<compile_context>
chip_gen: v5e
topology: v5e:2x2
jax: 0.10.0
libtpu: 0.0.40
codegen_flags: <defaults>
</compile_context>

<pallas_src>
import functools

import jax
import jax.numpy as jnp
from jax import lax
from jax.experimental import pallas as pl
from jax.experimental.pallas import tpu as pltpu

INPUT_SIZE = 38
HIDDEN_SIZE = 256
FC1_SIZE = 128
OUT_SIZE = 4
OUT_PAD = 128          # lane-dense output width; wrapper slices back to OUT_SIZE


def _lstm_head_kernel(x_ref, w_ih_ref, w_hh_ref, b_ref, w12_ref, b12_ref,
                      out_ref, h_scr, c_scr, *, seq_len, t_blk):
    """One grid step = one block of `t_blk` timesteps of the LSTM recurrence.

    Grid: (num_t_blocks,), dimension_semantics=("arbitrary",) -- sequential.

    x_ref:    [t_blk*Bp, F]  bf16  time-major slice for this block
    w_ih_ref: [F, 4H]        bf16  (weight_ih_l0^T)
    w_hh_ref: [H, 4H]        bf16  (weight_hh_l0^T)
    b_ref:    [1, 4H]        f32   (bias_ih_l0 + bias_hh_l0)
    w12_ref:  [H, OUT_PAD]   f32   fc1^T @ fc2^T, zero-padded to 128 lanes
    b12_ref:  [1, OUT_PAD]   f32   b1 @ fc2^T + b2, zero-padded
    out_ref:  [Bp, OUT_PAD]  f32   resident across the grid (constant index map)
    h_scr, c_scr: [Bp, H] f32 VMEM scratch; persists across grid steps.
    """
    t = pl.program_id(0)
    Bp = out_ref.shape[0]
    H = w_hh_ref.shape[0]

    @pl.when(t == 0)
    def _():
        h_scr[...] = jnp.zeros_like(h_scr)
        c_scr[...] = jnp.zeros_like(c_scr)

    # Hoisted input projection for the whole time block: one [t_blk*Bp, F] @ [F, 4H]
    # matmul + fused bias (recomputed per block; ~54x less traffic than materializing
    # the f32 gate slab for all T).
    gx = jnp.dot(x_ref[...], w_ih_ref[...],
                 preferred_element_type=jnp.float32) + b_ref[...]

    for j in range(t_blk):                       # short static loop -> fully unrolled
        step = t * t_blk + j

        @pl.when(step < seq_len)                 # mask zero-padded tail timesteps
        def _():
            h = h_scr[...]
            c = c_scr[...]
            gates = gx[j * Bp:(j + 1) * Bp, :] + jnp.dot(
                h.astype(jnp.bfloat16), w_hh_ref[...],
                preferred_element_type=jnp.float32)
            # PyTorch LSTM gate order: input, forget, cell(g), output.
            i_g = jax.nn.sigmoid(gates[:, 0 * H:1 * H])
            f_g = jax.nn.sigmoid(gates[:, 1 * H:2 * H])
            g_g = jnp.tanh(gates[:, 2 * H:3 * H])
            o_g = jax.nn.sigmoid(gates[:, 3 * H:4 * H])
            c_new = f_g * c + i_g * g_g
            h_new = o_g * jnp.tanh(c_new)
            c_scr[...] = c_new
            h_scr[...] = h_new

    @pl.when(t == pl.num_programs(0) - 1)
    def _():
        # fc2(fc1(h)) folded into a single f32 Linear (exact: no activation between).
        out_ref[...] = (jnp.dot(h_scr[...], w12_ref[...],
                                preferred_element_type=jnp.float32)
                        + b12_ref[...]).astype(out_ref.dtype)


def init_params(key, input_size=INPUT_SIZE, hidden_size=HIDDEN_SIZE):
    """Deterministic parameter init with PyTorch-style shapes and scale."""
    ks = jax.random.split(key, 8)
    k = 1.0 / jnp.sqrt(hidden_size)

    def u(key, shape, bound):
        return jax.random.uniform(key, shape, jnp.float32, -bound, bound)

    return {
        "w_ih": u(ks[0], (4 * hidden_size, input_size), k),   # weight_ih_l0
        "w_hh": u(ks[1], (4 * hidden_size, hidden_size), k),  # weight_hh_l0
        "b_ih": u(ks[2], (4 * hidden_size,), k),
        "b_hh": u(ks[3], (4 * hidden_size,), k),
        "w1": u(ks[4], (FC1_SIZE, hidden_size), 1.0 / jnp.sqrt(hidden_size)),
        "b1": u(ks[5], (FC1_SIZE,), 1.0 / jnp.sqrt(hidden_size)),
        "w2": u(ks[6], (OUT_SIZE, FC1_SIZE), 1.0 / jnp.sqrt(FC1_SIZE)),
        "b2": u(ks[7], (OUT_SIZE,), 1.0 / jnp.sqrt(FC1_SIZE)),
    }


def prepare_params(params):
    """One-time prep: transpose to [in,out], fold biases, fold fc1*fc2, pad head to 128 lanes."""
    H = params["w_hh"].shape[1]
    w1_t = params["w1"].T.astype(jnp.float32)            # [H, 128]
    w2_t = params["w2"].T.astype(jnp.float32)            # [128, 4]
    w12 = w1_t @ w2_t                                     # [H, 4]   exact fold (no act.)
    b12 = params["b1"].astype(jnp.float32) @ w2_t + params["b2"].astype(jnp.float32)
    w12_pad = jnp.zeros((H, OUT_PAD), jnp.float32).at[:, :OUT_SIZE].set(w12)
    b12_pad = jnp.zeros((1, OUT_PAD), jnp.float32).at[0, :OUT_SIZE].set(b12)
    return {
        "w_ih_t": params["w_ih"].T.astype(jnp.bfloat16),                      # [F, 4H]
        "w_hh_t": params["w_hh"].T.astype(jnp.bfloat16),                      # [H, 4H]
        "b": (params["b_ih"] + params["b_hh"]).reshape(1, 4 * H)
             .astype(jnp.float32),                                            # [1, 4H]
        "w12": w12_pad,                                                       # [H, 128]
        "b12": b12_pad,                                                       # [1, 128]
    }


@functools.partial(jax.jit, static_argnames=("t_block",))
def load_forecast_forward(x, prepared, *, t_block=4):
    """x: [B, T, F] float32 -> [B, 4] float32."""
    B, T, F = x.shape
    H = prepared["w_hh_t"].shape[0]
    Bp = ((B + 7) // 8) * 8                     # pad batch to sublane multiple
    t_blk = max(1, min(t_block, T))
    nb = pl.cdiv(T, t_blk)                      # grid length over time blocks
    Tpad = nb * t_blk

    x_tm = jnp.transpose(x, (1, 0, 2))          # [T, B, F] time-major
    x_tm = jnp.pad(x_tm, ((0, Tpad - T), (0, Bp - B), (0, 0)))
    x2d = x_tm.reshape(Tpad * Bp, F).astype(jnp.bfloat16)   # [Tpad*Bp, F]

    # VMEM budget from actual shapes (double-buffered operands + output + state scratch).
    blk_bytes = (2 * (t_blk * Bp * F * 2            # x block (bf16)
                      + F * 4 * H * 2               # w_ih (bf16)
                      + H * 4 * H * 2               # w_hh (bf16)
                      + 4 * H * 4                   # bias (f32)
                      + H * OUT_PAD * 4             # folded head weight (f32)
                      + OUT_PAD * 4                 # folded head bias (f32)
                      + Bp * OUT_PAD * 4)           # output slab (f32)
                 + 2 * Bp * H * 4)                  # h/c scratch (f32)
    vmem_limit = int(min(max(2 * blk_bytes, 4 * 2**20), 64 * 2**20))

    kernel = functools.partial(_lstm_head_kernel, seq_len=T, t_blk=t_blk)

    out = pl.pallas_call(
        kernel,
        out_shape=jax.ShapeDtypeStruct((Bp, OUT_PAD), jnp.float32),
        grid_spec=pltpu.PrefetchScalarGridSpec(
            num_scalar_prefetch=0,
            grid=(nb,),
            in_specs=[
                pl.BlockSpec((t_blk * Bp, F), lambda t: (t, 0)),     # x, streamed over T
                pl.BlockSpec((F, 4 * H), lambda t: (0, 0)),          # w_ih (resident)
                pl.BlockSpec((H, 4 * H), lambda t: (0, 0)),          # w_hh (resident)
                pl.BlockSpec((1, 4 * H), lambda t: (0, 0)),          # bias
                pl.BlockSpec((H, OUT_PAD), lambda t: (0, 0)),        # folded head weight
                pl.BlockSpec((1, OUT_PAD), lambda t: (0, 0)),        # folded head bias
            ],
            out_specs=pl.BlockSpec((Bp, OUT_PAD), lambda t: (0, 0)),
            scratch_shapes=[
                pltpu.VMEM((Bp, H), jnp.float32),    # h state
                pltpu.VMEM((Bp, H), jnp.float32),    # c state
            ],
        ),
        compiler_params=pltpu.CompilerParams(
            dimension_semantics=("arbitrary",),      # recurrence: sequential over T blocks
            vmem_limit_bytes=vmem_limit),
    )(x2d, prepared["w_ih_t"], prepared["w_hh_t"], prepared["b"],
      prepared["w12"], prepared["b12"])
    return out[:B, :OUT_SIZE]


def reference_forward(x, params):
    """Pure-JAX f32 reference matching torch.nn.LSTM + Linear semantics."""
    B = x.shape[0]
    H = params["w_hh"].shape[1]

    def step(carry, x_t):
        h, c = carry
        gates = (x_t @ params["w_ih"].T + h @ params["w_hh"].T
                 + params["b_ih"] + params["b_hh"])
        i = jax.nn.sigmoid(gates[:, 0 * H:1 * H])
        f = jax.nn.sigmoid(gates[:, 1 * H:2 * H])
        g = jnp.tanh(gates[:, 2 * H:3 * H])
        o = jax.nn.sigmoid(gates[:, 3 * H:4 * H])
        c_new = f * c + i * g
        h_new = o * jnp.tanh(c_new)
        return (h_new, c_new), None

    h0 = jnp.zeros((B, H), jnp.float32)
    c0 = jnp.zeros((B, H), jnp.float32)
    (h_last, _), _ = lax.scan(step, (h0, c0), jnp.transpose(x, (1, 0, 2)))
    y = h_last @ params["w1"].T + params["b1"]
    y = y @ params["w2"].T + params["b2"]
    return y


if __name__ == "__main__":
    key = jax.random.PRNGKey(0)
    k_param, k_x = jax.random.split(key)

    B, T = 2, 8
    params = init_params(k_param, input_size=INPUT_SIZE, hidden_size=HIDDEN_SIZE)
    prepared = prepare_params(params)
    x = jax.random.normal(k_x, (B, T, INPUT_SIZE), jnp.float32)

    out = load_forecast_forward(x, prepared, t_block=4)
    out = jax.block_until_ready(out)

    ref = reference_forward(x, params)
    assert out.shape == (B, OUT_SIZE), out.shape
    # bf16 matmul operands in the recurrence -> looser tolerance than pure f32.
    assert jnp.allclose(out, ref, atol=5e-2, rtol=5e-2), (
        f"max abs err = {jnp.max(jnp.abs(out - ref))}")

    print("KERNEL_OK")
</pallas_src>

<mosaic_0001>
module attributes {stable_mosaic.version = 11 : i64} {
  func.func @_lstm_head_kernel(%arg0: i32, %arg1: memref<32x38xbf16, #tpu.memory_space<vmem>>, %arg2: memref<38x1024xbf16, #tpu.memory_space<vmem>>, %arg3: memref<256x1024xbf16, #tpu.memory_space<vmem>>, %arg4: memref<1x1024xf32, #tpu.memory_space<vmem>>, %arg5: memref<256x128xf32, #tpu.memory_space<vmem>>, %arg6: memref<1x128xf32, #tpu.memory_space<vmem>>, %arg7: memref<8x128xf32, #tpu.memory_space<vmem>>, %arg8: memref<8x256xf32, #tpu.memory_space<vmem>>, %arg9: memref<8x256xf32, #tpu.memory_space<vmem>>) attributes {dimension_semantics = [#tpu.dimension_semantics<arbitrary>], iteration_bounds = array<i64: 2>, scalar_prefetch = 0 : i64, scratch_operands = 2 : i64, tpu.core_type = #tpu.core_type<tc>, window_params = [{transform_indices = @transform_0, window_bounds = array<i64: 32, 38>}, {pipeline_mode = #tpu.pipeline_mode<synchronous>, transform_indices = @transform_1, window_bounds = array<i64: 38, 1024>}, {pipeline_mode = #tpu.pipeline_mode<synchronous>, transform_indices = @transform_2, window_bounds = array<i64: 256, 1024>}, {pipeline_mode = #tpu.pipeline_mode<synchronous>, transform_indices = @transform_3, window_bounds = array<i64: 1, 1024>}, {pipeline_mode = #tpu.pipeline_mode<synchronous>, transform_indices = @transform_4, window_bounds = array<i64: 256, 128>}, {pipeline_mode = #tpu.pipeline_mode<synchronous>, transform_indices = @transform_5, window_bounds = array<i64: 1, 128>}, {pipeline_mode = #tpu.pipeline_mode<synchronous>, transform_indices = @transform_6, window_bounds = array<i64: 8, 128>}]} {
    %c0_i32 = arith.constant 0 : i32
    %0 = arith.cmpi eq, %arg0, %c0_i32 : i32
    %1 = arith.extui %0 : i1 to i32
    %c0_i32_0 = arith.constant 0 : i32
    %2 = arith.cmpi ne, %1, %c0_i32_0 : i32
    scf.if %2 {
      %cst_19 = arith.constant 0.000000e+00 : f32
      %32 = vector.broadcast %cst_19 : f32 to vector<8x256xf32>
      %c0_20 = arith.constant 0 : index
      %c0_21 = arith.constant 0 : index
      %33 = vector.load %arg8[%c0_20, %c0_21] : memref<8x256xf32, #tpu.memory_space<vmem>>, vector<8x256xf32>
      tpu.vector_store %arg8[%c0_20, %c0_21], %32 {strides = array<i32>} : memref<8x256xf32, #tpu.memory_space<vmem>>, vector<8x256xf32>,
      %cst_22 = arith.constant 0.000000e+00 : f32
      %34 = vector.broadcast %cst_22 : f32 to vector<8x256xf32>
      %c0_23 = arith.constant 0 : index
      %c0_24 = arith.constant 0 : index
      %35 = vector.load %arg9[%c0_23, %c0_24] : memref<8x256xf32, #tpu.memory_space<vmem>>, vector<8x256xf32>
      tpu.vector_store %arg9[%c0_23, %c0_24], %34 {strides = array<i32>} : memref<8x256xf32, #tpu.memory_space<vmem>>, vector<8x256xf32>,
    } else {
    }
    %c0 = arith.constant 0 : index
    %c0_1 = arith.constant 0 : index
    %3 = vector.load %arg1[%c0, %c0_1] : memref<32x38xbf16, #tpu.memory_space<vmem>>, vector<32x38xbf16>
    %c0_2 = arith.constant 0 : index
    %c0_3 = arith.constant 0 : index
    %4 = vector.load %arg2[%c0_2, %c0_3] : memref<38x1024xbf16, #tpu.memory_space<vmem>>, vector<38x1024xbf16>
    %cst = arith.constant dense<0.000000e+00> : vector<32x1024xf32>
    %5 = tpu.matmul %3, %4, %cst {dimension_numbers = #tpu.dot_dimension_numbers<[1], [0], [0], [1], [0, 0, 1, 1], [], []>} : vector<32x38xbf16>, vector<38x1024xbf16>, vector<32x1024xf32> -> vector<32x1024xf32>
    %c0_4 = arith.constant 0 : index
    %c0_5 = arith.constant 0 : index
    %6 = vector.load %arg4[%c0_4, %c0_5] : memref<1x1024xf32, #tpu.memory_space<vmem>>, vector<1x1024xf32>
    %7 = vector.broadcast %6 : vector<1x1024xf32> to vector<32x1024xf32>
    %8 = arith.addf %5, %7 : vector<32x1024xf32>
    %c4_i32 = arith.constant 4 : i32
    %9 = arith.muli %arg0, %c4_i32 : i32
    %c0_i32_6 = arith.constant 0 : i32
    %10 = arith.addi %9, %c0_i32_6 : i32
    %c8_i32 = arith.constant 8 : i32
    %11 = arith.cmpi slt, %10, %c8_i32 : i32
    %12 = arith.extui %11 : i1 to i32
    %c0_i32_7 = arith.constant 0 : i32
    %13 = arith.cmpi ne, %12, %c0_i32_7 : i32
    scf.if %13 {
      %c0_19 = arith.constant 0 : index
      %c0_20 = arith.constant 0 : index
      %32 = vector.load %arg8[%c0_19, %c0_20] : memref<8x256xf32, #tpu.memory_space<vmem>>, vector<8x256xf32>
      %c0_21 = arith.constant 0 : index
      %c0_22 = arith.constant 0 : index
      %33 = vector.load %arg9[%c0_21, %c0_22] : memref<8x256xf32, #tpu.memory_space<vmem>>, vector<8x256xf32>
      %34 = vector.extract_strided_slice %8 {offsets = [0, 0], sizes = [8, 1024], strides = [1, 1]} : vector<32x1024xf32> to vector<8x1024xf32>
      %35 = arith.truncf %32 : vector<8x256xf32> to vector<8x256xbf16>
      %c0_23 = arith.constant 0 : index
      %c0_24 = arith.constant 0 : index
      %36 = vector.load %arg3[%c0_23, %c0_24] : memref<256x1024xbf16, #tpu.memory_space<vmem>>, vector<256x1024xbf16>
      %cst_25 = arith.constant dense<0.000000e+00> : vector<8x1024xf32>
      %37 = tpu.matmul %35, %36, %cst_25 {dimension_numbers = #tpu.dot_dimension_numbers<[1], [0], [0], [1], [0, 0, 1, 1], [], []>} : vector<8x256xbf16>, vector<256x1024xbf16>, vector<8x1024xf32> -> vector<8x1024xf32>
      %38 = arith.addf %34, %37 : vector<8x1024xf32>
      %39 = vector.extract_strided_slice %38 {offsets = [0, 0], sizes = [8, 256], strides = [1, 1]} : vector<8x1024xf32> to vector<8x256xf32>
      %40 = arith.negf %39 : vector<8x256xf32>
      %41 = math.exp %40 : vector<8x256xf32>
      %cst_26 = arith.constant 1.000000e+00 : f32
      %42 = vector.broadcast %cst_26 : f32 to vector<8x256xf32>
      %43 = arith.addf %42, %41 : vector<8x256xf32>
      %44 = arith.divf %42, %43 : vector<8x256xf32>
      %45 = vector.extract_strided_slice %38 {offsets = [0, 256], sizes = [8, 256], strides = [1, 1]} : vector<8x1024xf32> to vector<8x256xf32>
      %46 = arith.negf %45 : vector<8x256xf32>
      %47 = math.exp %46 : vector<8x256xf32>
      %cst_27 = arith.constant 1.000000e+00 : f32
      %48 = vector.broadcast %cst_27 : f32 to vector<8x256xf32>
      %49 = arith.addf %48, %47 : vector<8x256xf32>
      %50 = arith.divf %48, %49 : vector<8x256xf32>
      %51 = vector.extract_strided_slice %38 {offsets = [0, 512], sizes = [8, 256], strides = [1, 1]} : vector<8x1024xf32> to vector<8x256xf32>
      %52 = math.tanh %51 : vector<8x256xf32>
      %53 = vector.extract_strided_slice %38 {offsets = [0, 768], sizes = [8, 256], strides = [1, 1]} : vector<8x1024xf32> to vector<8x256xf32>
      %54 = arith.negf %53 : vector<8x256xf32>
      %55 = math.exp %54 : vector<8x256xf32>
      %cst_28 = arith.constant 1.000000e+00 : f32
      %56 = vector.broadcast %cst_28 : f32 to vector<8x256xf32>
      %57 = arith.addf %56, %55 : vector<8x256xf32>
      %58 = arith.divf %56, %57 : vector<8x256xf32>
      %59 = arith.mulf %50, %33 : vector<8x256xf32>
      %60 = arith.mulf %44, %52 : vector<8x256xf32>
      %61 = arith.addf %59, %60 : vector<8x256xf32>
      %62 = math.tanh %61 : vector<8x256xf32>
      %63 = arith.mulf %58, %62 : vector<8x256xf32>
      %c0_29 = arith.constant 0 : index
      %c0_30 = arith.constant 0 : index
      %64 = vector.load %arg9[%c0_29, %c0_30] : memref<8x256xf32, #tpu.memory_space<vmem>>, vector<8x256xf32>
      tpu.vector_store %arg9[%c0_29, %c0_30], %61 {strides = array<i32>} : memref<8x256xf32, #tpu.memory_space<vmem>>, vector<8x256xf32>,
      %c0_31 = arith.constant 0 : index
      %c0_32 = arith.constant 0 : index
      %65 = vector.load %arg8[%c0_31, %c0_32] : memref<8x256xf32, #tpu.memory_space<vmem>>, vector<8x256xf32>
      tpu.vector_store %arg8[%c0_31, %c0_32], %63 {strides = array<i32>} : memref<8x256xf32, #tpu.memory_space<vmem>>, vector<8x256xf32>,
    } else {
    }
    %c4_i32_8 = arith.constant 4 : i32
    %14 = arith.muli %arg0, %c4_i32_8 : i32
    %c1_i32 = arith.constant 1 : i32
    %15 = arith.addi %14, %c1_i32 : i32
    %c8_i32_9 = arith.constant 8 : i32
    %16 = arith.cmpi slt, %15, %c8_i32_9 : i32
    %17 = arith.extui %16 : i1 to i32
    %c0_i32_10 = arith.constant 0 : i32
    %18 = arith.cmpi ne, %17, %c0_i32_10 : i32
    scf.if %18 {
      %c0_19 = arith.constant 0 : index
      %c0_20 = arith.constant 0 : index
      %32 = vector.load %arg8[%c0_19, %c0_20] : memref<8x256xf32, #tpu.memory_space<vmem>>, vector<8x256xf32>
      %c0_21 = arith.constant 0 : index
      %c0_22 = arith.constant 0 : index
      %33 = vector.load %arg9[%c0_21, %c0_22] : memref<8x256xf32, #tpu.memory_space<vmem>>, vector<8x256xf32>
      %34 = vector.extract_strided_slice %8 {offsets = [8, 0], sizes = [8, 1024], strides = [1, 1]} : vector<32x1024xf32> to vector<8x1024xf32>
      %35 = arith.truncf %32 : vector<8x256xf32> to vector<8x256xbf16>
      %c0_23 = arith.constant 0 : index
      %c0_24 = arith.constant 0 : index
      %36 = vector.load %arg3[%c0_23, %c0_24] : memref<256x1024xbf16, #tpu.memory_space<vmem>>, vector<256x1024xbf16>
      %cst_25 = arith.constant dense<0.000000e+00> : vector<8x1024xf32>
      %37 = tpu.matmul %35, %36, %cst_25 {dimension_numbers = #tpu.dot_dimension_numbers<[1], [0], [0], [1], [0, 0, 1, 1], [], []>} : vector<8x256xbf16>, vector<256x1024xbf16>, vector<8x1024xf32> -> vector<8x1024xf32>
      %38 = arith.addf %34, %37 : vector<8x1024xf32>
      %39 = vector.extract_strided_slice %38 {offsets = [0, 0], sizes = [8, 256], strides = [1, 1]} : vector<8x1024xf32> to vector<8x256xf32>
      %40 = arith.negf %39 : vector<8x256xf32>
      %41 = math.exp %40 : vector<8x256xf32>
      %cst_26 = arith.constant 1.000000e+00 : f32
      %42 = vector.broadcast %cst_26 : f32 to vector<8x256xf32>
      %43 = arith.addf %42, %41 : vector<8x256xf32>
      %44 = arith.divf %42, %43 : vector<8x256xf32>
      %45 = vector.extract_strided_slice %38 {offsets = [0, 256], sizes = [8, 256], strides = [1, 1]} : vector<8x1024xf32> to vector<8x256xf32>
      %46 = arith.negf %45 : vector<8x256xf32>
      %47 = math.exp %46 : vector<8x256xf32>
      %cst_27 = arith.constant 1.000000e+00 : f32
      %48 = vector.broadcast %cst_27 : f32 to vector<8x256xf32>
      %49 = arith.addf %48, %47 : vector<8x256xf32>
      %50 = arith.divf %48, %49 : vector<8x256xf32>
      %51 = vector.extract_strided_slice %38 {offsets = [0, 512], sizes = [8, 256], strides = [1, 1]} : vector<8x1024xf32> to vector<8x256xf32>
      %52 = math.tanh %51 : vector<8x256xf32>
      %53 = vector.extract_strided_slice %38 {offsets = [0, 768], sizes = [8, 256], strides = [1, 1]} : vector<8x1024xf32> to vector<8x256xf32>
      %54 = arith.negf %53 : vector<8x256xf32>
      %55 = math.exp %54 : vector<8x256xf32>
      %cst_28 = arith.constant 1.000000e+00 : f32
      %56 = vector.broadcast %cst_28 : f32 to vector<8x256xf32>
      %57 = arith.addf %56, %55 : vector<8x256xf32>
      %58 = arith.divf %56, %57 : vector<8x256xf32>
      %59 = arith.mulf %50, %33 : vector<8x256xf32>
      %60 = arith.mulf %44, %52 : vector<8x256xf32>
      %61 = arith.addf %59, %60 : vector<8x256xf32>
      %62 = math.tanh %61 : vector<8x256xf32>
      %63 = arith.mulf %58, %62 : vector<8x256xf32>
      %c0_29 = arith.constant 0 : index
      %c0_30 = arith.constant 0 : index
      %64 = vector.load %arg9[%c0_29, %c0_30] : memref<8x256xf32, #tpu.memory_space<vmem>>, vector<8x256xf32>
      tpu.vector_store %arg9[%c0_29, %c0_30], %61 {strides = array<i32>} : memref<8x256xf32, #tpu.memory_space<vmem>>, vector<8x256xf32>,
      %c0_31 = arith.constant 0 : index
      %c0_32 = arith.constant 0 : index
      %65 = vector.load %arg8[%c0_31, %c0_32] : memref<8x256xf32, #tpu.memory_space<vmem>>, vector<8x256xf32>
      tpu.vector_store %arg8[%c0_31, %c0_32], %63 {strides = array<i32>} : memref<8x256xf32, #tpu.memory_space<vmem>>, vector<8x256xf32>,
    } else {
    }
    %c4_i32_11 = arith.constant 4 : i32
    %19 = arith.muli %arg0, %c4_i32_11 : i32
    %c2_i32 = arith.constant 2 : i32
    %20 = arith.addi %19, %c2_i32 : i32
    %c8_i32_12 = arith.constant 8 : i32
    %21 = arith.cmpi slt, %20, %c8_i32_12 : i32
    %22 = arith.extui %21 : i1 to i32
    %c0_i32_13 = arith.constant 0 : i32
    %23 = arith.cmpi ne, %22, %c0_i32_13 : i32
    scf.if %23 {
      %c0_19 = arith.constant 0 : index
      %c0_20 = arith.constant 0 : index
      %32 = vector.load %arg8[%c0_19, %c0_20] : memref<8x256xf32, #tpu.memory_space<vmem>>, vector<8x256xf32>
      %c0_21 = arith.constant 0 : index
      %c0_22 = arith.constant 0 : index
      %33 = vector.load %arg9[%c0_21, %c0_22] : memref<8x256xf32, #tpu.memory_space<vmem>>, vector<8x256xf32>
      %34 = vector.extract_strided_slice %8 {offsets = [16, 0], sizes = [8, 1024], strides = [1, 1]} : vector<32x1024xf32> to vector<8x1024xf32>
      %35 = arith.truncf %32 : vector<8x256xf32> to vector<8x256xbf16>
      %c0_23 = arith.constant 0 : index
      %c0_24 = arith.constant 0 : index
      %36 = vector.load %arg3[%c0_23, %c0_24] : memref<256x1024xbf16, #tpu.memory_space<vmem>>, vector<256x1024xbf16>
      %cst_25 = arith.constant dense<0.000000e+00> : vector<8x1024xf32>
      %37 = tpu.matmul %35, %36, %cst_25 {dimension_numbers = #tpu.dot_dimension_numbers<[1], [0], [0], [1], [0, 0, 1, 1], [], []>} : vector<8x256xbf16>, vector<256x1024xbf16>, vector<8x1024xf32> -> vector<8x1024xf32>
      %38 = arith.addf %34, %37 : vector<8x1024xf32>
      %39 = vector.extract_strided_slice %38 {offsets = [0, 0], sizes = [8, 256], strides = [1, 1]} : vector<8x1024xf32> to vector<8x256xf32>
      %40 = arith.negf %39 : vector<8x256xf32>
      %41 = math.exp %40 : vector<8x256xf32>
      %cst_26 = arith.constant 1.000000e+00 : f32
      %42 = vector.broadcast %cst_26 : f32 to vector<8x256xf32>
      %43 = arith.addf %42, %41 : vector<8x256xf32>
      %44 = arith.divf %42, %43 : vector<8x256xf32>
      %45 = vector.extract_strided_slice %38 {offsets = [0, 256], sizes = [8, 256], strides = [1, 1]} : vector<8x1024xf32> to vector<8x256xf32>
      %46 = arith.negf %45 : vector<8x256xf32>
      %47 = math.exp %46 : vector<8x256xf32>
      %cst_27 = arith.constant 1.000000e+00 : f32
      %48 = vector.broadcast %cst_27 : f32 to vector<8x256xf32>
      %49 = arith.addf %48, %47 : vector<8x256xf32>
      %50 = arith.divf %48, %49 : vector<8x256xf32>
      %51 = vector.extract_strided_slice %38 {offsets = [0, 512], sizes = [8, 256], strides = [1, 1]} : vector<8x1024xf32> to vector<8x256xf32>
      %52 = math.tanh %51 : vector<8x256xf32>
      %53 = vector.extract_strided_slice %38 {offsets = [0, 768], sizes = [8, 256], strides = [1, 1]} : vector<8x1024xf32> to vector<8x256xf32>
      %54 = arith.negf %53 : vector<8x256xf32>
      %55 = math.exp %54 : vector<8x256xf32>
      %cst_28 = arith.constant 1.000000e+00 : f32
      %56 = vector.broadcast %cst_28 : f32 to vector<8x256xf32>
      %57 = arith.addf %56, %55 : vector<8x256xf32>
      %58 = arith.divf %56, %57 : vector<8x256xf32>
      %59 = arith.mulf %50, %33 : vector<8x256xf32>
      %60 = arith.mulf %44, %52 : vector<8x256xf32>
      %61 = arith.addf %59, %60 : vector<8x256xf32>
      %62 = math.tanh %61 : vector<8x256xf32>
      %63 = arith.mulf %58, %62 : vector<8x256xf32>
      %c0_29 = arith.constant 0 : index
      %c0_30 = arith.constant 0 : index
      %64 = vector.load %arg9[%c0_29, %c0_30] : memref<8x256xf32, #tpu.memory_space<vmem>>, vector<8x256xf32>
      tpu.vector_store %arg9[%c0_29, %c0_30], %61 {strides = array<i32>} : memref<8x256xf32, #tpu.memory_space<vmem>>, vector<8x256xf32>,
      %c0_31 = arith.constant 0 : index
      %c0_32 = arith.constant 0 : index
      %65 = vector.load %arg8[%c0_31, %c0_32] : memref<8x256xf32, #tpu.memory_space<vmem>>, vector<8x256xf32>
      tpu.vector_store %arg8[%c0_31, %c0_32], %63 {strides = array<i32>} : memref<8x256xf32, #tpu.memory_space<vmem>>, vector<8x256xf32>,
    } else {
    }
    %c4_i32_14 = arith.constant 4 : i32
    %24 = arith.muli %arg0, %c4_i32_14 : i32
    %c3_i32 = arith.constant 3 : i32
    %25 = arith.addi %24, %c3_i32 : i32
    %c8_i32_15 = arith.constant 8 : i32
    %26 = arith.cmpi slt, %25, %c8_i32_15 : i32
    %27 = arith.extui %26 : i1 to i32
    %c0_i32_16 = arith.constant 0 : i32
    %28 = arith.cmpi ne, %27, %c0_i32_16 : i32
    scf.if %28 {
      %c0_19 = arith.constant 0 : index
      %c0_20 = arith.constant 0 : index
      %32 = vector.load %arg8[%c0_19, %c0_20] : memref<8x256xf32, #tpu.memory_space<vmem>>, vector<8x256xf32>
      %c0_21 = arith.constant 0 : index
      %c0_22 = arith.constant 0 : index
      %33 = vector.load %arg9[%c0_21, %c0_22] : memref<8x256xf32, #tpu.memory_space<vmem>>, vector<8x256xf32>
      %34 = vector.extract_strided_slice %8 {offsets = [24, 0], sizes = [8, 1024], strides = [1, 1]} : vector<32x1024xf32> to vector<8x1024xf32>
      %35 = arith.truncf %32 : vector<8x256xf32> to vector<8x256xbf16>
      %c0_23 = arith.constant 0 : index
      %c0_24 = arith.constant 0 : index
      %36 = vector.load %arg3[%c0_23, %c0_24] : memref<256x1024xbf16, #tpu.memory_space<vmem>>, vector<256x1024xbf16>
      %cst_25 = arith.constant dense<0.000000e+00> : vector<8x1024xf32>
      %37 = tpu.matmul %35, %36, %cst_25 {dimension_numbers = #tpu.dot_dimension_numbers<[1], [0], [0], [1], [0, 0, 1, 1], [], []>} : vector<8x256xbf16>, vector<256x1024xbf16>, vector<8x1024xf32> -> vector<8x1024xf32>
      %38 = arith.addf %34, %37 : vector<8x1024xf32>
      %39 = vector.extract_strided_slice %38 {offsets = [0, 0], sizes = [8, 256], strides = [1, 1]} : vector<8x1024xf32> to vector<8x256xf32>
      %40 = arith.negf %39 : vector<8x256xf32>
      %41 = math.exp %40 : vector<8x256xf32>
      %cst_26 = arith.constant 1.000000e+00 : f32
      %42 = vector.broadcast %cst_26 : f32 to vector<8x256xf32>
      %43 = arith.addf %42, %41 : vector<8x256xf32>
      %44 = arith.divf %42, %43 : vector<8x256xf32>
      %45 = vector.extract_strided_slice %38 {offsets = [0, 256], sizes = [8, 256], strides = [1, 1]} : vector<8x1024xf32> to vector<8x256xf32>
      %46 = arith.negf %45 : vector<8x256xf32>
      %47 = math.exp %46 : vector<8x256xf32>
      %cst_27 = arith.constant 1.000000e+00 : f32
      %48 = vector.broadcast %cst_27 : f32 to vector<8x256xf32>
      %49 = arith.addf %48, %47 : vector<8x256xf32>
      %50 = arith.divf %48, %49 : vector<8x256xf32>
      %51 = vector.extract_strided_slice %38 {offsets = [0, 512], sizes = [8, 256], strides = [1, 1]} : vector<8x1024xf32> to vector<8x256xf32>
      %52 = math.tanh %51 : vector<8x256xf32>
      %53 = vector.extract_strided_slice %38 {offsets = [0, 768], sizes = [8, 256], strides = [1, 1]} : vector<8x1024xf32> to vector<8x256xf32>
      %54 = arith.negf %53 : vector<8x256xf32>
      %55 = math.exp %54 : vector<8x256xf32>
      %cst_28 = arith.constant 1.000000e+00 : f32
      %56 = vector.broadcast %cst_28 : f32 to vector<8x256xf32>
      %57 = arith.addf %56, %55 : vector<8x256xf32>
      %58 = arith.divf %56, %57 : vector<8x256xf32>
      %59 = arith.mulf %50, %33 : vector<8x256xf32>
      %60 = arith.mulf %44, %52 : vector<8x256xf32>
      %61 = arith.addf %59, %60 : vector<8x256xf32>
      %62 = math.tanh %61 : vector<8x256xf32>
      %63 = arith.mulf %58, %62 : vector<8x256xf32>
      %c0_29 = arith.constant 0 : index
      %c0_30 = arith.constant 0 : index
      %64 = vector.load %arg9[%c0_29, %c0_30] : memref<8x256xf32, #tpu.memory_space<vmem>>, vector<8x256xf32>
      tpu.vector_store %arg9[%c0_29, %c0_30], %61 {strides = array<i32>} : memref<8x256xf32, #tpu.memory_space<vmem>>, vector<8x256xf32>,
      %c0_31 = arith.constant 0 : index
      %c0_32 = arith.constant 0 : index
      %65 = vector.load %arg8[%c0_31, %c0_32] : memref<8x256xf32, #tpu.memory_space<vmem>>, vector<8x256xf32>
      tpu.vector_store %arg8[%c0_31, %c0_32], %63 {strides = array<i32>} : memref<8x256xf32, #tpu.memory_space<vmem>>, vector<8x256xf32>,
    } else {
    }
    %c1_i32_17 = arith.constant 1 : i32
    %29 = arith.cmpi eq, %arg0, %c1_i32_17 : i32
    %30 = arith.extui %29 : i1 to i32
    %c0_i32_18 = arith.constant 0 : i32
    %31 = arith.cmpi ne, %30, %c0_i32_18 : i32
    scf.if %31 {
      %c0_19 = arith.constant 0 : index
      %c0_20 = arith.constant 0 : index
      %32 = vector.load %arg8[%c0_19, %c0_20] : memref<8x256xf32, #tpu.memory_space<vmem>>, vector<8x256xf32>
      %c0_21 = arith.constant 0 : index
      %c0_22 = arith.constant 0 : index
      %33 = vector.load %arg5[%c0_21, %c0_22] : memref<256x128xf32, #tpu.memory_space<vmem>>, vector<256x128xf32>
      %cst_23 = arith.constant dense<0.000000e+00> : vector<8x128xf32>
      %34 = tpu.matmul %32, %33, %cst_23 {dimension_numbers = #tpu.dot_dimension_numbers<[1], [0], [0], [1], [0, 0, 1, 1], [], []>} : vector<8x256xf32>, vector<256x128xf32>, vector<8x128xf32> -> vector<8x128xf32>
      %c0_24 = arith.constant 0 : index
      %c0_25 = arith.constant 0 : index
      %35 = vector.load %arg6[%c0_24, %c0_25] : memref<1x128xf32, #tpu.memory_space<vmem>>, vector<1x128xf32>
      %36 = vector.broadcast %35 : vector<1x128xf32> to vector<8x128xf32>
      %37 = arith.addf %34, %36 : vector<8x128xf32>
      %c0_26 = arith.constant 0 : index
      %c0_27 = arith.constant 0 : index
      %38 = vector.load %arg7[%c0_26, %c0_27] : memref<8x128xf32, #tpu.memory_space<vmem>>, vector<8x128xf32>
      tpu.vector_store %arg7[%c0_26, %c0_27], %37 {strides = array<i32>} : memref<8x128xf32, #tpu.memory_space<vmem>>, vector<8x128xf32>,
    } else {
    }
    return
  }
  func.func @transform_0(%arg0: i32) -> (i32, i32) {
    %c0_i32 = arith.constant 0 : i32
    %c0_i32_0 = arith.constant 0 : i32
    return %arg0, %c0_i32 : i32, i32
  }
  func.func @transform_1(%arg0: i32) -> (i32, i32) {
    %c0_i32 = arith.constant 0 : i32
    %c0_i32_0 = arith.constant 0 : i32
    %c0_i32_1 = arith.constant 0 : i32
    return %c0_i32, %c0_i32_0 : i32, i32
  }
  func.func @transform_2(%arg0: i32) -> (i32, i32) {
    %c0_i32 = arith.constant 0 : i32
    %c0_i32_0 = arith.constant 0 : i32
    %c0_i32_1 = arith.constant 0 : i32
    return %c0_i32, %c0_i32_0 : i32, i32
  }
  func.func @transform_3(%arg0: i32) -> (i32, i32) {
    %c0_i32 = arith.constant 0 : i32
    %c0_i32_0 = arith.constant 0 : i32
    %c0_i32_1 = arith.constant 0 : i32
    return %c0_i32, %c0_i32_0 : i32, i32
  }
  func.func @transform_4(%arg0: i32) -> (i32, i32) {
    %c0_i32 = arith.constant 0 : i32
    %c0_i32_0 = arith.constant 0 : i32
    %c0_i32_1 = arith.constant 0 : i32
    return %c0_i32, %c0_i32_0 : i32, i32
  }
  func.func @transform_5(%arg0: i32) -> (i32, i32) {
    %c0_i32 = arith.constant 0 : i32
    %c0_i32_0 = arith.constant 0 : i32
    %c0_i32_1 = arith.constant 0 : i32
    return %c0_i32, %c0_i32_0 : i32, i32
  }
  func.func @transform_6(%arg0: i32) -> (i32, i32) {
    %c0_i32 = arith.constant 0 : i32
    %c0_i32_0 = arith.constant 0 : i32
    %c0_i32_1 = arith.constant 0 : i32
    return %c0_i32, %c0_i32_0 : i32, i32
  }
}

</mosaic_0001>

<bundles_post_ra>
// kernel: load_forecast_forward.1
= control target key start
LH: loop header
LB: loop body
LE: loop exit
PB: predicated region body
PF: predicated region fallthrough
CT: control target
= control target key end

     0   :  { %11 = vsyncpa [#allocation5], 0  ;;  %s8801_s0 = inlined_call_operand.vmem [shape: bf16[64,38], index: 0, kind: input, shape index: {}]   ;;  %s8802_s1 = inlined_call_operand.hbm [shape: bf16[38,1024], index: 1, kind: input, shape index: {}]   ;;  %s8803_s2 = inlined_call_operand.hbm [shape: bf16[256,1024], index: 2, kind: input, shape index: {}]   ;;  %s8804_s3 = inlined_call_operand.vmem [shape: f32[1,1024], index: 3, kind: input, shape index: {}]   ;;  %s8805_s4 = inlined_call_operand.hbm [shape: f32[256,128], index: 4, kind: input, shape index: {}]   ;;  %s8806_s5 = inlined_call_operand.vmem [shape: f32[1,128], index: 5, kind: input, shape index: {}]   ;;  %s8807_s6 = inlined_call_operand.vmem [shape: f32[8,128], index: 6, kind: output, shape index: {}]  }
   0x1   :  { %12 = vsyncpa [#allocation7], 0  ;;  %s8309_s21 = smov 0  }
   0x2 LB: > { %s8315_s22 = sadd.s32 4294967295, %s8264_s21   ;;  %p5277_p0 = scmp.ge.s32.totalorder %s8264_s21, 1  ;;  %s8264_s21 = sphi %s8309_s21, %s18_s21  }
   0x3   : > { %p175_p1 = scmp.lt.s32.totalorder %s8264_s21, 3  ;;  %p5278_p2 = scmp.ne.s32.totalorder %s8315_s22, 0 }
   0x4   : > { %p8009_p3 = scmp.eq.s32.totalorder %s8315_s22, 0  ;;  %s200_s25 = sshll.u32 %s8803_s2, 4  ;;  %s201_s25 = int_to_ptr.hbm [resolvable:$true] %s200_s25 }
   0x5   : > { %p8324_p4 = pnand %p5277_p0, %p175_p1  ;;  %s186_s29 = sshll.u32 %s8802_s1, 4  ;;  %s187_s29 = int_to_ptr.hbm [resolvable:$true] %s186_s29 }
   0x6   : > { %s8266_s30 = smov [#allocation6]   ;;  %s8267_s9 = smov [#allocation4]  }
   0x7   : > { %p7999_p5 = pneg %p8324_p4  ;;  %s202_s7 = sshll.u32 %s8266_s30, 4  ;;  %s203_s7 = int_to_ptr.vmem [resolvable:$true] %s202_s7 }
   0x8   : > { %s188_s10 = sshll.u32 %s8267_s9, 4  ;;  %s217_s13 = sshll.u32 %s8805_s4, 4  ;;  %s189_s10 = int_to_ptr.vmem [resolvable:$true] %s188_s10  ;;  %s218_s13 = int_to_ptr.hbm [resolvable:$true] %s217_s13 }
   0x9   : > { %p8335_p6 = pnand %p8009_p3, %p7999_p5  ;;  %s8268_s14 = smov 512  }
   0xa   : > { %s8269_s15 = smov 32   ;;  %s8270_s16 = smov [#allocation8]  }
   0xb   : > { %8005 = dma.hbm_to_vmem [thread:$0]  (!%p8335_p6), %s201_s25, 16384, %s203_s7, [#allocation7], %s8268_s14, %s8268_s14, %s8269_s15  }
   0xc   : > { %8002 = dma.hbm_to_vmem [thread:$0]  (!%p8335_p6), %s187_s29, 2560, %s189_s10, [#allocation5], %s8268_s14, %s8268_s14, %s8269_s15  }
   0xd   : > { %s219_s17 = sshll.u32 %s8270_s16, 4  ;;  %s8271_s18 = smov 128   ;;  %s220_s17 = int_to_ptr.vmem [resolvable:$true] %s219_s17 }
   0xe   : > { %s8272_s19 = smov 8   ;;  %247 = sbr.rel (%p8324_p4) target bundleno = 1637 (0x665), region = 44 }
   0xf   : > { %8008 = dma.hbm_to_vmem [thread:$0]  (!%p8335_p6), %s218_s13, 4096, %s220_s17, [#allocation7], %s8271_s18, %s8271_s18, %s8272_s19  }
  0x13   : > { %8255 = dma.done.wait (%p8009_p3), [#allocation5], 2560  }
  0x14   : > { %8257 = vsyncadd (%p8009_p3), [#allocation5], 4294964736 }
  0x15   : > { %8259 = dma.done.wait (%p8009_p3), [#allocation7], 20480  }
  0x16   : > { %8261 = vsyncadd (%p8009_p3), [#allocation7], 4294946816  ;;  %s8359_s20 = sshll.u32 %s8315_s22, 2 }
  0x17   : > { %p284_p7 = scmp.lt.s32.totalorder %s8359_s20, 7 }
  0x18   : > { %293 = sbr.rel (%p5278_p2) target bundleno = 34 (0x22), region = 60 }
  0x19   : > { %s285_s23 = scalar_select %p284_p7, %s8359_s20, 7 }
  0x1b   : > { %s5287_s24 = sshll.u32 %s285_s23, 2 }
  0x1c   : > { %s8366_s27 = scalar_lea.vmem %s8801_s0, %s5287_s24 }
  0x1d   : > { %v8273_v0 = vmov 0.0  }
  0x1e   : > { %294 = vst [vmem:[#allocation2] sm:$0xff] %v8273_v0 }
  0x1f   : > { %295 = vst [vmem:[#allocation2 + $0x8] sm:$0xff] %v8273_v0 }
  0x20   : > { %296 = vst [vmem:[#allocation3 + $0x8] sm:$0xff] %v8273_v0 }
  0x21   : > { %297 = vst [vmem:[#allocation3] sm:$0xff] %v8273_v0 }
  0x22 PF: > { %v318_v1 = vld [vmem:[#allocation4 + $0x80] sm:$0x77]  ;;  %v319_v2 = vld [vmem:[#allocation4 + $0x88] sm:$0x77]  ;;  %vm457_vm0 = vcmask 1042432   ;;  %vm450_vm1 = vcmask 310272  }
  0x23   : > { %v402_v3 = vunpack.c.l.b16 %v318_v1  ;;  %v403_v4 = vunpack.c.h.b16 %v318_v1  ;;  %v404_v5 = vunpack.c.l.b16 %v319_v2  ;;  %v405_v6 = vunpack.c.h.b16 %v319_v2  ;;  %v5331_v7 = vld [vmem:[#allocation4 + $0x40] sm:$0xf]  ;;  %v7467_v13 = vld [vmem:[#allocation4 + $0x44] sm:$0xf]  ;;  %v5339_v15 = vld [vmem:[#allocation4 + $0x48] sm:$0xf] }
  0x24   : > { %v7471_v8 = vld [vmem:[#allocation4 + $0x5c] sm:$0xf0]  ;;  %v5333_v14 = vld [vmem:[#allocation4 + $0x60] sm:$0xf0]  ;;  %v7472_v16 = vld [vmem:[#allocation4 + $0x64] sm:$0xf0] }
  0x25   : > { %v426_v9 = vpack.c.b16 %v402_v3, %v402_v3  ;;  %v427_v10 = vpack.c.b16 %v403_v4, %v403_v4  ;;  %v428_v11 = vpack.c.b16 %v404_v5, %v404_v5  ;;  %v429_v12 = vpack.c.b16 %v405_v6, %v405_v6  ;;  %v7468_v17 = vld [vmem:[#allocation4 + $0x4c] sm:$0xf]  ;;  %v5299_v23 = vld [vmem:[#allocation4] sm:$0xf]  ;;  %v7459_v27 = vld [vmem:[#allocation4 + $0x4] sm:$0xf] }
  0x26   : > { %v5341_v18 = vld [vmem:[#allocation4 + $0x68] sm:$0xf0]  ;;  %v5332_v24 = vor.u32 %v7471_v8, %v5331_v7  ;;  %v5336_v25 = vor.u32 %v7467_v13, %v5333_v14  ;;  %v7463_v26 = vld [vmem:[#allocation4 + $0x1c] sm:$0xf0]  ;;  %v5301_v28 = vld [vmem:[#allocation4 + $0x20] sm:$0xf0]  ;;  %v5340_v29 = vor.u32 %v7472_v16, %v5339_v15 }
  0x27   : > { %v459_v19 = vsel %vm457_vm0, %v426_v9, 0  ;;  %v462_v20 = vsel %vm457_vm0, %v427_v10, 0  ;;  %v465_v21 = vsel %vm457_vm0, %v428_v11, 0  ;;  %v468_v22 = vsel %vm457_vm0, %v429_v12, 0  ;;  %v5307_v31 = vld [vmem:[#allocation4 + $0x8] sm:$0xf] }
  0x28   : > { %487 = vmatpush.bf16.msra.mxu0 %v459_v19  ;;  %506 = vmatpush.bf16.msra.mxu1 %v462_v20  ;;  %v5344_v30 = vor.u32 %v7468_v17, %v5341_v18  ;;  %v321_v32 = vld [vmem:[#allocation4 + $0x98] sm:$0x77]  ;;  %v320_v33 = vld [vmem:[#allocation4 + $0x90] sm:$0x77]  ;;  %v7464_v34 = vld [vmem:[#allocation4 + $0x24] sm:$0xf0]  ;;  %v5300_v41 = vor.u32 %v7463_v26, %v5299_v23  ;;  %v5304_v42 = vor.u32 %v7459_v27, %v5301_v28 }
  0x29   : > { %525 = vmatpush.bf16.msra.mxu2 %v465_v21  ;;  %544 = vmatpush.bf16.msra.mxu3 %v468_v22  ;;  %v7460_v35 = vld [vmem:[#allocation4 + $0xc] sm:$0xf]  ;;  %v408_v37 = vunpack.c.l.b16 %v321_v32  ;;  %v409_v38 = vunpack.c.h.b16 %v321_v32  ;;  %v406_v39 = vunpack.c.l.b16 %v320_v33  ;;  %v407_v40 = vunpack.c.h.b16 %v320_v33  ;;  %v7457_v47 = vld [vmem:[%s8366_s27] sm:$0xff]  ;;  %v5355_v50 = vld [vmem:[#allocation4 + $0x58] sm:$0xf]  ;;  %p5378_p8 = scmp.ge.s32.totalorder %s8359_s20, 8 }
  0x2a   : > { %v5309_v36 = vld [vmem:[#allocation4 + $0x28] sm:$0xf0]  ;;  %v5308_v45 = vor.u32 %v7464_v34, %v5307_v31  ;;  %v7474_v51 = vld [vmem:[#allocation4 + $0x74] sm:$0xf0]  ;;  %v7470_v54 = vld [vmem:[#allocation4 + $0x5c] sm:$0xf] }
  0x2b   : > { %v432_v43 = vpack.c.b16 %v408_v37, %v408_v37  ;;  %v433_v44 = vpack.c.b16 %v409_v38, %v409_v38  ;;  %v5312_v46 = vor.u32 %v7460_v35, %v5309_v36  ;;  %v430_v48 = vpack.c.b16 %v406_v39, %v406_v39  ;;  %v5357_v55 = vld [vmem:[#allocation4 + $0x78] sm:$0xf0]  ;;  %v5347_v56 = vld [vmem:[#allocation4 + $0x50] sm:$0xf]  ;;  %v7469_v58 = vld [vmem:[#allocation4 + $0x54] sm:$0xf] }
  0x2c   : > { %488 = vmatpush.bf16.msra.mxu0 %v5332_v24  ;;  %507 = vmatpush.bf16.msra.mxu1 %v5336_v25  ;;  %v431_v49 = vpack.c.b16 %v407_v40, %v407_v40  ;;  %v7473_v57 = vld [vmem:[#allocation4 + $0x6c] sm:$0xf0]  ;;  %v5356_v61 = vor.u32 %v7474_v51, %v5355_v50  ;;  %v5360_v62 = vor.u32 %v7470_v54, %v5357_v55  ;;  %v5349_v63 = vld [vmem:[#allocation4 + $0x70] sm:$0xf0]  ;;  %v5323_v0 = vld [vmem:[#allocation4 + $0x18] sm:$0xf] }
  0x2d   : > { %526 = vmatpush.bf16.msra.mxu2 %v5340_v29  ;;  %545 = vmatpush.bf16.msra.mxu3 %v5344_v30  ;;  %v477_v52 = vsel %vm457_vm0, %v432_v43, 0  ;;  %v480_v53 = vsel %vm457_vm0, %v433_v44, 0  ;;  %v471_v59 = vsel %vm457_vm0, %v430_v48, 0  ;;  %v7466_v1 = vld [vmem:[#allocation4 + $0x34] sm:$0xf0]  ;;  %v5348_v4 = vor.u32 %v7473_v57, %v5347_v56  ;;  %v7458_v14 = vld [vmem:[%s8366_s27 + $0x8] sm:$0xff] }
  0x2e   : > { %v474_v60 = vsel %vm457_vm0, %v431_v49, 0  ;;  %v7462_v2 = vld [vmem:[#allocation4 + $0x1c] sm:$0xf]  ;;  %v5352_v5 = vor.u32 %v7469_v58, %v5349_v63  ;;  %v5315_v6 = vld [vmem:[#allocation4 + $0x10] sm:$0xf]  ;;  %v5324_v7 = vor.u32 %v7466_v1, %v5323_v0  ;;  %v322_v15 = vld [vmem:[%s8804_s3] sm:$0xff] }
  0x2f   : > { %v5325_v3 = vld [vmem:[#allocation4 + $0x38] sm:$0xf0]  ;;  %v7465_v9 = vld [vmem:[#allocation4 + $0x2c] sm:$0xf0]  ;;  %v7461_v10 = vld [vmem:[#allocation4 + $0x14] sm:$0xf] }
  0x30   : > { %489 = vmatpush.bf16.msra.mxu0 %v5300_v41  ;;  %508 = vmatpush.bf16.msra.mxu1 %v5304_v42  ;;  %v5328_v8 = vor.u32 %v7462_v2, %v5325_v3  ;;  %v5317_v11 = vld [vmem:[#allocation4 + $0x30] sm:$0xf0]  ;;  %v5316_v12 = vor.u32 %v7465_v9, %v5315_v6  ;;  %v324_v16 = vperm.slane %v322_v15, 0  ;;  %v325_v17 = vperm.slane %v322_v15, 1 }
  0x31   : > { %527 = vmatpush.bf16.msra.mxu2 %v5308_v45  ;;  %546 = vmatpush.bf16.msra.mxu3 %v5312_v46  ;;  %v5320_v13 = vor.u32 %v7461_v10, %v5317_v11  ;;  %v326_v22 = vperm.slane %v322_v15, 2  ;;  %v327_v23 = vperm.slane %v322_v15, 3  ;;  %v328_v48 = vperm.slane %v322_v15, 4 }
  0x32   : > { %v329_v49 = vperm.slane %v322_v15, 5  ;;  %v330_v58 = vperm.slane %v322_v15, 6 }
  0x33   : > { %5361 = vmatmul.msk.bf16.vlgmr.msra.gmra.mxu0 %vm450_vm1, %v7457_v47  ;;  %5363 = vmatmul.msk.bf16.vlgmr.msra.gmra.mxu1 %vm450_vm1, %v7457_v47 }
  0x34   : > { %5365 = vmatmul.msk.bf16.vlgmr.msra.gmra.mxu2 %vm450_vm1, %v7457_v47  ;;  %5367 = vmatmul.msk.bf16.vlgmr.msra.gmra.mxu3 %vm450_vm1, %v7457_v47 }
  0x35   : > { %601 = vmatpush.bf16.msrb.mxu2 %v477_v52  ;;  %620 = vmatpush.bf16.msrb.mxu3 %v480_v53 }
  0x36   : > { %563 = vmatpush.bf16.msrb.mxu0 %v471_v59  ;;  %582 = vmatpush.bf16.msrb.mxu1 %v474_v60  ;;  %v331_v59 = vperm.slane %v322_v15, 7 }
  0x39   : > { %602 = vmatpush.bf16.msrb.mxu2 %v5356_v61  ;;  %621 = vmatpush.bf16.msrb.mxu3 %v5360_v62 }
  0x3a   : > { %564 = vmatpush.bf16.msrb.mxu0 %v5348_v4  ;;  %583 = vmatpush.bf16.msrb.mxu1 %v5352_v5 }
  0x3d   : > { %603 = vmatpush.bf16.msrb.mxu2 %v5324_v7  ;;  %622 = vmatpush.bf16.msrb.mxu3 %v5328_v8 }
  0x3e   : > { %565 = vmatpush.bf16.msrb.mxu0 %v5316_v12  ;;  %584 = vmatpush.bf16.msrb.mxu1 %v5320_v13 }
  0x43   : > { %5362 = vmatmul.msk.bf16.gmra.mxu0 %vm450_vm1, %v7458_v14  ;;  %5364 = vmatmul.msk.bf16.gmra.mxu1 %vm450_vm1, %v7458_v14 }
  0x44   : > { %5366 = vmatmul.msk.bf16.gmra.mxu2 %vm450_vm1, %v7458_v14  ;;  %5368 = vmatmul.msk.bf16.gmra.mxu3 %vm450_vm1, %v7458_v14 }
  0x53   : > { %5369 = vmatmul.msk.bf16.vlgmr.msrb.gmra.mxu0 %vm450_vm1, %v7457_v47  ;;  %5371 = vmatmul.msk.bf16.vlgmr.msrb.gmra.mxu1 %vm450_vm1, %v7457_v47 }
  0x54   : > { %5373 = vmatmul.msk.bf16.vlgmr.msrb.gmra.mxu2 %vm450_vm1, %v7457_v47  ;;  %5375 = vmatmul.msk.bf16.vlgmr.msrb.gmra.mxu3 %vm450_vm1, %v7457_v47 }
  0x63   : > { %5370 = vmatmul.msk.bf16.gmra.mxu0 %vm450_vm1, %v7458_v14  ;;  %5372 = vmatmul.msk.bf16.gmra.mxu1 %vm450_vm1, %v7458_v14 }
  0x64   : > { %5374 = vmatmul.msk.bf16.gmra.mxu2 %vm450_vm1, %v7458_v14  ;;  %5376 = vmatmul.msk.bf16.gmra.mxu3 %vm450_vm1, %v7458_v14 }
  0xb0   : > { %v491_v18 = vpop.f32.mrf.mxu0  ;;  %v510_v19 = vpop.f32.mrf.mxu1 }
  0xb1   : > { %v8399_v20 = vadd.f32 %v491_v18, %v324_v16  ;;  %v8401_v21 = vadd.f32 %v510_v19, %v325_v17 }
  0xb7   : > { %v529_v24 = vpop.f32.mrf.mxu2  ;;  %v548_v25 = vpop.f32.mrf.mxu3 }
  0xb8   : > { %v8403_v26 = vadd.f32 %v529_v24, %v326_v22  ;;  %v8405_v27 = vadd.f32 %v548_v25, %v327_v23  ;;  %v493_v28 = vpop.f32.mrf.mxu0  ;;  %v512_v29 = vpop.f32.mrf.mxu1 }
  0xb9   : > { %v8407_v30 = vadd.f32 %v493_v28, %v324_v16  ;;  %v8409_v31 = vadd.f32 %v512_v29, %v325_v17 }
  0xbf   : > { %v531_v32 = vpop.f32.mrf.mxu2  ;;  %v550_v33 = vpop.f32.mrf.mxu3 }
  0xc0   : > { %v8411_v34 = vadd.f32 %v531_v32, %v326_v22  ;;  %v8413_v35 = vadd.f32 %v550_v33, %v327_v23  ;;  %v496_v36 = vpop.f32.mrf.mxu0  ;;  %v515_v37 = vpop.f32.mrf.mxu1 }
  0xc1   : > { %v8415_v38 = vadd.f32 %v496_v36, %v324_v16  ;;  %v8417_v39 = vadd.f32 %v515_v37, %v325_v17 }
  0xc7   : > { %v534_v40 = vpop.f32.mrf.mxu2  ;;  %v553_v41 = vpop.f32.mrf.mxu3 }
  0xc8   : > { %v8419_v42 = vadd.f32 %v534_v40, %v326_v22  ;;  %v8421_v43 = vadd.f32 %v553_v41, %v327_v23  ;;  %v498_v44 = vpop.f32.mrf.mxu0  ;;  %v517_v45 = vpop.f32.mrf.mxu1 }
  0xc9   : > { %v8423_v46 = vadd.f32 %v498_v44, %v324_v16  ;;  %v8425_v47 = vadd.f32 %v517_v45, %v325_v17 }
  0xcf   : > { %v536_v50 = vpop.f32.mrf.mxu2  ;;  %v555_v51 = vpop.f32.mrf.mxu3 }
  0xd0   : > { %v8427_v52 = vadd.f32 %v536_v50, %v326_v22  ;;  %v8429_v53 = vadd.f32 %v555_v51, %v327_v23  ;;  %v567_v54 = vpop.f32.mrf.mxu0  ;;  %v586_v55 = vpop.f32.mrf.mxu1 }
  0xd1   : > { %v8431_v56 = vadd.f32 %v567_v54, %v328_v48  ;;  %v8433_v57 = vadd.f32 %v586_v55, %v329_v49 }
  0xd7   : > { %v605_v60 = vpop.f32.mrf.mxu2  ;;  %v624_v61 = vpop.f32.mrf.mxu3 }
  0xd8   : > { %v8435_v62 = vadd.f32 %v605_v60, %v330_v58  ;;  %v8437_v63 = vadd.f32 %v624_v61, %v331_v59  ;;  %v569_v0 = vpop.f32.mrf.mxu0  ;;  %v588_v1 = vpop.f32.mrf.mxu1 }
  0xd9   : > { %v8439_v2 = vadd.f32 %v569_v0, %v328_v48  ;;  %v8441_v3 = vadd.f32 %v588_v1, %v329_v49 }
  0xdf   : > { %v607_v4 = vpop.f32.mrf.mxu2  ;;  %v626_v5 = vpop.f32.mrf.mxu3 }
  0xe0   : > { %v8443_v6 = vadd.f32 %v607_v4, %v330_v58  ;;  %v8445_v7 = vadd.f32 %v626_v5, %v331_v59  ;;  %v572_v8 = vpop.f32.mrf.mxu0  ;;  %v591_v9 = vpop.f32.mrf.mxu1 }
  0xe1   : > { %v8447_v10 = vadd.f32 %v572_v8, %v328_v48  ;;  %v8449_v11 = vadd.f32 %v591_v9, %v329_v49 }
  0xe7   : > { %v610_v12 = vpop.f32.mrf.mxu2  ;;  %v629_v13 = vpop.f32.mrf.mxu3 }
  0xe8   : > { %v8451_v14 = vadd.f32 %v610_v12, %v330_v58  ;;  %v8453_v15 = vadd.f32 %v629_v13, %v331_v59  ;;  %v574_v16 = vpop.f32.mrf.mxu0  ;;  %v593_v17 = vpop.f32.mrf.mxu1 }
  0xe9   : > { %v8455_v18 = vadd.f32 %v574_v16, %v328_v48  ;;  %v8457_v19 = vadd.f32 %v593_v17, %v329_v49 }
  0xee   : > { %638 = sbr.rel (%p5378_p8) target bundleno = 543 (0x21f), region = 64 }
  0xef   : > { %v612_v22 = vpop.f32.mrf.mxu2  ;;  %v631_v23 = vpop.f32.mrf.mxu3 }
  0xf0   : > { %v8459_v24 = vadd.f32 %v612_v22, %v330_v58  ;;  %v8461_v25 = vadd.f32 %v631_v23, %v331_v59 }
  0xf2   : > { %8810 = vst [vmem:[#allocation11_spill] sm:$0xff] %v8461_v25 }
  0xf3   : > { %v5605_v28 = vld [vmem:[#allocation6 + $0x1c0] sm:$0xf]  ;;  %v7531_v37 = vld [vmem:[#allocation6 + $0x1c4] sm:$0xf]  ;;  %v5591_v25 = vld [vmem:[#allocation6 + $0x1b0] sm:$0xf0] }
  0xf4   : > { %v7535_v29 = vld [vmem:[#allocation6 + $0x1dc] sm:$0xf0]  ;;  %v5607_v40 = vld [vmem:[#allocation6 + $0x1e0] sm:$0xf0] }
  0xf5   : > { %v5861_v32 = vld [vmem:[#allocation6 + $0x3c0] sm:$0xf]  ;;  %v5606_v33 = vor.u32 %v7535_v29, %v5605_v28  ;;  %v5610_v44 = vor.u32 %v7531_v37, %v5607_v40  ;;  %v7595_v45 = vld [vmem:[#allocation6 + $0x3c4] sm:$0xf] }
  0xf6   : > { %v7599_v36 = vld [vmem:[#allocation6 + $0x3dc] sm:$0xf0]  ;;  %v5863_v48 = vld [vmem:[#allocation6 + $0x3e0] sm:$0xf0] }
  0xf7   : > { %v5862_v41 = vor.u32 %v7599_v36, %v5861_v32  ;;  %v5573_v49 = vld [vmem:[#allocation6 + $0x180] sm:$0xf]  ;;  %1413 = vmatpush.bf16.msra.mxu0 %v5606_v33  ;;  %v5866_v50 = vor.u32 %v7595_v45, %v5863_v48  ;;  %1439 = vmatpush.bf16.msra.mxu2 %v5610_v44  ;;  %v7523_v60 = vld [vmem:[#allocation6 + $0x184] sm:$0xf] }
  0xf8   : > { %v7527_v51 = vld [vmem:[#allocation6 + $0x19c] sm:$0xf0]  ;;  %v5575_v61 = vld [vmem:[#allocation6 + $0x1a0] sm:$0xf0] }
  0xf9   : > { %v5829_v54 = vld [vmem:[#allocation6 + $0x380] sm:$0xf]  ;;  %1426 = vmatpush.bf16.msra.mxu1 %v5862_v41  ;;  %v5574_v58 = vor.u32 %v7527_v51, %v5573_v49  ;;  %v7587_v0 = vld [vmem:[#allocation6 + $0x384] sm:$0xf]  ;;  %1452 = vmatpush.bf16.msra.mxu3 %v5866_v50  ;;  %v5578_v1 = vor.u32 %v7523_v60, %v5575_v61 }
  0xfa   : > { %v7591_v55 = vld [vmem:[#allocation6 + $0x39c] sm:$0xf0]  ;;  %v5831_v4 = vld [vmem:[#allocation6 + $0x3a0] sm:$0xf0] }
  0xfb   : > { %v5830_v59 = vor.u32 %v7591_v55, %v5829_v54  ;;  %v5541_v5 = vld [vmem:[#allocation6 + $0x140] sm:$0xf]  ;;  %v5834_v9 = vor.u32 %v7587_v0, %v5831_v4  ;;  %v7515_v16 = vld [vmem:[#allocation6 + $0x144] sm:$0xf]  ;;  %1414 = vmatpush.bf16.msra.mxu0 %v5574_v58  ;;  %1440 = vmatpush.bf16.msra.mxu2 %v5578_v1 }
  0xfc   : > { %v7519_v8 = vld [vmem:[#allocation6 + $0x15c] sm:$0xf0]  ;;  %v5543_v22 = vld [vmem:[#allocation6 + $0x160] sm:$0xf0] }
  0xfd   : > { %v5797_v12 = vld [vmem:[#allocation6 + $0x340] sm:$0xf]  ;;  %v5542_v17 = vor.u32 %v7519_v8, %v5541_v5  ;;  %v7579_v23 = vld [vmem:[#allocation6 + $0x344] sm:$0xf]  ;;  %1427 = vmatpush.bf16.msra.mxu1 %v5830_v59  ;;  %v5546_v32 = vor.u32 %v7515_v16, %v5543_v22  ;;  %1453 = vmatpush.bf16.msra.mxu3 %v5834_v9 }
  0xfe   : > { %v7583_v13 = vld [vmem:[#allocation6 + $0x35c] sm:$0xf0]  ;;  %v5799_v28 = vld [vmem:[#allocation6 + $0x360] sm:$0xf0] }
  0xff   : > { %v5798_v29 = vor.u32 %v7583_v13, %v5797_v12  ;;  %v5509_v33 = vld [vmem:[#allocation6 + $0x100] sm:$0xf]  ;;  %v5802_v40 = vor.u32 %v7579_v23, %v5799_v28  ;;  %v7507_v44 = vld [vmem:[#allocation6 + $0x104] sm:$0xf]  ;;  %1415 = vmatpush.bf16.msra.mxu0 %v5542_v17  ;;  %1441 = vmatpush.bf16.msra.mxu2 %v5546_v32 }
 0x100   : > { %v7511_v36 = vld [vmem:[#allocation6 + $0x11c] sm:$0xf0]  ;;  %v5511_v45 = vld [vmem:[#allocation6 + $0x120] sm:$0xf0] }
 0x101   : > { %v5765_v37 = vld [vmem:[#allocation6 + $0x300] sm:$0xf]  ;;  %v7571_v48 = vld [vmem:[#allocation6 + $0x304] sm:$0xf]  ;;  %v5510_v50 = vor.u32 %v7511_v36, %v5509_v33  ;;  %1428 = vmatpush.bf16.msra.mxu1 %v5798_v29  ;;  %v5514_v54 = vor.u32 %v7507_v44, %v5511_v45  ;;  %1454 = vmatpush.bf16.msra.mxu3 %v5802_v40 }
 0x102   : > { %v7575_v41 = vld [vmem:[#allocation6 + $0x31c] sm:$0xf0]  ;;  %v5767_v49 = vld [vmem:[#allocation6 + $0x320] sm:$0xf0] }
 0x103   : > { %v5766_v51 = vor.u32 %v7575_v41, %v5765_v37  ;;  %v5477_v55 = vld [vmem:[#allocation6 + $0xc0] sm:$0xf]  ;;  %v5770_v60 = vor.u32 %v7571_v48, %v5767_v49  ;;  %v7499_v0 = vld [vmem:[#allocation6 + $0xc4] sm:$0xf]  ;;  %1416 = vmatpush.bf16.msra.mxu0 %v5510_v50  ;;  %1442 = vmatpush.bf16.msra.mxu2 %v5514_v54 }
 0x104   : > { %v7503_v58 = vld [vmem:[#allocation6 + $0xdc] sm:$0xf0]  ;;  %v5479_v1 = vld [vmem:[#allocation6 + $0xe0] sm:$0xf0] }
 0x105   : > { %v5733_v59 = vld [vmem:[#allocation6 + $0x2c0] sm:$0xf]  ;;  %v7563_v4 = vld [vmem:[#allocation6 + $0x2c4] sm:$0xf]  ;;  %v5478_v8 = vor.u32 %v7503_v58, %v5477_v55  ;;  %1429 = vmatpush.bf16.msra.mxu1 %v5766_v51  ;;  %v5482_v12 = vor.u32 %v7499_v0, %v5479_v1  ;;  %1455 = vmatpush.bf16.msra.mxu3 %v5770_v60 }
 0x106   : > { %v7567_v61 = vld [vmem:[#allocation6 + $0x2dc] sm:$0xf0]  ;;  %v5735_v5 = vld [vmem:[#allocation6 + $0x2e0] sm:$0xf0] }
 0x107   : > { %v5734_v9 = vor.u32 %v7567_v61, %v5733_v59  ;;  %v5445_v13 = vld [vmem:[#allocation6 + $0x80] sm:$0xf]  ;;  %v5738_v22 = vor.u32 %v7563_v4, %v5735_v5  ;;  %v7491_v28 = vld [vmem:[#allocation6 + $0x84] sm:$0xf]  ;;  %1417 = vmatpush.bf16.msra.mxu0 %v5478_v8  ;;  %1443 = vmatpush.bf16.msra.mxu2 %v5482_v12 }
 0x108   : > { %v7495_v16 = vld [vmem:[#allocation6 + $0x9c] sm:$0xf0]  ;;  %v5447_v29 = vld [vmem:[#allocation6 + $0xa0] sm:$0xf0] }
 0x109   : > { %v5701_v17 = vld [vmem:[#allocation6 + $0x280] sm:$0xf]  ;;  %v7555_v32 = vld [vmem:[#allocation6 + $0x284] sm:$0xf]  ;;  %v5446_v36 = vor.u32 %v7495_v16, %v5445_v13  ;;  %1430 = vmatpush.bf16.msra.mxu1 %v5734_v9  ;;  %v5450_v40 = vor.u32 %v7491_v28, %v5447_v29  ;;  %1456 = vmatpush.bf16.msra.mxu3 %v5738_v22  ;;  %v5613_v16 = vld [vmem:[#allocation6 + $0x1c8] sm:$0xf] }
 0x10a   : > { %v7559_v23 = vld [vmem:[#allocation6 + $0x29c] sm:$0xf0]  ;;  %v5703_v33 = vld [vmem:[#allocation6 + $0x2a0] sm:$0xf0]  ;;  %v5869_v22 = vld [vmem:[#allocation6 + $0x3c8] sm:$0xf] }
 0x10b   : > { %v5702_v37 = vor.u32 %v7559_v23, %v5701_v17  ;;  %v5413_v41 = vld [vmem:[#allocation6 + $0x40] sm:$0xf]  ;;  %v5706_v48 = vor.u32 %v7555_v32, %v5703_v33  ;;  %v7483_v50 = vld [vmem:[#allocation6 + $0x44] sm:$0xf]  ;;  %1418 = vmatpush.bf16.msra.mxu0 %v5446_v36  ;;  %1444 = vmatpush.bf16.msra.mxu2 %v5450_v40  ;;  %v7536_v17 = vld [vmem:[#allocation6 + $0x1e4] sm:$0xf0] }
 0x10c   : > { %v7487_v44 = vld [vmem:[#allocation6 + $0x5c] sm:$0xf0]  ;;  %v5415_v51 = vld [vmem:[#allocation6 + $0x60] sm:$0xf0]  ;;  %v7600_v28 = vld [vmem:[#allocation6 + $0x3e4] sm:$0xf0] }
 0x10d   : > { %v5669_v45 = vld [vmem:[#allocation6 + $0x240] sm:$0xf]  ;;  %v7547_v54 = vld [vmem:[#allocation6 + $0x244] sm:$0xf]  ;;  %v5414_v58 = vor.u32 %v7487_v44, %v5413_v41  ;;  %1431 = vmatpush.bf16.msra.mxu1 %v5702_v37  ;;  %v5418_v0 = vor.u32 %v7483_v50, %v5415_v51  ;;  %1457 = vmatpush.bf16.msra.mxu3 %v5706_v48  ;;  %v7532_v29 = vld [vmem:[#allocation6 + $0x1cc] sm:$0xf]  ;;  %v5614_v44 = vor.u32 %v7536_v17, %v5613_v16 }
 0x10e   : > { %v7551_v49 = vld [vmem:[#allocation6 + $0x25c] sm:$0xf0]  ;;  %v5671_v55 = vld [vmem:[#allocation6 + $0x260] sm:$0xf0]  ;;  %v5615_v32 = vld [vmem:[#allocation6 + $0x1e8] sm:$0xf0]  ;;  %v5870_v48 = vor.u32 %v7600_v28, %v5869_v22 }
 0x10f   : > { %v5381_v59 = vld [vmem:[#allocation6] sm:$0xf]  ;;  %v5670_v61 = vor.u32 %v7551_v49, %v5669_v45  ;;  %v7475_v5 = vld [vmem:[#allocation6 + $0x4] sm:$0xf]  ;;  %v5674_v8 = vor.u32 %v7547_v54, %v5671_v55  ;;  %1419 = vmatpush.bf16.msra.mxu0 %v5414_v58  ;;  %1445 = vmatpush.bf16.msra.mxu2 %v5418_v0  ;;  %v7596_v37 = vld [vmem:[#allocation6 + $0x3cc] sm:$0xf]  ;;  %v5618_v49 = vor.u32 %v7532_v29, %v5615_v32 }
 0x110   : > { %v7479_v60 = vld [vmem:[#allocation6 + $0x1c] sm:$0xf0]  ;;  %v5383_v9 = vld [vmem:[#allocation6 + $0x20] sm:$0xf0]  ;;  %v5871_v40 = vld [vmem:[#allocation6 + $0x3e8] sm:$0xf0] }
 0x111   : > { %v5637_v1 = vld [vmem:[#allocation6 + $0x200] sm:$0xf]  ;;  %v7539_v12 = vld [vmem:[#allocation6 + $0x204] sm:$0xf]  ;;  %v5382_v23 = vor.u32 %v7479_v60, %v5381_v59  ;;  %1432 = vmatpush.bf16.msra.mxu1 %v5670_v61  ;;  %v5386_v36 = vor.u32 %v7475_v5, %v5383_v9  ;;  %1458 = vmatpush.bf16.msra.mxu3 %v5674_v8  ;;  %v5581_v45 = vld [vmem:[#allocation6 + $0x188] sm:$0xf]  ;;  %v5874_v55 = vor.u32 %v7596_v37, %v5871_v40 }
 0x112   : > { %v7543_v4 = vld [vmem:[#allocation6 + $0x21c] sm:$0xf0]  ;;  %v5639_v13 = vld [vmem:[#allocation6 + $0x220] sm:$0xf0]  ;;  %v7528_v50 = vld [vmem:[#allocation6 + $0x1a4] sm:$0xf0] }
 0x113   : > { %v5638_v33 = vor.u32 %v7543_v4, %v5637_v1  ;;  %v5642_v41 = vor.u32 %v7539_v12, %v5639_v13  ;;  %v5837_v51 = vld [vmem:[#allocation6 + $0x388] sm:$0xf]  ;;  %1420 = vmatpush.bf16.msra.mxu0 %v5382_v23  ;;  %v7524_v58 = vld [vmem:[#allocation6 + $0x18c] sm:$0xf]  ;;  %1446 = vmatpush.bf16.msra.mxu2 %v5386_v36  ;;  %v639_v0 = vld [vmem:[#allocation2] sm:$0xff]  ;;  %v5582_v4 = vor.u32 %v7528_v50, %v5581_v45 }
 0x114   : > { %v7592_v54 = vld [vmem:[#allocation6 + $0x3a4] sm:$0xf0]  ;;  %v5583_v59 = vld [vmem:[#allocation6 + $0x1a8] sm:$0xf0]  ;;  %v8464_v5 = vpack.c.bf16 %v639_v0, %v639_v0 }
 0x115   : > { %v7588_v60 = vld [vmem:[#allocation6 + $0x38c] sm:$0xf]  ;;  %1433 = vmatpush.bf16.msra.mxu1 %v5638_v33  ;;  %1459 = vmatpush.bf16.msra.mxu3 %v5642_v41  ;;  %v5838_v9 = vor.u32 %v7592_v54, %v5837_v51  ;;  %v5586_v12 = vor.u32 %v7524_v58, %v5583_v59  ;;  %v5549_v13 = vld [vmem:[#allocation6 + $0x148] sm:$0xf] }
 0x116   : > { %v5839_v61 = vld [vmem:[#allocation6 + $0x3a8] sm:$0xf0]  ;;  %v7520_v16 = vld [vmem:[#allocation6 + $0x164] sm:$0xf0]  ;;  %1447 = vmatmul.bf16.vlgmr.msra.gmra.mxu2 %v8464_v5  ;;  %1421 = vmatmul.bf16.vlgmr.msra.gmra.mxu0 %v8464_v5 }
 0x117   : > { %v640_v1 = vld [vmem:[#allocation2 + $0x8] sm:$0xff]  ;;  %1465 = vmatpush.bf16.msrb.mxu0 %v5614_v44  ;;  %1491 = vmatpush.bf16.msrb.mxu2 %v5618_v49  ;;  %v5842_v22 = vor.u32 %v7588_v60, %v5839_v61  ;;  %v5550_v36 = vor.u32 %v7520_v16, %v5549_v13 }
 0x118   : > { %v8466_v8 = vpack.c.bf16 %v640_v1, %v640_v1  ;;  %v5805_v17 = vld [vmem:[#allocation6 + $0x348] sm:$0xf]  ;;  %v7516_v28 = vld [vmem:[#allocation6 + $0x14c] sm:$0xf] }
 0x119   : > { %1478 = vmatpush.bf16.msrb.mxu1 %v5870_v48  ;;  %1504 = vmatpush.bf16.msrb.mxu3 %v5874_v55  ;;  %v7584_v23 = vld [vmem:[#allocation6 + $0x364] sm:$0xf0]  ;;  %v5551_v29 = vld [vmem:[#allocation6 + $0x168] sm:$0xf0] }
 0x11a   : > { %v7580_v32 = vld [vmem:[#allocation6 + $0x34c] sm:$0xf]  ;;  %1460 = vmatmul.bf16.vlgmr.msra.gmra.mxu3 %v8466_v8  ;;  %1434 = vmatmul.bf16.vlgmr.msra.gmra.mxu1 %v8466_v8  ;;  %v5806_v37 = vor.u32 %v7584_v23, %v5805_v17  ;;  %v5554_v40 = vor.u32 %v7516_v28, %v5551_v29  ;;  %v5517_v41 = vld [vmem:[#allocation6 + $0x108] sm:$0xf] }
 0x11b   : > { %v5807_v33 = vld [vmem:[#allocation6 + $0x368] sm:$0xf0]  ;;  %1466 = vmatpush.bf16.msrb.mxu0 %v5582_v4  ;;  %1492 = vmatpush.bf16.msrb.mxu2 %v5586_v12  ;;  %v7512_v44 = vld [vmem:[#allocation6 + $0x124] sm:$0xf0] }
 0x11c   : > { %v5773_v45 = vld [vmem:[#allocation6 + $0x308] sm:$0xf]  ;;  %v5810_v48 = vor.u32 %v7580_v32, %v5807_v33  ;;  %v7508_v50 = vld [vmem:[#allocation6 + $0x10c] sm:$0xf]  ;;  %v5518_v58 = vor.u32 %v7512_v44, %v5517_v41 }
 0x11d   : > { %1479 = vmatpush.bf16.msrb.mxu1 %v5838_v9  ;;  %1505 = vmatpush.bf16.msrb.mxu3 %v5842_v22  ;;  %v7576_v49 = vld [vmem:[#allocation6 + $0x324] sm:$0xf0]  ;;  %v5519_v51 = vld [vmem:[#allocation6 + $0x128] sm:$0xf0] }
 0x11e   : > { %v7572_v54 = vld [vmem:[#allocation6 + $0x30c] sm:$0xf]  ;;  %v5774_v59 = vor.u32 %v7576_v49, %v5773_v45  ;;  %v5522_v60 = vor.u32 %v7508_v50, %v5519_v51  ;;  %v5485_v61 = vld [vmem:[#allocation6 + $0xc8] sm:$0xf] }
 0x11f   : > { %v5775_v55 = vld [vmem:[#allocation6 + $0x328] sm:$0xf0]  ;;  %1467 = vmatpush.bf16.msrb.mxu0 %v5550_v36  ;;  %1493 = vmatpush.bf16.msrb.mxu2 %v5554_v40  ;;  %v7504_v0 = vld [vmem:[#allocation6 + $0xe4] sm:$0xf0] }
 0x120   : > { %v5741_v1 = vld [vmem:[#allocation6 + $0x2c8] sm:$0xf]  ;;  %v5778_v4 = vor.u32 %v7572_v54, %v5775_v55  ;;  %v7500_v12 = vld [vmem:[#allocation6 + $0xcc] sm:$0xf]  ;;  %v5486_v22 = vor.u32 %v7504_v0, %v5485_v61 }
 0x121   : > { %1480 = vmatpush.bf16.msrb.mxu1 %v5806_v37  ;;  %1506 = vmatpush.bf16.msrb.mxu3 %v5810_v48  ;;  %v7568_v9 = vld [vmem:[#allocation6 + $0x2e4] sm:$0xf0]  ;;  %v5487_v13 = vld [vmem:[#allocation6 + $0xe8] sm:$0xf0] }
 0x122   : > { %v7564_v16 = vld [vmem:[#allocation6 + $0x2cc] sm:$0xf]  ;;  %v5742_v23 = vor.u32 %v7568_v9, %v5741_v1  ;;  %v5490_v28 = vor.u32 %v7500_v12, %v5487_v13  ;;  %v5453_v29 = vld [vmem:[#allocation6 + $0x88] sm:$0xf] }
 0x123   : > { %v5743_v17 = vld [vmem:[#allocation6 + $0x2e8] sm:$0xf0]  ;;  %1468 = vmatpush.bf16.msrb.mxu0 %v5518_v58  ;;  %1494 = vmatpush.bf16.msrb.mxu2 %v5522_v60  ;;  %v7496_v32 = vld [vmem:[#allocation6 + $0xa4] sm:$0xf0] }
 0x124   : > { %v5709_v33 = vld [vmem:[#allocation6 + $0x288] sm:$0xf]  ;;  %v5746_v36 = vor.u32 %v7564_v16, %v5743_v17  ;;  %v7492_v40 = vld [vmem:[#allocation6 + $0x8c] sm:$0xf]  ;;  %v5454_v48 = vor.u32 %v7496_v32, %v5453_v29 }
 0x125   : > { %1481 = vmatpush.bf16.msrb.mxu1 %v5774_v59  ;;  %1507 = vmatpush.bf16.msrb.mxu3 %v5778_v4  ;;  %v7560_v37 = vld [vmem:[#allocation6 + $0x2a4] sm:$0xf0]  ;;  %v5455_v41 = vld [vmem:[#allocation6 + $0xa8] sm:$0xf0] }
 0x126   : > { %v7556_v44 = vld [vmem:[#allocation6 + $0x28c] sm:$0xf]  ;;  %v5710_v49 = vor.u32 %v7560_v37, %v5709_v33  ;;  %v5458_v50 = vor.u32 %v7492_v40, %v5455_v41  ;;  %v5421_v51 = vld [vmem:[#allocation6 + $0x48] sm:$0xf]  ;;  %v7537_v37 = vld [vmem:[#allocation6 + $0x1ec] sm:$0xf0] }
 0x127   : > { %v5711_v45 = vld [vmem:[#allocation6 + $0x2a8] sm:$0xf0]  ;;  %1469 = vmatpush.bf16.msrb.mxu0 %v5486_v22  ;;  %1495 = vmatpush.bf16.msrb.mxu2 %v5490_v28  ;;  %v7488_v54 = vld [vmem:[#allocation6 + $0x64] sm:$0xf0]  ;;  %v5877_v40 = vld [vmem:[#allocation6 + $0x3d0] sm:$0xf] }
 0x128   : > { %v5677_v55 = vld [vmem:[#allocation6 + $0x248] sm:$0xf]  ;;  %v5714_v58 = vor.u32 %v7556_v44, %v5711_v45  ;;  %v7484_v60 = vld [vmem:[#allocation6 + $0x4c] sm:$0xf]  ;;  %v5422_v4 = vor.u32 %v7488_v54, %v5421_v51  ;;  %v7601_v44 = vld [vmem:[#allocation6 + $0x3ec] sm:$0xf0] }
 0x129   : > { %1482 = vmatpush.bf16.msrb.mxu1 %v5742_v23  ;;  %1508 = vmatpush.bf16.msrb.mxu3 %v5746_v36  ;;  %v7552_v59 = vld [vmem:[#allocation6 + $0x264] sm:$0xf0]  ;;  %v5423_v61 = vld [vmem:[#allocation6 + $0x68] sm:$0xf0]  ;;  %v5621_v36 = vld [vmem:[#allocation6 + $0x1d0] sm:$0xf] }
 0x12a   : > { %v7548_v0 = vld [vmem:[#allocation6 + $0x24c] sm:$0xf]  ;;  %v5389_v9 = vld [vmem:[#allocation6 + $0x8] sm:$0xf]  ;;  %v5678_v13 = vor.u32 %v7552_v59, %v5677_v55  ;;  %v5426_v16 = vor.u32 %v7484_v60, %v5423_v61  ;;  %v7533_v45 = vld [vmem:[#allocation6 + $0x1d4] sm:$0xf]  ;;  %v5878_v59 = vor.u32 %v7601_v44, %v5877_v40 }
 0x12b   : > { %v5679_v1 = vld [vmem:[#allocation6 + $0x268] sm:$0xf0]  ;;  %1470 = vmatpush.bf16.msrb.mxu0 %v5454_v48  ;;  %v7480_v12 = vld [vmem:[#allocation6 + $0x24] sm:$0xf0]  ;;  %1496 = vmatpush.bf16.msrb.mxu2 %v5458_v50  ;;  %v5623_v48 = vld [vmem:[#allocation6 + $0x1f0] sm:$0xf0] }
 0x12c   : > { %v5645_v17 = vld [vmem:[#allocation6 + $0x208] sm:$0xf]  ;;  %v7476_v23 = vld [vmem:[#allocation6 + $0xc] sm:$0xf]  ;;  %v5682_v28 = vor.u32 %v7548_v0, %v5679_v1  ;;  %v5390_v41 = vor.u32 %v7480_v12, %v5389_v9  ;;  %v7597_v51 = vld [vmem:[#allocation6 + $0x3d4] sm:$0xf]  ;;  %v5626_v60 = vor.u32 %v7533_v45, %v5623_v48 }
 0x12d   : > { %1483 = vmatpush.bf16.msrb.mxu1 %v5710_v49  ;;  %v7544_v22 = vld [vmem:[#allocation6 + $0x224] sm:$0xf0]  ;;  %1509 = vmatpush.bf16.msrb.mxu3 %v5714_v58  ;;  %v5391_v29 = vld [vmem:[#allocation6 + $0x28] sm:$0xf0]  ;;  %v5879_v54 = vld [vmem:[#allocation6 + $0x3f0] sm:$0xf0]  ;;  %v5622_v58 = vor.u32 %v7537_v37, %v5621_v36 }
 0x12e   : > { %v7540_v32 = vld [vmem:[#allocation6 + $0x20c] sm:$0xf]  ;;  %v5646_v49 = vor.u32 %v7544_v22, %v5645_v17  ;;  %v5394_v50 = vor.u32 %v7476_v23, %v5391_v29  ;;  %v5589_v61 = vld [vmem:[#allocation6 + $0x190] sm:$0xf]  ;;  %v7525_v12 = vld [vmem:[#allocation6 + $0x194] sm:$0xf] }
 0x12f   : > { %v5647_v33 = vld [vmem:[#allocation6 + $0x228] sm:$0xf0]  ;;  %1471 = vmatpush.bf16.msrb.mxu0 %v5422_v4  ;;  %1497 = vmatpush.bf16.msrb.mxu2 %v5426_v16  ;;  %v7529_v0 = vld [vmem:[#allocation6 + $0x1ac] sm:$0xf0]  ;;  %v5882_v4 = vor.u32 %v7597_v51, %v5879_v54  ;;  %v5847_v16 = vld [vmem:[#allocation6 + $0x3b0] sm:$0xf0]  ;;  %v5594_v23 = vor.u32 %v7525_v12, %v5591_v25 }
 0x130   : > { %v5650_v55 = vor.u32 %v7540_v32, %v5647_v33  ;;  %v5845_v1 = vld [vmem:[#allocation6 + $0x390] sm:$0xf]  ;;  %v5590_v17 = vor.u32 %v7529_v0, %v5589_v61  ;;  %v7517_v37 = vld [vmem:[#allocation6 + $0x154] sm:$0xf] }
 0x131   : > { %1484 = vmatpush.bf16.msrb.mxu1 %v5678_v13  ;;  %1510 = vmatpush.bf16.msrb.mxu3 %v5682_v28  ;;  %v7593_v9 = vld [vmem:[#allocation6 + $0x3ac] sm:$0xf0]  ;;  %v7589_v13 = vld [vmem:[#allocation6 + $0x394] sm:$0xf] }
 0x132   : > { %v5846_v22 = vor.u32 %v7593_v9, %v5845_v1  ;;  %v5557_v28 = vld [vmem:[#allocation6 + $0x150] sm:$0xf]  ;;  %v5850_v33 = vor.u32 %v7589_v13, %v5847_v16  ;;  %v5559_v40 = vld [vmem:[#allocation6 + $0x170] sm:$0xf0] }
 0x133   : > { %1472 = vmatpush.bf16.msrb.mxu0 %v5390_v41  ;;  %1498 = vmatpush.bf16.msrb.mxu2 %v5394_v50  ;;  %v7521_v29 = vld [vmem:[#allocation6 + $0x16c] sm:$0xf0]  ;;  %v7581_v41 = vld [vmem:[#allocation6 + $0x354] sm:$0xf]  ;;  %v5562_v48 = vor.u32 %v7517_v37, %v5559_v40 }
 0x134   : > { %v5813_v32 = vld [vmem:[#allocation6 + $0x350] sm:$0xf]  ;;  %v5815_v44 = vld [vmem:[#allocation6 + $0x370] sm:$0xf0]  ;;  %v5558_v45 = vor.u32 %v7521_v29, %v5557_v28 }
 0x135   : > { %1485 = vmatpush.bf16.msrb.mxu1 %v5646_v49  ;;  %1511 = vmatpush.bf16.msrb.mxu3 %v5650_v55  ;;  %v7585_v36 = vld [vmem:[#allocation6 + $0x36c] sm:$0xf0]  ;;  %v5818_v54 = vor.u32 %v7581_v41, %v5815_v44  ;;  %v5783_v61 = vld [vmem:[#allocation6 + $0x330] sm:$0xf0] }
 0x136   : > { %1473 = vmatmul.bf16.vlgmr.msrb.gmra.mxu0 %v8464_v5  ;;  %1499 = vmatmul.bf16.vlgmr.msrb.gmra.mxu2 %v8464_v5  ;;  %v5814_v25 = vor.u32 %v7585_v36, %v5813_v32  ;;  %v5525_v49 = vld [vmem:[#allocation6 + $0x110] sm:$0xf]  ;;  %v7565_v28 = vld [vmem:[#allocation6 + $0x2d4] sm:$0xf] }
 0x137   : > { %1517 = vmatpush.bf16.msra.mxu0 %v5622_v58  ;;  %1543 = vmatpush.bf16.msra.mxu2 %v5626_v60  ;;  %v7513_v50 = vld [vmem:[#allocation6 + $0x12c] sm:$0xf0]  ;;  %v7509_v58 = vld [vmem:[#allocation6 + $0x114] sm:$0xf] }
 0x138   : > { %1486 = vmatmul.bf16.vlgmr.msrb.gmra.mxu1 %v8466_v8  ;;  %1512 = vmatmul.bf16.vlgmr.msrb.gmra.mxu3 %v8466_v8  ;;  %v5781_v51 = vld [vmem:[#allocation6 + $0x310] sm:$0xf]  ;;  %v7573_v60 = vld [vmem:[#allocation6 + $0x314] sm:$0xf]  ;;  %v5526_v0 = vor.u32 %v7513_v50, %v5525_v49 }
 0x139   : > { %1530 = vmatpush.bf16.msra.mxu1 %v5878_v59  ;;  %1556 = vmatpush.bf16.msra.mxu3 %v5882_v4  ;;  %v7577_v55 = vld [vmem:[#allocation6 + $0x32c] sm:$0xf0]  ;;  %v5527_v59 = vld [vmem:[#allocation6 + $0x130] sm:$0xf0]  ;;  %v5786_v16 = vor.u32 %v7573_v60, %v5783_v61 }
 0x13a   : > { %v5782_v1 = vor.u32 %v7577_v55, %v5781_v51  ;;  %v5530_v4 = vor.u32 %v7509_v58, %v5527_v59  ;;  %v5493_v9 = vld [vmem:[#allocation6 + $0xd0] sm:$0xf]  ;;  %v5751_v29 = vld [vmem:[#allocation6 + $0x2f0] sm:$0xf0] }
 0x13b   : > { %1518 = vmatpush.bf16.msra.mxu0 %v5590_v17  ;;  %1544 = vmatpush.bf16.msra.mxu2 %v5594_v23  ;;  %v7505_v12 = vld [vmem:[#allocation6 + $0xec] sm:$0xf0]  ;;  %v5495_v23 = vld [vmem:[#allocation6 + $0xf0] sm:$0xf0]  ;;  %v5754_v44 = vor.u32 %v7565_v28, %v5751_v29 }
 0x13c   : > { %v5749_v13 = vld [vmem:[#allocation6 + $0x2d0] sm:$0xf]  ;;  %v5494_v32 = vor.u32 %v7505_v12, %v5493_v9  ;;  %v7557_v49 = vld [vmem:[#allocation6 + $0x294] sm:$0xf] }
 0x13d   : > { %1531 = vmatpush.bf16.msra.mxu1 %v5846_v22  ;;  %1557 = vmatpush.bf16.msra.mxu3 %v5850_v33  ;;  %v7569_v17 = vld [vmem:[#allocation6 + $0x2ec] sm:$0xf0]  ;;  %v7501_v22 = vld [vmem:[#allocation6 + $0xd4] sm:$0xf] }
 0x13e   : > { %v5750_v33 = vor.u32 %v7569_v17, %v5749_v13  ;;  %v5498_v36 = vor.u32 %v7501_v22, %v5495_v23  ;;  %v5461_v37 = vld [vmem:[#allocation6 + $0x90] sm:$0xf]  ;;  %v5719_v50 = vld [vmem:[#allocation6 + $0x2b0] sm:$0xf0] }
 0x13f   : > { %1519 = vmatpush.bf16.msra.mxu0 %v5558_v45  ;;  %1545 = vmatpush.bf16.msra.mxu2 %v5562_v48  ;;  %v7497_v40 = vld [vmem:[#allocation6 + $0xac] sm:$0xf0]  ;;  %v5463_v48 = vld [vmem:[#allocation6 + $0xb0] sm:$0xf0]  ;;  %v5722_v61 = vor.u32 %v7557_v49, %v5719_v50  ;;  %v7534_v49 = vld [vmem:[#allocation6 + $0x1dc] sm:$0xf] }
 0x140   : > { %v5717_v41 = vld [vmem:[#allocation6 + $0x290] sm:$0xf]  ;;  %v5462_v51 = vor.u32 %v7497_v40, %v5461_v37  ;;  %v7549_v9 = vld [vmem:[#allocation6 + $0x254] sm:$0xf]  ;;  %v5631_v50 = vld [vmem:[#allocation6 + $0x1f8] sm:$0xf0] }
 0x141   : > { %1532 = vmatpush.bf16.msra.mxu1 %v5814_v25  ;;  %1558 = vmatpush.bf16.msra.mxu3 %v5818_v54  ;;  %v7561_v45 = vld [vmem:[#allocation6 + $0x2ac] sm:$0xf0]  ;;  %v7493_v25 = vld [vmem:[#allocation6 + $0x94] sm:$0xf] }
 0x142   : > { %v5718_v54 = vor.u32 %v7561_v45, %v5717_v41  ;;  %v5466_v55 = vor.u32 %v7493_v25, %v5463_v48  ;;  %v5429_v58 = vld [vmem:[#allocation6 + $0x50] sm:$0xf]  ;;  %v5687_v12 = vld [vmem:[#allocation6 + $0x270] sm:$0xf0]  ;;  %v5629_v41 = vld [vmem:[#allocation6 + $0x1d8] sm:$0xf] }
 0x143   : > { %1520 = vmatpush.bf16.msra.mxu0 %v5526_v0  ;;  %1546 = vmatpush.bf16.msra.mxu2 %v5530_v4  ;;  %v7489_v59 = vld [vmem:[#allocation6 + $0x6c] sm:$0xf0]  ;;  %v5431_v4 = vld [vmem:[#allocation6 + $0x70] sm:$0xf0]  ;;  %v5885_v45 = vld [vmem:[#allocation6 + $0x3d8] sm:$0xf] }
 0x144   : > { %v5685_v60 = vld [vmem:[#allocation6 + $0x250] sm:$0xf]  ;;  %v5430_v13 = vor.u32 %v7489_v59, %v5429_v58  ;;  %v7541_v37 = vld [vmem:[#allocation6 + $0x214] sm:$0xf]  ;;  %v7602_v48 = vld [vmem:[#allocation6 + $0x3f4] sm:$0xf0] }
 0x145   : > { %1533 = vmatpush.bf16.msra.mxu1 %v5782_v1  ;;  %1559 = vmatpush.bf16.msra.mxu3 %v5786_v16  ;;  %v7553_v0 = vld [vmem:[#allocation6 + $0x26c] sm:$0xf0]  ;;  %v7485_v1 = vld [vmem:[#allocation6 + $0x54] sm:$0xf]  ;;  %v5887_v58 = vld [vmem:[#allocation6 + $0x3f8] sm:$0xf0] }
 0x146   : > { %v5397_v16 = vld [vmem:[#allocation6 + $0x10] sm:$0xf]  ;;  %v5686_v22 = vor.u32 %v7553_v0, %v5685_v60  ;;  %v5434_v23 = vor.u32 %v7485_v1, %v5431_v4  ;;  %v5655_v40 = vld [vmem:[#allocation6 + $0x230] sm:$0xf0]  ;;  %v5634_v0 = vor.u32 %v7534_v49, %v5631_v50  ;;  %v5597_v1 = vld [vmem:[#allocation6 + $0x198] sm:$0xf] }
 0x147   : > { %1521 = vmatpush.bf16.msra.mxu0 %v5494_v32  ;;  %1547 = vmatpush.bf16.msra.mxu2 %v5498_v36  ;;  %v7481_v17 = vld [vmem:[#allocation6 + $0x2c] sm:$0xf0]  ;;  %v7477_v32 = vld [vmem:[#allocation6 + $0x14] sm:$0xf]  ;;  %v5658_v59 = vor.u32 %v7541_v37, %v5655_v40  ;;  %v7530_v4 = vld [vmem:[#allocation6 + $0x1b4] sm:$0xf0] }
 0x148   : > { %v5653_v28 = vld [vmem:[#allocation6 + $0x210] sm:$0xf]  ;;  %v5399_v36 = vld [vmem:[#allocation6 + $0x30] sm:$0xf0]  ;;  %v5398_v25 = vor.u32 %v7481_v17, %v5397_v16  ;;  %v7526_v16 = vld [vmem:[#allocation6 + $0x19c] sm:$0xf] }
 0x149   : > { %1534 = vmatpush.bf16.msra.mxu1 %v5750_v33  ;;  %1560 = vmatpush.bf16.msra.mxu3 %v5754_v44  ;;  %v7545_v29 = vld [vmem:[#allocation6 + $0x22c] sm:$0xf0]  ;;  %v5690_v33 = vor.u32 %v7549_v9, %v5687_v12  ;;  %v7538_v44 = vld [vmem:[#allocation6 + $0x1f4] sm:$0xf0]  ;;  %v5599_v17 = vld [vmem:[#allocation6 + $0x1b8] sm:$0xf0] }
 0x14a   : > { %v5630_v60 = vor.u32 %v7538_v44, %v5629_v41  ;;  %v5853_v9 = vld [vmem:[#allocation6 + $0x398] sm:$0xf]  ;;  %v7518_v44 = vld [vmem:[#allocation6 + $0x15c] sm:$0xf] }
 0x14b   : > { %1522 = vmatpush.bf16.msra.mxu0 %v5462_v51  ;;  %1548 = vmatpush.bf16.msra.mxu2 %v5466_v55  ;;  %v5654_v51 = vor.u32 %v7545_v29, %v5653_v28  ;;  %v7598_v55 = vld [vmem:[#allocation6 + $0x3dc] sm:$0xf]  ;;  %v5598_v28 = vor.u32 %v7530_v4, %v5597_v1  ;;  %v5821_v37 = vld [vmem:[#allocation6 + $0x358] sm:$0xf] }
 0x14c   : > { %v5890_v12 = vor.u32 %v7598_v55, %v5887_v58  ;;  %v7586_v41 = vld [vmem:[#allocation6 + $0x374] sm:$0xf0]  ;;  %v7574_v1 = vld [vmem:[#allocation6 + $0x31c] sm:$0xf] }
 0x14d   : > { %1535 = vmatpush.bf16.msra.mxu1 %v5718_v54  ;;  %1561 = vmatpush.bf16.msra.mxu3 %v5722_v61  ;;  %v5402_v54 = vor.u32 %v7477_v32, %v5399_v36  ;;  %v5886_v61 = vor.u32 %v7602_v48, %v5885_v45  ;;  %v5602_v32 = vor.u32 %v7526_v16, %v5599_v17  ;;  %v7522_v36 = vld [vmem:[#allocation6 + $0x174] sm:$0xf0]  ;;  %v5567_v45 = vld [vmem:[#allocation6 + $0x178] sm:$0xf0] }
 0x14e   : > { %v5823_v48 = vld [vmem:[#allocation6 + $0x378] sm:$0xf0]  ;;  %v5822_v50 = vor.u32 %v7586_v41, %v5821_v37  ;;  %v7514_v55 = vld [vmem:[#allocation6 + $0x134] sm:$0xf0] }
 0x14f   : > { %1523 = vmatpush.bf16.msra.mxu0 %v5430_v13  ;;  %1549 = vmatpush.bf16.msra.mxu2 %v5434_v23  ;;  %v7594_v13 = vld [vmem:[#allocation6 + $0x3b4] sm:$0xf0]  ;;  %v5855_v23 = vld [vmem:[#allocation6 + $0x3b8] sm:$0xf0] }
 0x150   : > { %v5854_v29 = vor.u32 %v7594_v13, %v5853_v9  ;;  %v5789_v58 = vld [vmem:[#allocation6 + $0x318] sm:$0xf]  ;;  %v5791_v4 = vld [vmem:[#allocation6 + $0x338] sm:$0xf0] }
 0x151   : > { %1536 = vmatpush.bf16.msra.mxu1 %v5686_v22  ;;  %1562 = vmatpush.bf16.msra.mxu3 %v5690_v33  ;;  %v7590_v22 = vld [vmem:[#allocation6 + $0x39c] sm:$0xf]  ;;  %v5565_v33 = vld [vmem:[#allocation6 + $0x158] sm:$0xf] }
 0x152   : > { %v5858_v40 = vor.u32 %v7590_v22, %v5855_v23  ;;  %v5566_v49 = vor.u32 %v7522_v36, %v5565_v33  ;;  %v5501_v16 = vld [vmem:[#allocation6 + $0xd8] sm:$0xf]  ;;  %v5794_v23 = vor.u32 %v7574_v1, %v5791_v4  ;;  %v7566_v33 = vld [vmem:[#allocation6 + $0x2dc] sm:$0xf] }
 0x153   : > { %1524 = vmatpush.bf16.msra.mxu0 %v5398_v25  ;;  %1550 = vmatpush.bf16.msra.mxu2 %v5402_v54  ;;  %v7582_v25 = vld [vmem:[#allocation6 + $0x35c] sm:$0xf]  ;;  %v5533_v54 = vld [vmem:[#allocation6 + $0x118] sm:$0xf] }
 0x154   : > { %v5534_v9 = vor.u32 %v7514_v55, %v5533_v54  ;;  %v7506_v17 = vld [vmem:[#allocation6 + $0xf4] sm:$0xf0]  ;;  %v5759_v36 = vld [vmem:[#allocation6 + $0x2f8] sm:$0xf0] }
 0x155   : > { %1537 = vmatpush.bf16.msra.mxu1 %v5654_v51  ;;  %1563 = vmatpush.bf16.msra.mxu3 %v5658_v59  ;;  %v5570_v51 = vor.u32 %v7518_v44, %v5567_v45  ;;  %v5826_v59 = vor.u32 %v7582_v25, %v5823_v48  ;;  %v5757_v22 = vld [vmem:[#allocation6 + $0x2d8] sm:$0xf]  ;;  %v5502_v37 = vor.u32 %v7506_v17, %v5501_v16  ;;  %v7558_v54 = vld [vmem:[#allocation6 + $0x29c] sm:$0xf] }
 0x156   : > { %1525 = vmatmul.bf16.vlgmr.msra.gmra.mxu0 %v8464_v5  ;;  %1551 = vmatmul.bf16.vlgmr.msra.gmra.mxu2 %v8464_v5  ;;  %v5469_v44 = vld [vmem:[#allocation6 + $0x98] sm:$0xf]  ;;  %v5762_v48 = vor.u32 %v7566_v33, %v5759_v36  ;;  %v5727_v55 = vld [vmem:[#allocation6 + $0x2b8] sm:$0xf0] }
 0x157   : > { %1569 = vmatpush.bf16.msrb.mxu0 %v5630_v60  ;;  %1595 = vmatpush.bf16.msrb.mxu2 %v5634_v0  ;;  %v7578_v60 = vld [vmem:[#allocation6 + $0x334] sm:$0xf0]  ;;  %v5535_v0 = vld [vmem:[#allocation6 + $0x138] sm:$0xf0]  ;;  %v5730_v4 = vor.u32 %v7558_v54, %v5727_v55 }
 0x158   : > { %1538 = vmatmul.bf16.vlgmr.msra.gmra.mxu1 %v8466_v8  ;;  %1564 = vmatmul.bf16.vlgmr.msra.gmra.mxu3 %v8466_v8  ;;  %v7498_v45 = vld [vmem:[#allocation6 + $0xb4] sm:$0xf0]  ;;  %v7550_v16 = vld [vmem:[#allocation6 + $0x25c] sm:$0xf] }
 0x159   : > { %1582 = vmatpush.bf16.msrb.mxu1 %v5886_v61  ;;  %1608 = vmatpush.bf16.msrb.mxu3 %v5890_v12  ;;  %v7510_v61 = vld [vmem:[#allocation6 + $0x11c] sm:$0xf]  ;;  %v5790_v12 = vor.u32 %v7578_v60, %v5789_v58  ;;  %v5725_v25 = vld [vmem:[#allocation6 + $0x298] sm:$0xf]  ;;  %v5470_v58 = vor.u32 %v7498_v45, %v5469_v44 }
 0x15a   : > { %v5538_v13 = vor.u32 %v7510_v61, %v5535_v0  ;;  %v5437_v61 = vld [vmem:[#allocation6 + $0x58] sm:$0xf]  ;;  %v5695_v17 = vld [vmem:[#allocation6 + $0x278] sm:$0xf0] }
 0x15b   : > { %1570 = vmatpush.bf16.msrb.mxu0 %v5598_v28  ;;  %1596 = vmatpush.bf16.msrb.mxu2 %v5602_v32  ;;  %v7570_v28 = vld [vmem:[#allocation6 + $0x2f4] sm:$0xf0]  ;;  %v5503_v32 = vld [vmem:[#allocation6 + $0xf8] sm:$0xf0]  ;;  %v5698_v36 = vor.u32 %v7550_v16, %v5695_v17 }
 0x15c   : > { %v7490_v0 = vld [vmem:[#allocation6 + $0x74] sm:$0xf0]  ;;  %v7542_v44 = vld [vmem:[#allocation6 + $0x21c] sm:$0xf] }
 0x15d   : > { %1583 = vmatpush.bf16.msrb.mxu1 %v5854_v29  ;;  %1609 = vmatpush.bf16.msrb.mxu3 %v5858_v40  ;;  %v7502_v29 = vld [vmem:[#allocation6 + $0xdc] sm:$0xf]  ;;  %v5758_v40 = vor.u32 %v7570_v28, %v5757_v22  ;;  %v5693_v1 = vld [vmem:[#allocation6 + $0x258] sm:$0xf]  ;;  %v5438_v22 = vor.u32 %v7490_v0, %v5437_v61 }
 0x15e   : > { %v5506_v41 = vor.u32 %v7502_v29, %v5503_v32  ;;  %v5405_v29 = vld [vmem:[#allocation6 + $0x18] sm:$0xf]  ;;  %v5663_v45 = vld [vmem:[#allocation6 + $0x238] sm:$0xf0] }
 0x15f   : > { %1571 = vmatpush.bf16.msrb.mxu0 %v5566_v49  ;;  %1597 = vmatpush.bf16.msrb.mxu2 %v5570_v51  ;;  %v7562_v49 = vld [vmem:[#allocation6 + $0x2b4] sm:$0xf0]  ;;  %v5471_v51 = vld [vmem:[#allocation6 + $0xb8] sm:$0xf0] }
 0x160   : > { %v7482_v32 = vld [vmem:[#allocation6 + $0x34] sm:$0xf0] }
 0x161   : > { %1584 = vmatpush.bf16.msrb.mxu1 %v5822_v50  ;;  %1610 = vmatpush.bf16.msrb.mxu3 %v5826_v59  ;;  %v7494_v50 = vld [vmem:[#allocation6 + $0x9c] sm:$0xf]  ;;  %v5726_v59 = vor.u32 %v7562_v49, %v5725_v25  ;;  %v5661_v33 = vld [vmem:[#allocation6 + $0x218] sm:$0xf]  ;;  %v5406_v25 = vor.u32 %v7482_v32, %v5405_v29 }
 0x162   : > { %v5474_v60 = vor.u32 %v7494_v50, %v5471_v51  ;;  %v5666_v50 = vor.u32 %v7542_v44, %v5663_v45 }
 0x163   : > { %1572 = vmatpush.bf16.msrb.mxu0 %v5534_v9  ;;  %1598 = vmatpush.bf16.msrb.mxu2 %v5538_v13  ;;  %v7554_v9 = vld [vmem:[#allocation6 + $0x274] sm:$0xf0]  ;;  %v5439_v13 = vld [vmem:[#allocation6 + $0x78] sm:$0xf0] }
 0x165   : > { %1585 = vmatpush.bf16.msrb.mxu1 %v5790_v12  ;;  %1611 = vmatpush.bf16.msrb.mxu3 %v5794_v23  ;;  %v7486_v12 = vld [vmem:[#allocation6 + $0x5c] sm:$0xf]  ;;  %v5694_v23 = vor.u32 %v7554_v9, %v5693_v1 }
 0x166   : > { %v5442_v28 = vor.u32 %v7486_v12, %v5439_v13 }
 0x167   : > { %1573 = vmatpush.bf16.msrb.mxu0 %v5502_v37  ;;  %1599 = vmatpush.bf16.msrb.mxu2 %v5506_v41  ;;  %v7546_v37 = vld [vmem:[#allocation6 + $0x234] sm:$0xf0]  ;;  %v5407_v41 = vld [vmem:[#allocation6 + $0x38] sm:$0xf0] }
 0x169   : > { %1586 = vmatpush.bf16.msrb.mxu1 %v5758_v40  ;;  %1612 = vmatpush.bf16.msrb.mxu3 %v5762_v48  ;;  %v7478_v40 = vld [vmem:[#allocation6 + $0x1c] sm:$0xf]  ;;  %v5662_v48 = vor.u32 %v7546_v37, %v5661_v33 }
 0x16a   : > { %v5410_v49 = vor.u32 %v7478_v40, %v5407_v41 }
 0x16b   : > { %1574 = vmatpush.bf16.msrb.mxu0 %v5470_v58  ;;  %1600 = vmatpush.bf16.msrb.mxu2 %v5474_v60 }
 0x16d   : > { %1587 = vmatpush.bf16.msrb.mxu1 %v5726_v59  ;;  %1613 = vmatpush.bf16.msrb.mxu3 %v5730_v4 }
 0x16f   : > { %1575 = vmatpush.bf16.msrb.mxu0 %v5438_v22  ;;  %1601 = vmatpush.bf16.msrb.mxu2 %v5442_v28 }
 0x171   : > { %1588 = vmatpush.bf16.msrb.mxu1 %v5694_v23  ;;  %1614 = vmatpush.bf16.msrb.mxu3 %v5698_v36 }
 0x173   : > { %1576 = vmatpush.bf16.msrb.mxu0 %v5406_v25  ;;  %1602 = vmatpush.bf16.msrb.mxu2 %v5410_v49 }
 0x175   : > { %1589 = vmatpush.bf16.msrb.mxu1 %v5662_v48  ;;  %1615 = vmatpush.bf16.msrb.mxu3 %v5666_v50 }
 0x176   : > { %1577 = vmatmul.bf16.vlgmr.msrb.gmra.mxu0 %v8464_v5  ;;  %1603 = vmatmul.bf16.vlgmr.msrb.gmra.mxu2 %v8464_v5 }
 0x178   : > { %1590 = vmatmul.bf16.vlgmr.msrb.gmra.mxu1 %v8466_v8  ;;  %1616 = vmatmul.bf16.vlgmr.msrb.gmra.mxu3 %v8466_v8 }
 0x193   : > { %v1422_v51 = vpop.f32.mrf.mxu0 }
 0x197   : > { %v1435_v54 = vpop.f32.mrf.mxu1 }
 0x198   : > { %v1436_v1 = vadd.f32 %v1435_v54, %v1422_v51 }
 0x199   : > { %v1448_v55 = vpop.f32.mrf.mxu2 }
 0x19a   : > { %v1621_v4 = vadd.f32 %v1436_v1, %v8399_v20 }
 0x19b   : > { %v1424_v59 = vpop.f32.mrf.mxu0 }
 0x19c   : > { %v5891_v12 = vmul.f32 -1.442695, %v1621_v4 }
 0x19d   : > { %v1461_v58 = vpop.f32.mrf.mxu3 }
 0x19e   : > { %v1462_v9 = vadd.f32 %v1461_v58, %v1448_v55  ;;  %8031 = vpow2.f32 %v5891_v12 }
 0x19f   : > { %v1437_v60 = vpop.f32.mrf.mxu1 }
 0x1a0   : > { %v1622_v13 = vadd.f32 %v1462_v9, %v8401_v21 }
 0x1a1   : > { %v1450_v61 = vpop.f32.mrf.mxu2 }
 0x1a2   : > { %v5892_v8 = vmul.f32 -1.442695, %v1622_v13 }
 0x1a4   : > { %v8032_v28 = vpop.eup %8031  ;;  %8033 = vpow2.f32 %v5892_v8 }
 0x1a5   : > { %v1463_v0 = vpop.f32.mrf.mxu3  ;;  %v8487_v37 = vadd.f32 1.0, %v8032_v28 }
 0x1a7   : > { %vm1642_vm5 = vweird.f32 %v8487_v37  ;;  %v1648_v28 = vand.u32 2147483648, %v8487_v37 }
 0x1aa   : > { %v8034_v40 = vpop.eup %8033 }
 0x1ab   : > { %v8491_v48 = vadd.f32 1.0, %v8034_v40 }
 0x1ad   : > { %vm1657_vm13 = vweird.f32 %v8491_v48 }
 0x1b3   : > { %v1474_v16 = vpop.f32.mrf.mxu0 }
 0x1b5   : > { %v1487_v5 = vpop.f32.mrf.mxu1 }
 0x1b6   : > { %v1488_v17 = vadd.f32 %v1487_v5, %v1474_v16 }
 0x1b8   : > { %v1623_v22 = vadd.f32 %v1488_v17, %v8403_v26 }
 0x1b9   : > { %v1500_v29 = vpop.f32.mrf.mxu2 }
 0x1ba   : > { %v5893_v23 = vmul.f32 -1.442695, %v1623_v22 }
 0x1bb   : > { %v1513_v32 = vpop.f32.mrf.mxu3  ;;  %v1476_v33 = vpop.f32.mrf.mxu0 }
 0x1bc   : > { %8035 = vpow2.f32 %v5893_v23  ;;  %v1514_v36 = vadd.f32 %v1513_v32, %v1500_v29 }
 0x1bd   : > { %v1489_v20 = vpop.f32.mrf.mxu1  ;;  %8037 = vrcp.f32 %v8487_v37 }
 0x1be   : > { %v1624_v21 = vadd.f32 %v1514_v36, %v8405_v27  ;;  %v1646_v36 = vand.u32 2147483647, %v8487_v37 }
 0x1c0   : > { %v5894_v41 = vmul.f32 -1.442695, %v1624_v21  ;;  %vm1647_vm12 = vcmp.eq.f32.partialorder %v1646_v36, 8.507059e+37 }
 0x1c1   : > { %v1502_v26 = vpop.f32.mrf.mxu2 }
 0x1c2   : > { %v8036_v44 = vpop.eup %8035  ;;  %8039 = vpow2.f32 %v5894_v41 }
 0x1c3   : > { %v1673_v45 = vadd.f32 1.0, %v8036_v44  ;;  %v1515_v25 = vpop.f32.mrf.mxu3  ;;  %v8493_v49 = vpop.eup %8037 }
 0x1c4   : > { %v1638_v54 = vmul.f32 %v8493_v49, %v8487_v37  ;;  %vm1643_vm6 = vweird.f32 %v8493_v49  ;;  %v641_v37 = vld [vmem:[#allocation3 + $0x8] sm:$0xff] }
 0x1c5   : > { %8041 = vrcp.f32 %v1673_v45  ;;  %vm1680_vm2 = vweird.f32 %v1673_v45  ;;  %v1686_v4 = vand.u32 2147483648, %v1673_v45  ;;  %v1684_v17 = vand.u32 2147483647, %v1673_v45  ;;  %vm8520_vm10 = vmor %vm1642_vm5, %vm1643_vm6 }
 0x1c6   : > { %8043 = vrcp.f32 %v8491_v48  ;;  %v1639_v60 = vsub.f32 1.0, %v1638_v54 }
 0x1c7   : > { %v1687_v32 = vor.u32 1.1754944e-38, %v1686_v4  ;;  %vm1685_vm7 = vcmp.eq.f32.partialorder %v1684_v17, 8.507059e+37  ;;  %v1661_v4 = vand.u32 2147483647, %v8491_v48 }
 0x1c8   : > { %v8040_v50 = vpop.eup %8039  ;;  %v1640_v16 = vmul.f32 %v8493_v49, %v1639_v60 }
 0x1c9   : > { %v8496_v51 = vadd.f32 1.0, %v8040_v50  ;;  %vm1662_vm1 = vcmp.eq.f32.partialorder %v1661_v4, 8.507059e+37 }
 0x1ca   : > { %v1641_v21 = vadd.f32 %v8493_v49, %v1640_v16 }
 0x1cb   : > { %v8042_v27 = vpop.eup %8041  ;;  %8045 = vrcp.f32 %v8496_v51  ;;  %vm1695_vm8 = vweird.f32 %v8496_v51  ;;  %v1701_v44 = vand.u32 2147483648, %v8496_v51 }
 0x1cc   : > { %v1676_v55 = vmul.f32 %v8042_v27, %v1673_v45  ;;  %v8501_v59 = vpop.eup %8043  ;;  %vm1681_vm3 = vweird.f32 %v8042_v27  ;;  %v1645_v60 = vsel %vm8520_vm10, %v8493_v49, %v1641_v21 }
 0x1cd   : > { %v1653_v1 = vmul.f32 %v8501_v59, %v8491_v48  ;;  %vm8507_vm4 = vmor %vm1680_vm2, %vm1681_vm3  ;;  %vm1658_vm14 = vweird.f32 %v8501_v59 }
 0x1ce   : > { %v1677_v58 = vsub.f32 1.0, %v1676_v55  ;;  %vm1659_vm0 = vmor %vm1657_vm13, %vm1658_vm14 }
 0x1cf   : > { %v1654_v29 = vsub.f32 1.0, %v1653_v1 }
 0x1d0   : > { %v1678_v61 = vmul.f32 %v8042_v27, %v1677_v58 }
 0x1d1   : > { %v8046_v0 = vpop.eup %8045  ;;  %v1655_v50 = vmul.f32 %v8501_v59, %v1654_v29 }
 0x1d2   : > { %v1691_v12 = vmul.f32 %v8046_v0, %v8496_v51  ;;  %v1679_v5 = vadd.f32 %v8042_v27, %v1678_v61  ;;  %vm1696_vm9 = vweird.f32 %v8046_v0 }
 0x1d3   : > { %v1526_v9 = vpop.f32.mrf.mxu0  ;;  %vm8527_vm11 = vmor %vm1695_vm8, %vm1696_vm9  ;;  %v1656_v17 = vadd.f32 %v8501_v59, %v1655_v50 }
 0x1d4   : > { %v1692_v23 = vsub.f32 1.0, %v1691_v12  ;;  %v1683_v40 = vsel %vm8507_vm4, %v8042_v27, %v1679_v5  ;;  %v1699_v27 = vand.u32 2147483647, %v8496_v51 }
 0x1d5   : > { %v1539_v13 = vpop.f32.mrf.mxu1  ;;  %v1688_v26 = vsel %vm1685_vm7, %v1687_v32, %v1683_v40 }
 0x1d6   : > { %v1540_v22 = vadd.f32 %v1539_v13, %v1526_v9  ;;  %v1693_v20 = vmul.f32 %v8046_v0, %v1692_v23  ;;  %v1702_v9 = vor.u32 1.1754944e-38, %v1701_v44  ;;  %v1745_v51 = vmul.f32 %v1688_v26, %v641_v37  ;;  %v642_v23 = vld [vmem:[#allocation3] sm:$0xff] }
 0x1d7   : > { %v1663_v13 = vand.u32 2147483648, %v8491_v48  ;;  %vm1700_vm15 = vcmp.eq.f32.partialorder %v1699_v27, 8.507059e+37 }
 0x1d8   : > { %v1625_v33 = vadd.f32 %v1540_v22, %v8431_v56  ;;  %v1649_v56 = vor.u32 1.1754944e-38, %v1648_v28  ;;  %v1694_v54 = vadd.f32 %v8046_v0, %v1693_v20 }
 0x1d9   : > { %v1552_v45 = vpop.f32.mrf.mxu2  ;;  %v1664_v28 = vor.u32 1.1754944e-38, %v1663_v13 }
 0x1da   : > { %8047 = vtanh.f32 %v1625_v33  ;;  %v1650_v5 = vsel %vm1647_vm12, %v1649_v56, %v1645_v60  ;;  %v1698_v49 = vsel %vm8527_vm11, %v8046_v0, %v1694_v54 }
 0x1db   : > { %v1565_v25 = vpop.f32.mrf.mxu3  ;;  %v1528_v55 = vpop.f32.mrf.mxu0  ;;  %v1703_v29 = vsel %vm1700_vm15, %v1702_v9, %v1698_v49 }
 0x1dc   : > { %v1566_v61 = vadd.f32 %v1565_v25, %v1552_v45  ;;  %v1746_v33 = vmul.f32 %v1703_v29, %v642_v23 }
 0x1dd   : > { %v1541_v1 = vpop.f32.mrf.mxu1 }
 0x1de   : > { %v1626_v12 = vadd.f32 %v1566_v61, %v8433_v57  ;;  %v1660_v57 = vsel %vm1659_vm0, %v8501_v59, %v1656_v17 }
 0x1df   : > { %v1665_v20 = vsel %vm1662_vm1, %v1664_v28, %v1660_v57 }
 0x1e0   : > { %v8048_v16 = vpop.eup %8047  ;;  %8049 = vtanh.f32 %v1626_v12 }
 0x1e1   : > { %v1747_v8 = vmul.f32 %v8048_v16, %v1650_v5  ;;  %v1554_v32 = vpop.f32.mrf.mxu2 }
 0x1e3   : > { %v1749_v22 = vadd.f32 %v1747_v8, %v1745_v51  ;;  %v1567_v48 = vpop.f32.mrf.mxu3 }
 0x1e5   : > { %1755 = vst [vmem:[#allocation3 + $0x8] sm:$0xff] %v1749_v22 }
 0x1e6   : > { %v8050_v36 = vpop.eup %8049 }
 0x1e7   : > { %v1748_v21 = vmul.f32 %v8050_v36, %v1665_v20 }
 0x1e9   : > { %v1750_v40 = vadd.f32 %v1748_v21, %v1746_v33 }
 0x1eb   : > { %1756 = vst [vmem:[#allocation3] sm:$0xff] %v1750_v40 }
 0x1f3   : > { %v1578_v0 = vpop.f32.mrf.mxu0 }
 0x1f5   : > { %v1591_v41 = vpop.f32.mrf.mxu1 }
 0x1f6   : > { %v1592_v44 = vadd.f32 %v1591_v41, %v1578_v0 }
 0x1f8   : > { %v1627_v56 = vadd.f32 %v1592_v44, %v8435_v62 }
 0x1f9   : > { %v1604_v37 = vpop.f32.mrf.mxu2 }
 0x1fa   : > { %v5895_v45 = vmul.f32 -1.442695, %v1627_v56 }
 0x1fb   : > { %v1617_v26 = vpop.f32.mrf.mxu3  ;;  %v1580_v25 = vpop.f32.mrf.mxu0 }
 0x1fc   : > { %8051 = vpow2.f32 %v5895_v45  ;;  %v1618_v59 = vadd.f32 %v1617_v26, %v1604_v37 }
 0x1fd   : > { %v1593_v50 = vpop.f32.mrf.mxu1 }
 0x1fe   : > { %v1628_v54 = vadd.f32 %v1618_v59, %v8437_v63 }
 0x200   : > { %v5896_v27 = vmul.f32 -1.442695, %v1628_v54 }
 0x201   : > { %v1606_v60 = vpop.f32.mrf.mxu2 }
 0x202   : > { %v8052_v55 = vpop.eup %8051  ;;  %8053 = vpow2.f32 %v5896_v27 }
 0x203   : > { %v1713_v58 = vadd.f32 1.0, %v8052_v55  ;;  %v1619_v61 = vpop.f32.mrf.mxu3 }
 0x205   : > { %8055 = vrcp.f32 %v1713_v58  ;;  %v1726_v12 = vand.u32 2147483648, %v1713_v58  ;;  %vm1720_vm2 = vweird.f32 %v1713_v58  ;;  %v1724_v16 = vand.u32 2147483647, %v1713_v58 }
 0x207   : > { %v1727_v17 = vor.u32 1.1754944e-38, %v1726_v12  ;;  %vm1725_vm5 = vcmp.eq.f32.partialorder %v1724_v16, 8.507059e+37 }
 0x208   : > { %v8054_v1 = vpop.eup %8053 }
 0x209   : > { %v1714_v4 = vadd.f32 1.0, %v8054_v1 }
 0x20b   : > { %v8056_v9 = vpop.eup %8055  ;;  %8057 = vrcp.f32 %v1714_v4  ;;  %v1741_v57 = vand.u32 2147483648, %v1714_v4  ;;  %vm1735_vm7 = vweird.f32 %v1714_v4 }
 0x20c   : > { %v1716_v62 = vmul.f32 %v8056_v9, %v1713_v58  ;;  %8059 = vtanh.f32 %v1749_v22  ;;  %vm1721_vm3 = vweird.f32 %v8056_v9  ;;  %v1739_v22 = vand.u32 2147483647, %v1714_v4 }
 0x20d   : > { %vm1722_vm4 = vmor %vm1720_vm2, %vm1721_vm3  ;;  %8061 = vtanh.f32 %v1750_v40  ;;  %v1742_v36 = vor.u32 1.1754944e-38, %v1741_v57 }
 0x20e   : > { %v1717_v51 = vsub.f32 1.0, %v1716_v62  ;;  %vm1740_vm9 = vcmp.eq.f32.partialorder %v1739_v22, 8.507059e+37 }
 0x210   : > { %v1718_v13 = vmul.f32 %v8056_v9, %v1717_v51 }
 0x211   : > { %v8058_v63 = vpop.eup %8057 }
 0x212   : > { %v1719_v5 = vadd.f32 %v8056_v9, %v1718_v13  ;;  %v1731_v49 = vmul.f32 %v8058_v63, %v1714_v4  ;;  %v8060_v23 = vpop.eup %8059  ;;  %vm1736_vm6 = vweird.f32 %v8058_v63 }
 0x213   : > { %vm1737_vm8 = vmor %vm1735_vm7, %vm1736_vm6  ;;  %v8062_v21 = vpop.eup %8061 }
 0x214   : > { %v1723_v8 = vsel %vm1722_vm4, %v8056_v9, %v1719_v5  ;;  %v1732_v29 = vsub.f32 1.0, %v1731_v49 }
 0x215   : > { %v1728_v28 = vsel %vm1725_vm5, %v1727_v17, %v1723_v8 }
 0x216   : > { %v1753_v32 = vmul.f32 %v8060_v23, %v1728_v28  ;;  %v1733_v48 = vmul.f32 %v8058_v63, %v1732_v29 }
 0x218   : > { %1757 = vst [vmem:[#allocation2] sm:$0xff] %v1753_v32  ;;  %v1734_v33 = vadd.f32 %v8058_v63, %v1733_v48 }
 0x21a   : > { %v1738_v20 = vsel %vm1737_vm8, %v8058_v63, %v1734_v33 }
 0x21b   : > { %v1743_v0 = vsel %vm1740_vm9, %v1742_v36, %v1738_v20 }
 0x21c   : > { %v1754_v41 = vmul.f32 %v8062_v21, %v1743_v0 }
 0x21e   : > { %1758 = vst [vmem:[#allocation2 + $0x8] sm:$0xff] %v1754_v41 }
 0x21f PF: > { %s1759_s30 = sadd.s32 1, %s8359_s20 }
 0x220   : > { %p5897_p9 = scmp.ge.s32.totalorder %s1759_s30, 8 }
 0x222   : > { %1763 = sbr.rel (%p5897_p9) target bundleno = 851 (0x353), region = 68 }
 0x227   : > { %v6124_v40 = vld [vmem:[#allocation6 + $0x1c0] sm:$0xf]  ;;  %v7659_v26 = vld [vmem:[#allocation6 + $0x1c4] sm:$0xf] }
 0x228   : > { %v7663_v44 = vld [vmem:[#allocation6 + $0x1dc] sm:$0xf0]  ;;  %v6126_v25 = vld [vmem:[#allocation6 + $0x1e0] sm:$0xf0] }
 0x229   : > { %v6380_v56 = vld [vmem:[#allocation6 + $0x3c0] sm:$0xf]  ;;  %v6125_v45 = vor.u32 %v7663_v44, %v6124_v40  ;;  %v6129_v50 = vor.u32 %v7659_v26, %v6126_v25  ;;  %v7723_v54 = vld [vmem:[#allocation6 + $0x3c4] sm:$0xf] }
 0x22a   : > { %v7727_v37 = vld [vmem:[#allocation6 + $0x3dc] sm:$0xf0]  ;;  %v6382_v27 = vld [vmem:[#allocation6 + $0x3e0] sm:$0xf0] }
 0x22b   : > { %v6381_v59 = vor.u32 %v7727_v37, %v6380_v56  ;;  %v6092_v55 = vld [vmem:[#allocation6 + $0x180] sm:$0xf]  ;;  %2538 = vmatpush.bf16.msra.mxu0 %v6125_v45  ;;  %v6385_v58 = vor.u32 %v7723_v54, %v6382_v27  ;;  %2564 = vmatpush.bf16.msra.mxu2 %v6129_v50  ;;  %v7651_v62 = vld [vmem:[#allocation6 + $0x184] sm:$0xf] }
 0x22c   : > { %v7655_v60 = vld [vmem:[#allocation6 + $0x19c] sm:$0xf0]  ;;  %v6094_v51 = vld [vmem:[#allocation6 + $0x1a0] sm:$0xf0] }
 0x22d   : > { %v6348_v61 = vld [vmem:[#allocation6 + $0x380] sm:$0xf]  ;;  %2551 = vmatpush.bf16.msra.mxu1 %v6381_v59  ;;  %v6093_v4 = vor.u32 %v7655_v60, %v6092_v55  ;;  %v7715_v12 = vld [vmem:[#allocation6 + $0x384] sm:$0xf]  ;;  %2577 = vmatpush.bf16.msra.mxu3 %v6385_v58  ;;  %v6097_v13 = vor.u32 %v7651_v62, %v6094_v51 }
 0x22e   : > { %v7719_v1 = vld [vmem:[#allocation6 + $0x39c] sm:$0xf0]  ;;  %v6350_v16 = vld [vmem:[#allocation6 + $0x3a0] sm:$0xf0] }
 0x22f   : > { %v6349_v9 = vor.u32 %v7719_v1, %v6348_v61  ;;  %v6060_v63 = vld [vmem:[#allocation6 + $0x140] sm:$0xf]  ;;  %v6353_v17 = vor.u32 %v7715_v12, %v6350_v16  ;;  %v7643_v23 = vld [vmem:[#allocation6 + $0x144] sm:$0xf]  ;;  %2539 = vmatpush.bf16.msra.mxu0 %v6093_v4  ;;  %2565 = vmatpush.bf16.msra.mxu2 %v6097_v13 }
 0x230   : > { %v7647_v5 = vld [vmem:[#allocation6 + $0x15c] sm:$0xf0]  ;;  %v6062_v29 = vld [vmem:[#allocation6 + $0x160] sm:$0xf0] }
 0x231   : > { %v6316_v49 = vld [vmem:[#allocation6 + $0x340] sm:$0xf]  ;;  %v6061_v28 = vor.u32 %v7647_v5, %v6060_v63  ;;  %v7707_v32 = vld [vmem:[#allocation6 + $0x344] sm:$0xf]  ;;  %2552 = vmatpush.bf16.msra.mxu1 %v6349_v9  ;;  %v6065_v22 = vor.u32 %v7643_v23, %v6062_v29  ;;  %2578 = vmatpush.bf16.msra.mxu3 %v6353_v17 }
 0x232   : > { %v7711_v8 = vld [vmem:[#allocation6 + $0x35c] sm:$0xf0]  ;;  %v6318_v57 = vld [vmem:[#allocation6 + $0x360] sm:$0xf0] }
 0x233   : > { %v6317_v48 = vor.u32 %v7711_v8, %v6316_v49  ;;  %v6028_v33 = vld [vmem:[#allocation6 + $0x100] sm:$0xf]  ;;  %v6321_v21 = vor.u32 %v7707_v32, %v6318_v57  ;;  %v7635_v41 = vld [vmem:[#allocation6 + $0x104] sm:$0xf]  ;;  %2540 = vmatpush.bf16.msra.mxu0 %v6061_v28  ;;  %2566 = vmatpush.bf16.msra.mxu2 %v6065_v22 }
 0x234   : > { %v7639_v36 = vld [vmem:[#allocation6 + $0x11c] sm:$0xf0]  ;;  %v6030_v40 = vld [vmem:[#allocation6 + $0x120] sm:$0xf0] }
 0x235   : > { %v6284_v20 = vld [vmem:[#allocation6 + $0x300] sm:$0xf]  ;;  %v7699_v44 = vld [vmem:[#allocation6 + $0x304] sm:$0xf]  ;;  %v6029_v45 = vor.u32 %v7639_v36, %v6028_v33  ;;  %2553 = vmatpush.bf16.msra.mxu1 %v6317_v48  ;;  %v6033_v26 = vor.u32 %v7635_v41, %v6030_v40  ;;  %2579 = vmatpush.bf16.msra.mxu3 %v6321_v21 }
 0x236   : > { %v7703_v0 = vld [vmem:[#allocation6 + $0x31c] sm:$0xf0]  ;;  %v6286_v56 = vld [vmem:[#allocation6 + $0x320] sm:$0xf0] }
 0x237   : > { %v6285_v37 = vor.u32 %v7703_v0, %v6284_v20  ;;  %v5996_v25 = vld [vmem:[#allocation6 + $0xc0] sm:$0xf]  ;;  %v6289_v54 = vor.u32 %v7699_v44, %v6286_v56  ;;  %v7627_v55 = vld [vmem:[#allocation6 + $0xc4] sm:$0xf]  ;;  %2541 = vmatpush.bf16.msra.mxu0 %v6029_v45  ;;  %2567 = vmatpush.bf16.msra.mxu2 %v6033_v26 }
 0x238   : > { %v7631_v59 = vld [vmem:[#allocation6 + $0xdc] sm:$0xf0]  ;;  %v5998_v58 = vld [vmem:[#allocation6 + $0xe0] sm:$0xf0] }
 0x239   : > { %v6252_v50 = vld [vmem:[#allocation6 + $0x2c0] sm:$0xf]  ;;  %v7691_v60 = vld [vmem:[#allocation6 + $0x2c4] sm:$0xf]  ;;  %v5997_v1 = vor.u32 %v7631_v59, %v5996_v25  ;;  %2554 = vmatpush.bf16.msra.mxu1 %v6285_v37  ;;  %v6001_v9 = vor.u32 %v7627_v55, %v5998_v58  ;;  %2580 = vmatpush.bf16.msra.mxu3 %v6289_v54  ;;  %v7664_v55 = vld [vmem:[#allocation6 + $0x1e4] sm:$0xf0] }
 0x23a   : > { %v7695_v27 = vld [vmem:[#allocation6 + $0x2dc] sm:$0xf0]  ;;  %v6254_v61 = vld [vmem:[#allocation6 + $0x2e0] sm:$0xf0]  ;;  %v6388_v58 = vld [vmem:[#allocation6 + $0x3c8] sm:$0xf] }
 0x23b   : > { %v6253_v4 = vor.u32 %v7695_v27, %v6252_v50  ;;  %v5964_v62 = vld [vmem:[#allocation6 + $0x80] sm:$0xf]  ;;  %v6257_v13 = vor.u32 %v7691_v60, %v6254_v61  ;;  %v7619_v63 = vld [vmem:[#allocation6 + $0x84] sm:$0xf]  ;;  %2542 = vmatpush.bf16.msra.mxu0 %v5997_v1  ;;  %2568 = vmatpush.bf16.msra.mxu2 %v6001_v9  ;;  %v6132_v27 = vld [vmem:[#allocation6 + $0x1c8] sm:$0xf] }
 0x23c   : > { %v7623_v51 = vld [vmem:[#allocation6 + $0x9c] sm:$0xf0]  ;;  %v5966_v5 = vld [vmem:[#allocation6 + $0xa0] sm:$0xf0]  ;;  %v7728_v61 = vld [vmem:[#allocation6 + $0x3e4] sm:$0xf0] }
 0x23d   : > { %v6220_v12 = vld [vmem:[#allocation6 + $0x280] sm:$0xf]  ;;  %v7683_v17 = vld [vmem:[#allocation6 + $0x284] sm:$0xf]  ;;  %v5965_v8 = vor.u32 %v7623_v51, %v5964_v62  ;;  %2555 = vmatpush.bf16.msra.mxu1 %v6253_v4  ;;  %v5969_v28 = vor.u32 %v7619_v63, %v5966_v5  ;;  %2581 = vmatpush.bf16.msra.mxu3 %v6257_v13  ;;  %v7660_v1 = vld [vmem:[#allocation6 + $0x1cc] sm:$0xf]  ;;  %v6389_v5 = vor.u32 %v7728_v61, %v6388_v58 }
 0x23e   : > { %v7687_v16 = vld [vmem:[#allocation6 + $0x29c] sm:$0xf0]  ;;  %v6222_v49 = vld [vmem:[#allocation6 + $0x2a0] sm:$0xf0]  ;;  %v6134_v4 = vld [vmem:[#allocation6 + $0x1e8] sm:$0xf0] }
 0x23f   : > { %v6221_v23 = vor.u32 %v7687_v16, %v6220_v12  ;;  %v5932_v29 = vld [vmem:[#allocation6 + $0x40] sm:$0xf]  ;;  %v6225_v48 = vor.u32 %v7683_v17, %v6222_v49  ;;  %v7611_v33 = vld [vmem:[#allocation6 + $0x44] sm:$0xf]  ;;  %2543 = vmatpush.bf16.msra.mxu0 %v5965_v8  ;;  %2569 = vmatpush.bf16.msra.mxu2 %v5969_v28  ;;  %v7724_v51 = vld [vmem:[#allocation6 + $0x3cc] sm:$0xf]  ;;  %v6133_v16 = vor.u32 %v7664_v55, %v6132_v27 }
 0x240   : > { %v7615_v32 = vld [vmem:[#allocation6 + $0x5c] sm:$0xf0]  ;;  %v5934_v36 = vld [vmem:[#allocation6 + $0x60] sm:$0xf0]  ;;  %v6390_v12 = vld [vmem:[#allocation6 + $0x3e8] sm:$0xf0]  ;;  %v6137_v17 = vor.u32 %v7660_v1, %v6134_v4 }
 0x241   : > { %v6188_v57 = vld [vmem:[#allocation6 + $0x240] sm:$0xf]  ;;  %v7675_v20 = vld [vmem:[#allocation6 + $0x244] sm:$0xf]  ;;  %v5933_v0 = vor.u32 %v7615_v32, %v5932_v29  ;;  %2556 = vmatpush.bf16.msra.mxu1 %v6221_v23  ;;  %v5937_v56 = vor.u32 %v7611_v33, %v5934_v36  ;;  %2582 = vmatpush.bf16.msra.mxu3 %v6225_v48  ;;  %v6100_v63 = vld [vmem:[#allocation6 + $0x188] sm:$0xf]  ;;  %v6393_v28 = vor.u32 %v7724_v51, %v6390_v12 }
 0x242   : > { %v7679_v22 = vld [vmem:[#allocation6 + $0x25c] sm:$0xf0]  ;;  %v6190_v21 = vld [vmem:[#allocation6 + $0x260] sm:$0xf0]  ;;  %v7656_v49 = vld [vmem:[#allocation6 + $0x1a4] sm:$0xf0] }
 0x243   : > { %v5900_v41 = vld [vmem:[#allocation6] sm:$0xf]  ;;  %v6189_v44 = vor.u32 %v7679_v22, %v6188_v57  ;;  %v7603_v26 = vld [vmem:[#allocation6 + $0x4] sm:$0xf]  ;;  %v6193_v25 = vor.u32 %v7675_v20, %v6190_v21  ;;  %2544 = vmatpush.bf16.msra.mxu0 %v5933_v0  ;;  %2570 = vmatpush.bf16.msra.mxu2 %v5937_v56  ;;  %v6356_v8 = vld [vmem:[#allocation6 + $0x388] sm:$0xf]  ;;  %v6101_v36 = vor.u32 %v7656_v49, %v6100_v63 }
 0x244   : > { %v7607_v40 = vld [vmem:[#allocation6 + $0x1c] sm:$0xf0]  ;;  %v5902_v59 = vld [vmem:[#allocation6 + $0x20] sm:$0xf0]  ;;  %v7720_v23 = vld [vmem:[#allocation6 + $0x3a4] sm:$0xf0] }
 0x245   : > { %v6156_v45 = vld [vmem:[#allocation6 + $0x200] sm:$0xf]  ;;  %v7667_v50 = vld [vmem:[#allocation6 + $0x204] sm:$0xf]  ;;  %v5901_v60 = vor.u32 %v7607_v40, %v5900_v41  ;;  %2557 = vmatpush.bf16.msra.mxu1 %v6189_v44  ;;  %v5905_v62 = vor.u32 %v7603_v26, %v5902_v59  ;;  %2583 = vmatpush.bf16.msra.mxu3 %v6193_v25  ;;  %v7652_v29 = vld [vmem:[#allocation6 + $0x18c] sm:$0xf]  ;;  %v6357_v0 = vor.u32 %v7720_v23, %v6356_v8 }
 0x246   : > { %v7671_v37 = vld [vmem:[#allocation6 + $0x21c] sm:$0xf0]  ;;  %v6158_v54 = vld [vmem:[#allocation6 + $0x220] sm:$0xf0]  ;;  %v6102_v32 = vld [vmem:[#allocation6 + $0x1a8] sm:$0xf0] }
 0x247   : > { %v6157_v9 = vor.u32 %v7671_v37, %v6156_v45  ;;  %v6161_v13 = vor.u32 %v7667_v50, %v6158_v54  ;;  %2545 = vmatpush.bf16.msra.mxu0 %v5901_v60  ;;  %v7716_v57 = vld [vmem:[#allocation6 + $0x38c] sm:$0xf]  ;;  %2571 = vmatpush.bf16.msra.mxu2 %v5905_v62  ;;  %v1764_v22 = vld [vmem:[#allocation2] sm:$0xff]  ;;  %v6105_v41 = vor.u32 %v7652_v29, %v6102_v32  ;;  %v6068_v40 = vld [vmem:[#allocation6 + $0x148] sm:$0xf] }
 0x248   : > { %v6358_v48 = vld [vmem:[#allocation6 + $0x3a8] sm:$0xf0]  ;;  %v8546_v20 = vpack.c.bf16 %v1764_v22, %v1764_v22  ;;  %v7648_v44 = vld [vmem:[#allocation6 + $0x164] sm:$0xf0] }
 0x249   : > { %2558 = vmatpush.bf16.msra.mxu1 %v6157_v9  ;;  %v1765_v33 = vld [vmem:[#allocation2 + $0x8] sm:$0xff]  ;;  %2584 = vmatpush.bf16.msra.mxu3 %v6161_v13  ;;  %v6361_v45 = vor.u32 %v7716_v57, %v6358_v48  ;;  %v6069_v54 = vor.u32 %v7648_v44, %v6068_v40 }
 0x24a   : > { %v8548_v21 = vpack.c.bf16 %v1765_v33, %v1765_v33  ;;  %v6324_v56 = vld [vmem:[#allocation6 + $0x348] sm:$0xf]  ;;  %v7644_v26 = vld [vmem:[#allocation6 + $0x14c] sm:$0xf]  ;;  %2572 = vmatmul.bf16.vlgmr.msra.gmra.mxu2 %v8546_v20  ;;  %2546 = vmatmul.bf16.vlgmr.msra.gmra.mxu0 %v8546_v20 }
 0x24b   : > { %2590 = vmatpush.bf16.msrb.mxu0 %v6133_v16  ;;  %2616 = vmatpush.bf16.msrb.mxu2 %v6137_v17  ;;  %v7712_v37 = vld [vmem:[#allocation6 + $0x364] sm:$0xf0]  ;;  %v6070_v25 = vld [vmem:[#allocation6 + $0x168] sm:$0xf0] }
 0x24c   : > { %v7708_v59 = vld [vmem:[#allocation6 + $0x34c] sm:$0xf]  ;;  %2585 = vmatmul.bf16.vlgmr.msra.gmra.mxu3 %v8548_v21  ;;  %2559 = vmatmul.bf16.vlgmr.msra.gmra.mxu1 %v8548_v21  ;;  %v6325_v27 = vor.u32 %v7712_v37, %v6324_v56  ;;  %v6073_v55 = vor.u32 %v7644_v26, %v6070_v25  ;;  %v6036_v58 = vld [vmem:[#allocation6 + $0x108] sm:$0xf] }
 0x24d   : > { %2603 = vmatpush.bf16.msrb.mxu1 %v6389_v5  ;;  %2629 = vmatpush.bf16.msrb.mxu3 %v6393_v28  ;;  %v6326_v50 = vld [vmem:[#allocation6 + $0x368] sm:$0xf0]  ;;  %v7640_v60 = vld [vmem:[#allocation6 + $0x124] sm:$0xf0] }
 0x24e   : > { %v6292_v61 = vld [vmem:[#allocation6 + $0x308] sm:$0xf]  ;;  %v6329_v1 = vor.u32 %v7708_v59, %v6326_v50  ;;  %v7636_v9 = vld [vmem:[#allocation6 + $0x10c] sm:$0xf]  ;;  %v6037_v13 = vor.u32 %v7640_v60, %v6036_v58 }
 0x24f   : > { %2591 = vmatpush.bf16.msrb.mxu0 %v6101_v36  ;;  %2617 = vmatpush.bf16.msrb.mxu2 %v6105_v41  ;;  %v7704_v4 = vld [vmem:[#allocation6 + $0x324] sm:$0xf0]  ;;  %v6038_v62 = vld [vmem:[#allocation6 + $0x128] sm:$0xf0] }
 0x250   : > { %v7700_v51 = vld [vmem:[#allocation6 + $0x30c] sm:$0xf]  ;;  %v6293_v16 = vor.u32 %v7704_v4, %v6292_v61  ;;  %v6041_v63 = vor.u32 %v7636_v9, %v6038_v62  ;;  %v6004_v5 = vld [vmem:[#allocation6 + $0xc8] sm:$0xf] }
 0x251   : > { %2604 = vmatpush.bf16.msrb.mxu1 %v6357_v0  ;;  %2630 = vmatpush.bf16.msrb.mxu3 %v6361_v45  ;;  %v6294_v12 = vld [vmem:[#allocation6 + $0x328] sm:$0xf0]  ;;  %v7632_v17 = vld [vmem:[#allocation6 + $0xe4] sm:$0xf0] }
 0x252   : > { %v6260_v49 = vld [vmem:[#allocation6 + $0x2c8] sm:$0xf]  ;;  %v6297_v8 = vor.u32 %v7700_v51, %v6294_v12  ;;  %v7628_v28 = vld [vmem:[#allocation6 + $0xcc] sm:$0xf]  ;;  %v6005_v48 = vor.u32 %v7632_v17, %v6004_v5 }
 0x253   : > { %2592 = vmatpush.bf16.msrb.mxu0 %v6069_v54  ;;  %2618 = vmatpush.bf16.msrb.mxu2 %v6073_v55  ;;  %v7696_v23 = vld [vmem:[#allocation6 + $0x2e4] sm:$0xf0]  ;;  %v6006_v29 = vld [vmem:[#allocation6 + $0xe8] sm:$0xf0] }
 0x254   : > { %v7692_v32 = vld [vmem:[#allocation6 + $0x2cc] sm:$0xf]  ;;  %v6261_v22 = vor.u32 %v7696_v23, %v6260_v49  ;;  %v6009_v33 = vor.u32 %v7628_v28, %v6006_v29  ;;  %v5972_v36 = vld [vmem:[#allocation6 + $0x88] sm:$0xf]  ;;  %v6140_v29 = vld [vmem:[#allocation6 + $0x1d0] sm:$0xf] }
 0x255   : > { %2605 = vmatpush.bf16.msrb.mxu1 %v6325_v27  ;;  %2631 = vmatpush.bf16.msrb.mxu3 %v6329_v1  ;;  %v6262_v57 = vld [vmem:[#allocation6 + $0x2e8] sm:$0xf0]  ;;  %v7624_v0 = vld [vmem:[#allocation6 + $0xa4] sm:$0xf0] }
 0x256   : > { %v6228_v41 = vld [vmem:[#allocation6 + $0x288] sm:$0xf]  ;;  %v6265_v40 = vor.u32 %v7692_v32, %v6262_v57  ;;  %v7620_v56 = vld [vmem:[#allocation6 + $0x8c] sm:$0xf]  ;;  %v5973_v25 = vor.u32 %v7624_v0, %v5972_v36  ;;  %v7665_v32 = vld [vmem:[#allocation6 + $0x1ec] sm:$0xf0] }
 0x257   : > { %2593 = vmatpush.bf16.msrb.mxu0 %v6037_v13  ;;  %2619 = vmatpush.bf16.msrb.mxu2 %v6041_v63  ;;  %v7688_v44 = vld [vmem:[#allocation6 + $0x2a4] sm:$0xf0]  ;;  %v5974_v45 = vld [vmem:[#allocation6 + $0xa8] sm:$0xf0]  ;;  %v6396_v57 = vld [vmem:[#allocation6 + $0x3d0] sm:$0xf] }
 0x258   : > { %v7684_v37 = vld [vmem:[#allocation6 + $0x28c] sm:$0xf]  ;;  %v6229_v59 = vor.u32 %v7688_v44, %v6228_v41  ;;  %v5977_v50 = vor.u32 %v7620_v56, %v5974_v45  ;;  %v5940_v54 = vld [vmem:[#allocation6 + $0x48] sm:$0xf]  ;;  %v6142_v36 = vld [vmem:[#allocation6 + $0x1f0] sm:$0xf0]  ;;  %v6141_v45 = vor.u32 %v7665_v32, %v6140_v29 }
 0x259   : > { %2606 = vmatpush.bf16.msrb.mxu1 %v6293_v16  ;;  %2632 = vmatpush.bf16.msrb.mxu3 %v6297_v8  ;;  %v6230_v26 = vld [vmem:[#allocation6 + $0x2a8] sm:$0xf0]  ;;  %v7616_v27 = vld [vmem:[#allocation6 + $0x64] sm:$0xf0]  ;;  %v6398_v44 = vld [vmem:[#allocation6 + $0x3f0] sm:$0xf0] }
 0x25a   : > { %v6196_v55 = vld [vmem:[#allocation6 + $0x248] sm:$0xf]  ;;  %v6233_v58 = vor.u32 %v7684_v37, %v6230_v26  ;;  %v7612_v61 = vld [vmem:[#allocation6 + $0x4c] sm:$0xf]  ;;  %v5941_v62 = vor.u32 %v7616_v27, %v5940_v54  ;;  %v7721_v27 = vld [vmem:[#allocation6 + $0x3ac] sm:$0xf0] }
 0x25b   : > { %2594 = vmatpush.bf16.msrb.mxu0 %v6005_v48  ;;  %2620 = vmatpush.bf16.msrb.mxu2 %v6009_v33  ;;  %v7680_v60 = vld [vmem:[#allocation6 + $0x264] sm:$0xf0]  ;;  %v5942_v1 = vld [vmem:[#allocation6 + $0x68] sm:$0xf0]  ;;  %v7661_v33 = vld [vmem:[#allocation6 + $0x1d4] sm:$0xf] }
 0x25c   : > { %v7676_v4 = vld [vmem:[#allocation6 + $0x24c] sm:$0xf]  ;;  %v5908_v51 = vld [vmem:[#allocation6 + $0x8] sm:$0xf]  ;;  %v6197_v13 = vor.u32 %v7680_v60, %v6196_v55  ;;  %v5945_v16 = vor.u32 %v7612_v61, %v5942_v1  ;;  %v6145_v26 = vor.u32 %v7661_v33, %v6142_v36  ;;  %v7653_v55 = vld [vmem:[#allocation6 + $0x194] sm:$0xf] }
 0x25d   : > { %2607 = vmatpush.bf16.msrb.mxu1 %v6261_v22  ;;  %2633 = vmatpush.bf16.msrb.mxu3 %v6265_v40  ;;  %v6198_v9 = vld [vmem:[#allocation6 + $0x268] sm:$0xf0]  ;;  %v7608_v12 = vld [vmem:[#allocation6 + $0x24] sm:$0xf0]  ;;  %v7729_v22 = vld [vmem:[#allocation6 + $0x3ec] sm:$0xf0] }
 0x25e   : > { %v6164_v63 = vld [vmem:[#allocation6 + $0x208] sm:$0xf]  ;;  %v7604_v17 = vld [vmem:[#allocation6 + $0xc] sm:$0xf]  ;;  %v6201_v49 = vor.u32 %v7676_v4, %v6198_v9  ;;  %v5909_v48 = vor.u32 %v7608_v12, %v5908_v51  ;;  %v7725_v40 = vld [vmem:[#allocation6 + $0x3d4] sm:$0xf]  ;;  %v6397_v37 = vor.u32 %v7729_v22, %v6396_v57 }
 0x25f   : > { %2595 = vmatpush.bf16.msrb.mxu0 %v5973_v25  ;;  %2621 = vmatpush.bf16.msrb.mxu2 %v5977_v50  ;;  %v7672_v5 = vld [vmem:[#allocation6 + $0x224] sm:$0xf0]  ;;  %v5910_v8 = vld [vmem:[#allocation6 + $0x28] sm:$0xf0]  ;;  %v6108_v25 = vld [vmem:[#allocation6 + $0x190] sm:$0xf]  ;;  %v6401_v54 = vor.u32 %v7725_v40, %v6398_v44 }
 0x260   : > { %v7668_v23 = vld [vmem:[#allocation6 + $0x20c] sm:$0xf]  ;;  %v6165_v0 = vor.u32 %v7672_v5, %v6164_v63  ;;  %v5913_v41 = vor.u32 %v7604_v17, %v5910_v8  ;;  %v6364_v50 = vld [vmem:[#allocation6 + $0x390] sm:$0xf]  ;;  %v7717_v60 = vld [vmem:[#allocation6 + $0x394] sm:$0xf] }
 0x261   : > { %2608 = vmatpush.bf16.msrb.mxu1 %v6229_v59  ;;  %2634 = vmatpush.bf16.msrb.mxu3 %v6233_v58  ;;  %v6166_v28 = vld [vmem:[#allocation6 + $0x228] sm:$0xf0]  ;;  %v7657_v59 = vld [vmem:[#allocation6 + $0x1ac] sm:$0xf0]  ;;  %v6110_v58 = vld [vmem:[#allocation6 + $0x1b0] sm:$0xf0]  ;;  %v6365_v4 = vor.u32 %v7721_v27, %v6364_v50 }
 0x262   : > { %v6169_v56 = vor.u32 %v7668_v23, %v6166_v28  ;;  %v6366_v61 = vld [vmem:[#allocation6 + $0x3b0] sm:$0xf0]  ;;  %v6109_v1 = vor.u32 %v7657_v59, %v6108_v25  ;;  %v6113_v9 = vor.u32 %v7653_v55, %v6110_v58  ;;  %v7649_v51 = vld [vmem:[#allocation6 + $0x16c] sm:$0xf0] }
 0x263   : > { %2596 = vmatpush.bf16.msrb.mxu0 %v5941_v62  ;;  %2622 = vmatpush.bf16.msrb.mxu2 %v5945_v16  ;;  %v6076_v62 = vld [vmem:[#allocation6 + $0x150] sm:$0xf]  ;;  %v7645_v63 = vld [vmem:[#allocation6 + $0x154] sm:$0xf] }
 0x264   : > { %v6332_v12 = vld [vmem:[#allocation6 + $0x350] sm:$0xf]  ;;  %v6078_v5 = vld [vmem:[#allocation6 + $0x170] sm:$0xf0]  ;;  %v6077_v8 = vor.u32 %v7649_v51, %v6076_v62 }
 0x265   : > { %2609 = vmatpush.bf16.msrb.mxu1 %v6197_v13  ;;  %2635 = vmatpush.bf16.msrb.mxu3 %v6201_v49  ;;  %v6369_v13 = vor.u32 %v7717_v60, %v6366_v61  ;;  %v7713_v16 = vld [vmem:[#allocation6 + $0x36c] sm:$0xf0]  ;;  %v7709_v17 = vld [vmem:[#allocation6 + $0x354] sm:$0xf]  ;;  %v6081_v28 = vor.u32 %v7645_v63, %v6078_v5 }
 0x266   : > { %v6334_v49 = vld [vmem:[#allocation6 + $0x370] sm:$0xf0]  ;;  %v6333_v23 = vor.u32 %v7713_v16, %v6332_v12  ;;  %v6044_v29 = vld [vmem:[#allocation6 + $0x110] sm:$0xf] }
 0x267   : > { %2597 = vmatpush.bf16.msrb.mxu0 %v5909_v48  ;;  %2623 = vmatpush.bf16.msrb.mxu2 %v5913_v41  ;;  %v7641_v32 = vld [vmem:[#allocation6 + $0x12c] sm:$0xf0]  ;;  %v6337_v48 = vor.u32 %v7709_v17, %v6334_v49  ;;  %v7637_v33 = vld [vmem:[#allocation6 + $0x114] sm:$0xf] }
 0x268   : > { %v6300_v57 = vld [vmem:[#allocation6 + $0x310] sm:$0xf]  ;;  %v6046_v36 = vld [vmem:[#allocation6 + $0x130] sm:$0xf0]  ;;  %v6045_v40 = vor.u32 %v7641_v32, %v6044_v29 }
 0x269   : > { %2610 = vmatpush.bf16.msrb.mxu1 %v6165_v0  ;;  %2636 = vmatpush.bf16.msrb.mxu3 %v6169_v56  ;;  %v7705_v22 = vld [vmem:[#allocation6 + $0x32c] sm:$0xf0]  ;;  %v7701_v0 = vld [vmem:[#allocation6 + $0x314] sm:$0xf]  ;;  %v6049_v56 = vor.u32 %v7637_v33, %v6046_v36 }
 0x26a   : > { %2598 = vmatmul.bf16.vlgmr.msrb.gmra.mxu0 %v8546_v20  ;;  %2624 = vmatmul.bf16.vlgmr.msrb.gmra.mxu2 %v8546_v20  ;;  %v6302_v41 = vld [vmem:[#allocation6 + $0x330] sm:$0xf0]  ;;  %v6301_v44 = vor.u32 %v7705_v22, %v6300_v57  ;;  %v7697_v59 = vld [vmem:[#allocation6 + $0x2ec] sm:$0xf0] }
 0x26b   : > { %2642 = vmatpush.bf16.msra.mxu0 %v6141_v45  ;;  %2668 = vmatpush.bf16.msra.mxu2 %v6145_v26  ;;  %v6012_v45 = vld [vmem:[#allocation6 + $0xd0] sm:$0xf]  ;;  %v6305_v25 = vor.u32 %v7701_v0, %v6302_v41  ;;  %v7629_v50 = vld [vmem:[#allocation6 + $0xd4] sm:$0xf] }
 0x26c   : > { %2611 = vmatmul.bf16.vlgmr.msrb.gmra.mxu1 %v8548_v21  ;;  %2637 = vmatmul.bf16.vlgmr.msrb.gmra.mxu3 %v8548_v21  ;;  %v6268_v26 = vld [vmem:[#allocation6 + $0x2d0] sm:$0xf]  ;;  %v7693_v27 = vld [vmem:[#allocation6 + $0x2d4] sm:$0xf] }
 0x26d   : > { %2655 = vmatpush.bf16.msra.mxu1 %v6397_v37  ;;  %2681 = vmatpush.bf16.msra.mxu3 %v6401_v54  ;;  %v7633_v37 = vld [vmem:[#allocation6 + $0xec] sm:$0xf0]  ;;  %v6014_v54 = vld [vmem:[#allocation6 + $0xf0] sm:$0xf0]  ;;  %v6269_v60 = vor.u32 %v7697_v59, %v6268_v26 }
 0x26e   : > { %v6270_v55 = vld [vmem:[#allocation6 + $0x2f0] sm:$0xf0]  ;;  %v6013_v58 = vor.u32 %v7633_v37, %v6012_v45  ;;  %v6017_v61 = vor.u32 %v7629_v50, %v6014_v54  ;;  %v7689_v51 = vld [vmem:[#allocation6 + $0x2ac] sm:$0xf0]  ;;  %v6148_v54 = vld [vmem:[#allocation6 + $0x1d8] sm:$0xf] }
 0x26f   : > { %2643 = vmatpush.bf16.msra.mxu0 %v6109_v1  ;;  %2669 = vmatpush.bf16.msra.mxu2 %v6113_v9  ;;  %v5980_v1 = vld [vmem:[#allocation6 + $0x90] sm:$0xf]  ;;  %v6273_v62 = vor.u32 %v7693_v27, %v6270_v55  ;;  %v7621_v12 = vld [vmem:[#allocation6 + $0x94] sm:$0xf]  ;;  %v7666_v27 = vld [vmem:[#allocation6 + $0x1f4] sm:$0xf0] }
 0x270   : > { %v6236_v9 = vld [vmem:[#allocation6 + $0x290] sm:$0xf]  ;;  %v7685_v16 = vld [vmem:[#allocation6 + $0x294] sm:$0xf]  ;;  %v6404_v55 = vld [vmem:[#allocation6 + $0x3d8] sm:$0xf] }
 0x271   : > { %2656 = vmatpush.bf16.msra.mxu1 %v6365_v4  ;;  %2682 = vmatpush.bf16.msra.mxu3 %v6369_v13  ;;  %v7625_v4 = vld [vmem:[#allocation6 + $0xac] sm:$0xf0]  ;;  %v5982_v13 = vld [vmem:[#allocation6 + $0xb0] sm:$0xf0]  ;;  %v6237_v17 = vor.u32 %v7689_v51, %v6236_v9  ;;  %v6406_v51 = vld [vmem:[#allocation6 + $0x3f8] sm:$0xf0] }
 0x272   : > { %v6238_v63 = vld [vmem:[#allocation6 + $0x2b0] sm:$0xf0]  ;;  %v5981_v5 = vor.u32 %v7625_v4, %v5980_v1  ;;  %v5985_v49 = vor.u32 %v7621_v12, %v5982_v13  ;;  %v7681_v32 = vld [vmem:[#allocation6 + $0x26c] sm:$0xf0]  ;;  %v6150_v1 = vld [vmem:[#allocation6 + $0x1f8] sm:$0xf0]  ;;  %v6149_v13 = vor.u32 %v7666_v27, %v6148_v54 }
 0x273   : > { %2644 = vmatpush.bf16.msra.mxu0 %v6077_v8  ;;  %2670 = vmatpush.bf16.msra.mxu2 %v6081_v28  ;;  %v5948_v8 = vld [vmem:[#allocation6 + $0x50] sm:$0xf]  ;;  %v6241_v29 = vor.u32 %v7685_v16, %v6238_v63  ;;  %v7613_v57 = vld [vmem:[#allocation6 + $0x54] sm:$0xf]  ;;  %v6052_v54 = vld [vmem:[#allocation6 + $0x118] sm:$0xf] }
 0x274   : > { %v6204_v28 = vld [vmem:[#allocation6 + $0x250] sm:$0xf]  ;;  %v7677_v22 = vld [vmem:[#allocation6 + $0x254] sm:$0xf]  ;;  %v7642_v27 = vld [vmem:[#allocation6 + $0x134] sm:$0xf0] }
 0x275   : > { %2657 = vmatpush.bf16.msra.mxu1 %v6333_v23  ;;  %2683 = vmatpush.bf16.msra.mxu3 %v6337_v48  ;;  %v7617_v23 = vld [vmem:[#allocation6 + $0x6c] sm:$0xf0]  ;;  %v5950_v48 = vld [vmem:[#allocation6 + $0x70] sm:$0xf0] }
 0x276   : > { %v6206_v33 = vld [vmem:[#allocation6 + $0x270] sm:$0xf0]  ;;  %v5949_v36 = vor.u32 %v7617_v23, %v5948_v8  ;;  %v5916_v0 = vld [vmem:[#allocation6 + $0x10] sm:$0xf]  ;;  %v7722_v23 = vld [vmem:[#allocation6 + $0x3b4] sm:$0xf0] }
 0x277   : > { %2645 = vmatpush.bf16.msra.mxu0 %v6045_v40  ;;  %2671 = vmatpush.bf16.msra.mxu2 %v6049_v56  ;;  %v7609_v41 = vld [vmem:[#allocation6 + $0x2c] sm:$0xf0]  ;;  %v6205_v40 = vor.u32 %v7681_v32, %v6204_v28  ;;  %v7605_v37 = vld [vmem:[#allocation6 + $0x14] sm:$0xf]  ;;  %v6209_v26 = vor.u32 %v7677_v22, %v6206_v33  ;;  %v7654_v28 = vld [vmem:[#allocation6 + $0x19c] sm:$0xf] }
 0x278   : > { %v6172_v56 = vld [vmem:[#allocation6 + $0x210] sm:$0xf]  ;;  %v7669_v59 = vld [vmem:[#allocation6 + $0x214] sm:$0xf]  ;;  %v7718_v32 = vld [vmem:[#allocation6 + $0x39c] sm:$0xf] }
 0x279   : > { %2658 = vmatpush.bf16.msra.mxu1 %v6301_v44  ;;  %2684 = vmatpush.bf16.msra.mxu3 %v6305_v25  ;;  %v5953_v44 = vor.u32 %v7613_v57, %v5950_v48  ;;  %v7673_v45 = vld [vmem:[#allocation6 + $0x22c] sm:$0xf0]  ;;  %v5918_v25 = vld [vmem:[#allocation6 + $0x30] sm:$0xf0]  ;;  %v6374_v57 = vld [vmem:[#allocation6 + $0x3b8] sm:$0xf0] }
 0x27a   : > { %v6174_v50 = vld [vmem:[#allocation6 + $0x230] sm:$0xf0]  ;;  %v6173_v4 = vor.u32 %v7673_v45, %v6172_v56  ;;  %v5921_v9 = vor.u32 %v7605_v37, %v5918_v25  ;;  %v7646_v56 = vld [vmem:[#allocation6 + $0x15c] sm:$0xf] }
 0x27b   : > { %2646 = vmatpush.bf16.msra.mxu0 %v6013_v58  ;;  %2672 = vmatpush.bf16.msra.mxu2 %v6017_v61  ;;  %v5917_v58 = vor.u32 %v7609_v41, %v5916_v0  ;;  %v7662_v61 = vld [vmem:[#allocation6 + $0x1dc] sm:$0xf]  ;;  %v6177_v12 = vor.u32 %v7669_v59, %v6174_v50  ;;  %v7650_v0 = vld [vmem:[#allocation6 + $0x174] sm:$0xf0] }
 0x27c   : > { %v6153_v63 = vor.u32 %v7662_v61, %v6150_v1  ;;  %v6340_v41 = vld [vmem:[#allocation6 + $0x358] sm:$0xf]  ;;  %v6086_v45 = vld [vmem:[#allocation6 + $0x178] sm:$0xf0] }
 0x27d   : > { %2659 = vmatpush.bf16.msra.mxu1 %v6269_v60  ;;  %2685 = vmatpush.bf16.msra.mxu3 %v6273_v62  ;;  %v7730_v60 = vld [vmem:[#allocation6 + $0x3f4] sm:$0xf0]  ;;  %v7726_v62 = vld [vmem:[#allocation6 + $0x3dc] sm:$0xf]  ;;  %v6089_v50 = vor.u32 %v7646_v56, %v6086_v45 }
 0x27e   : > { %v6405_v16 = vor.u32 %v7730_v60, %v6404_v55  ;;  %v6409_v8 = vor.u32 %v7726_v62, %v6406_v51  ;;  %v7710_v37 = vld [vmem:[#allocation6 + $0x35c] sm:$0xf]  ;;  %v6308_v55 = vld [vmem:[#allocation6 + $0x318] sm:$0xf]  ;;  %v6053_v62 = vor.u32 %v7642_v27, %v6052_v54 }
 0x27f   : > { %2647 = vmatpush.bf16.msra.mxu0 %v5981_v5  ;;  %2673 = vmatpush.bf16.msra.mxu2 %v5985_v49  ;;  %v6116_v5 = vld [vmem:[#allocation6 + $0x198] sm:$0xf]  ;;  %v7638_v61 = vld [vmem:[#allocation6 + $0x11c] sm:$0xf] }
 0x280   : > { %v6372_v49 = vld [vmem:[#allocation6 + $0x398] sm:$0xf]  ;;  %v6054_v1 = vld [vmem:[#allocation6 + $0x138] sm:$0xf0] }
 0x281   : > { %2660 = vmatpush.bf16.msra.mxu1 %v6237_v17  ;;  %2686 = vmatpush.bf16.msra.mxu3 %v6241_v29  ;;  %v7658_v17 = vld [vmem:[#allocation6 + $0x1b4] sm:$0xf0]  ;;  %v6118_v29 = vld [vmem:[#allocation6 + $0x1b8] sm:$0xf0]  ;;  %v6373_v22 = vor.u32 %v7722_v23, %v6372_v49 }
 0x282   : > { %v6117_v48 = vor.u32 %v7658_v17, %v6116_v5  ;;  %v6121_v33 = vor.u32 %v7654_v28, %v6118_v29  ;;  %v7706_v60 = vld [vmem:[#allocation6 + $0x334] sm:$0xf0]  ;;  %v7630_v49 = vld [vmem:[#allocation6 + $0xdc] sm:$0xf] }
 0x283   : > { %2648 = vmatpush.bf16.msra.mxu0 %v5949_v36  ;;  %2674 = vmatpush.bf16.msra.mxu2 %v5953_v44  ;;  %v6084_v36 = vld [vmem:[#allocation6 + $0x158] sm:$0xf]  ;;  %v6309_v51 = vor.u32 %v7706_v60, %v6308_v55  ;;  %v7694_v23 = vld [vmem:[#allocation6 + $0x2dc] sm:$0xf] }
 0x284   : > { %v7714_v44 = vld [vmem:[#allocation6 + $0x374] sm:$0xf0]  ;;  %v6085_v25 = vor.u32 %v7650_v0, %v6084_v36  ;;  %v6278_v28 = vld [vmem:[#allocation6 + $0x2f8] sm:$0xf0] }
 0x285   : > { %2661 = vmatpush.bf16.msra.mxu1 %v6205_v40  ;;  %2687 = vmatpush.bf16.msra.mxu3 %v6209_v26  ;;  %v6377_v40 = vor.u32 %v7718_v32, %v6374_v57  ;;  %v6342_v26 = vld [vmem:[#allocation6 + $0x378] sm:$0xf0]  ;;  %v6341_v59 = vor.u32 %v7714_v44, %v6340_v41  ;;  %v7698_v17 = vld [vmem:[#allocation6 + $0x2f4] sm:$0xf0]  ;;  %v6281_v36 = vor.u32 %v7694_v23, %v6278_v28 }
 0x286   : > { %v7690_v0 = vld [vmem:[#allocation6 + $0x2b4] sm:$0xf0]  ;;  %v7622_v41 = vld [vmem:[#allocation6 + $0x9c] sm:$0xf] }
 0x287   : > { %2649 = vmatpush.bf16.msra.mxu0 %v5917_v58  ;;  %2675 = vmatpush.bf16.msra.mxu2 %v5921_v9  ;;  %v6345_v58 = vor.u32 %v7710_v37, %v6342_v26  ;;  %v6310_v9 = vld [vmem:[#allocation6 + $0x338] sm:$0xf0]  ;;  %v7682_v27 = vld [vmem:[#allocation6 + $0x274] sm:$0xf0] }
 0x288   : > { %v7686_v44 = vld [vmem:[#allocation6 + $0x29c] sm:$0xf] }
 0x289   : > { %2662 = vmatpush.bf16.msra.mxu1 %v6173_v4  ;;  %2688 = vmatpush.bf16.msra.mxu3 %v6177_v12  ;;  %v7702_v4 = vld [vmem:[#allocation6 + $0x31c] sm:$0xf]  ;;  %v6057_v12 = vor.u32 %v7638_v61, %v6054_v1 }
 0x28a   : > { %2650 = vmatmul.bf16.vlgmr.msra.gmra.mxu0 %v8546_v20  ;;  %2676 = vmatmul.bf16.vlgmr.msra.gmra.mxu2 %v8546_v20  ;;  %v6313_v5 = vor.u32 %v7702_v4, %v6310_v9  ;;  %v6246_v56 = vld [vmem:[#allocation6 + $0x2b8] sm:$0xf0] }
 0x28b   : > { %2694 = vmatpush.bf16.msrb.mxu0 %v6149_v13  ;;  %2720 = vmatpush.bf16.msrb.mxu2 %v6153_v63  ;;  %v6020_v13 = vld [vmem:[#allocation6 + $0xd8] sm:$0xf]  ;;  %v6249_v54 = vor.u32 %v7686_v44, %v6246_v56  ;;  %v7614_v55 = vld [vmem:[#allocation6 + $0x5c] sm:$0xf] }
 0x28c   : > { %2663 = vmatmul.bf16.vlgmr.msra.gmra.mxu1 %v8548_v21  ;;  %2689 = vmatmul.bf16.vlgmr.msra.gmra.mxu3 %v8548_v21  ;;  %v6276_v63 = vld [vmem:[#allocation6 + $0x2d8] sm:$0xf]  ;;  %v7678_v60 = vld [vmem:[#allocation6 + $0x25c] sm:$0xf] }
 0x28d   : > { %2707 = vmatpush.bf16.msrb.mxu1 %v6405_v16  ;;  %2733 = vmatpush.bf16.msrb.mxu3 %v6409_v8  ;;  %v7634_v16 = vld [vmem:[#allocation6 + $0xf4] sm:$0xf0]  ;;  %v6022_v8 = vld [vmem:[#allocation6 + $0xf8] sm:$0xf0]  ;;  %v6277_v32 = vor.u32 %v7698_v17, %v6276_v63 }
 0x28e   : > { %v6021_v29 = vor.u32 %v7634_v16, %v6020_v13  ;;  %v6025_v57 = vor.u32 %v7630_v49, %v6022_v8  ;;  %v6214_v61 = vld [vmem:[#allocation6 + $0x278] sm:$0xf0]  ;;  %v7674_v16 = vld [vmem:[#allocation6 + $0x234] sm:$0xf0] }
 0x28f   : > { %2695 = vmatpush.bf16.msrb.mxu0 %v6117_v48  ;;  %2721 = vmatpush.bf16.msrb.mxu2 %v6121_v33  ;;  %v5988_v48 = vld [vmem:[#allocation6 + $0x98] sm:$0xf]  ;;  %v6217_v13 = vor.u32 %v7678_v60, %v6214_v61  ;;  %v7606_v63 = vld [vmem:[#allocation6 + $0x1c] sm:$0xf] }
 0x290   : > { %v6244_v33 = vld [vmem:[#allocation6 + $0x298] sm:$0xf]  ;;  %v7670_v17 = vld [vmem:[#allocation6 + $0x21c] sm:$0xf] }
 0x291   : > { %2708 = vmatpush.bf16.msrb.mxu1 %v6373_v22  ;;  %2734 = vmatpush.bf16.msrb.mxu3 %v6377_v40  ;;  %v7626_v22 = vld [vmem:[#allocation6 + $0xb4] sm:$0xf0]  ;;  %v5990_v40 = vld [vmem:[#allocation6 + $0xb8] sm:$0xf0]  ;;  %v6245_v37 = vor.u32 %v7690_v0, %v6244_v33 }
 0x292   : > { %v5989_v45 = vor.u32 %v7626_v22, %v5988_v48  ;;  %v5993_v26 = vor.u32 %v7622_v41, %v5990_v40  ;;  %v6182_v49 = vld [vmem:[#allocation6 + $0x238] sm:$0xf0] }
 0x293   : > { %2696 = vmatpush.bf16.msrb.mxu0 %v6085_v25  ;;  %2722 = vmatpush.bf16.msrb.mxu2 %v6089_v50  ;;  %v5956_v25 = vld [vmem:[#allocation6 + $0x58] sm:$0xf] }
 0x294   : > { %v6212_v50 = vld [vmem:[#allocation6 + $0x258] sm:$0xf] }
 0x295   : > { %2709 = vmatpush.bf16.msrb.mxu1 %v6341_v59  ;;  %2735 = vmatpush.bf16.msrb.mxu3 %v6345_v58  ;;  %v7618_v59 = vld [vmem:[#allocation6 + $0x74] sm:$0xf0]  ;;  %v5958_v58 = vld [vmem:[#allocation6 + $0x78] sm:$0xf0]  ;;  %v6213_v4 = vor.u32 %v7682_v27, %v6212_v50 }
 0x296   : > { %v5957_v1 = vor.u32 %v7618_v59, %v5956_v25  ;;  %v5961_v9 = vor.u32 %v7614_v55, %v5958_v58 }
 0x297   : > { %2697 = vmatpush.bf16.msrb.mxu0 %v6053_v62  ;;  %2723 = vmatpush.bf16.msrb.mxu2 %v6057_v12  ;;  %v5924_v62 = vld [vmem:[#allocation6 + $0x18] sm:$0xf] }
 0x298   : > { %v6180_v12 = vld [vmem:[#allocation6 + $0x218] sm:$0xf] }
 0x299   : > { %2710 = vmatpush.bf16.msrb.mxu1 %v6309_v51  ;;  %2736 = vmatpush.bf16.msrb.mxu3 %v6313_v5  ;;  %v7610_v51 = vld [vmem:[#allocation6 + $0x34] sm:$0xf0]  ;;  %v5926_v5 = vld [vmem:[#allocation6 + $0x38] sm:$0xf0]  ;;  %v6181_v23 = vor.u32 %v7674_v16, %v6180_v12 }
 0x29a   : > { %v5925_v8 = vor.u32 %v7610_v51, %v5924_v62  ;;  %v5929_v28 = vor.u32 %v7606_v63, %v5926_v5 }
 0x29b   : > { %2698 = vmatpush.bf16.msrb.mxu0 %v6021_v29  ;;  %2724 = vmatpush.bf16.msrb.mxu2 %v6025_v57  ;;  %v6185_v29 = vor.u32 %v7670_v17, %v6182_v49 }
 0x29d   : > { %2711 = vmatpush.bf16.msrb.mxu1 %v6277_v32  ;;  %2737 = vmatpush.bf16.msrb.mxu3 %v6281_v36 }
 0x29f   : > { %2699 = vmatpush.bf16.msrb.mxu0 %v5989_v45  ;;  %2725 = vmatpush.bf16.msrb.mxu2 %v5993_v26 }
 0x2a1   : > { %2712 = vmatpush.bf16.msrb.mxu1 %v6245_v37  ;;  %2738 = vmatpush.bf16.msrb.mxu3 %v6249_v54 }
 0x2a3   : > { %2700 = vmatpush.bf16.msrb.mxu0 %v5957_v1  ;;  %2726 = vmatpush.bf16.msrb.mxu2 %v5961_v9 }
 0x2a5   : > { %2713 = vmatpush.bf16.msrb.mxu1 %v6213_v4  ;;  %2739 = vmatpush.bf16.msrb.mxu3 %v6217_v13 }
 0x2a7   : > { %2701 = vmatpush.bf16.msrb.mxu0 %v5925_v8  ;;  %2727 = vmatpush.bf16.msrb.mxu2 %v5929_v28 }
 0x2a9   : > { %2714 = vmatpush.bf16.msrb.mxu1 %v6181_v23  ;;  %2740 = vmatpush.bf16.msrb.mxu3 %v6185_v29 }
 0x2aa   : > { %2702 = vmatmul.bf16.vlgmr.msrb.gmra.mxu0 %v8546_v20  ;;  %2728 = vmatmul.bf16.vlgmr.msrb.gmra.mxu2 %v8546_v20 }
 0x2ac   : > { %2715 = vmatmul.bf16.vlgmr.msrb.gmra.mxu1 %v8548_v21  ;;  %2741 = vmatmul.bf16.vlgmr.msrb.gmra.mxu3 %v8548_v21 }
 0x2c7   : > { %v2547_v32 = vpop.f32.mrf.mxu0 }
 0x2c9   : > { %v2560_v57 = vpop.f32.mrf.mxu1 }
 0x2ca   : > { %v2561_v40 = vadd.f32 %v2560_v57, %v2547_v32 }
 0x2cc   : > { %v2746_v44 = vadd.f32 %v2561_v40, %v8407_v30 }
 0x2cd   : > { %v2573_v48 = vpop.f32.mrf.mxu2 }
 0x2ce   : > { %v6410_v45 = vmul.f32 -1.442695, %v2746_v44 }
 0x2cf   : > { %v2586_v22 = vpop.f32.mrf.mxu3  ;;  %v2549_v33 = vpop.f32.mrf.mxu0 }
 0x2d0   : > { %v2587_v56 = vadd.f32 %v2586_v22, %v2573_v48  ;;  %8063 = vpow2.f32 %v6410_v45 }
 0x2d1   : > { %v2562_v36 = vpop.f32.mrf.mxu1 }
 0x2d2   : > { %v2747_v37 = vadd.f32 %v2587_v56, %v8409_v31 }
 0x2d4   : > { %v6411_v21 = vmul.f32 -1.442695, %v2747_v37 }
 0x2d5   : > { %v2575_v0 = vpop.f32.mrf.mxu2 }
 0x2d6   : > { %v8064_v54 = vpop.eup %8063  ;;  %8065 = vpow2.f32 %v6411_v21 }
 0x2d7   : > { %v2588_v41 = vpop.f32.mrf.mxu3  ;;  %v8569_v61 = vadd.f32 1.0, %v8064_v54 }
 0x2d9   : > { %vm2767_vm13 = vweird.f32 %v8569_v61  ;;  %v2773_v45 = vand.u32 2147483648, %v8569_v61 }
 0x2dc   : > { %v8066_v1 = vpop.eup %8065 }
 0x2dd   : > { %v8573_v12 = vadd.f32 1.0, %v8066_v1 }
 0x2df   : > { %vm2782_vm5 = vweird.f32 %v8573_v12 }
 0x2e7   : > { %v2599_v26 = vpop.f32.mrf.mxu0 }
 0x2e9   : > { %v2612_v20 = vpop.f32.mrf.mxu1 }
 0x2ea   : > { %v2613_v25 = vadd.f32 %v2612_v20, %v2599_v26 }
 0x2ec   : > { %v2748_v59 = vadd.f32 %v2613_v25, %v8411_v34  ;;  %v2771_v25 = vand.u32 2147483647, %v8569_v61 }
 0x2ed   : > { %v2625_v27 = vpop.f32.mrf.mxu2 }
 0x2ee   : > { %v6412_v50 = vmul.f32 -1.442695, %v2748_v59  ;;  %vm2772_vm4 = vcmp.eq.f32.partialorder %v2771_v25, 8.507059e+37 }
 0x2ef   : > { %v2638_v55 = vpop.f32.mrf.mxu3  ;;  %v2601_v58 = vpop.f32.mrf.mxu0 }
 0x2f0   : > { %8067 = vpow2.f32 %v6412_v50  ;;  %v2639_v60 = vadd.f32 %v2638_v55, %v2625_v27  ;;  %v1766_v58 = vld [vmem:[#allocation3 + $0x8] sm:$0xff] }
 0x2f1   : > { %v2614_v30 = vpop.f32.mrf.mxu1  ;;  %8069 = vrcp.f32 %v8569_v61 }
 0x2f2   : > { %v2749_v31 = vadd.f32 %v2639_v60, %v8413_v35 }
 0x2f4   : > { %v6413_v4 = vmul.f32 -1.442695, %v2749_v31 }
 0x2f5   : > { %v2627_v34 = vpop.f32.mrf.mxu2 }
 0x2f6   : > { %v8068_v9 = vpop.eup %8067  ;;  %8071 = vpow2.f32 %v6413_v4 }
 0x2f7   : > { %v2798_v62 = vadd.f32 1.0, %v8068_v9  ;;  %v2640_v51 = vpop.f32.mrf.mxu3  ;;  %v8575_v13 = vpop.eup %8069 }
 0x2f8   : > { %v2763_v5 = vmul.f32 %v8575_v13, %v8569_v61  ;;  %vm2768_vm14 = vweird.f32 %v8575_v13 }
 0x2f9   : > { %8073 = vrcp.f32 %v2798_v62  ;;  %vm2805_vm10 = vweird.f32 %v2798_v62  ;;  %v2811_v57 = vand.u32 2147483648, %v2798_v62  ;;  %v2809_v41 = vand.u32 2147483647, %v2798_v62  ;;  %vm8602_vm2 = vmor %vm2767_vm13, %vm2768_vm14 }
 0x2fa   : > { %8075 = vrcp.f32 %v8573_v12  ;;  %v2764_v23 = vsub.f32 1.0, %v2763_v5 }
 0x2fb   : > { %v2812_v26 = vor.u32 1.1754944e-38, %v2811_v57  ;;  %vm2810_vm15 = vcmp.eq.f32.partialorder %v2809_v41, 8.507059e+37 }
 0x2fc   : > { %v8072_v16 = vpop.eup %8071  ;;  %v2765_v36 = vmul.f32 %v8575_v13, %v2764_v23 }
 0x2fd   : > { %v8578_v63 = vadd.f32 1.0, %v8072_v16  ;;  %v2786_v16 = vand.u32 2147483647, %v8573_v12 }
 0x2fe   : > { %v2766_v59 = vadd.f32 %v8575_v13, %v2765_v36 }
 0x2ff   : > { %v8074_v35 = vpop.eup %8073  ;;  %8077 = vrcp.f32 %v8578_v63  ;;  %vm2820_vm0 = vweird.f32 %v8578_v63  ;;  %v2826_v27 = vand.u32 2147483648, %v8578_v63  ;;  %v2824_v1 = vand.u32 2147483647, %v8578_v63 }
 0x300   : > { %v2801_v17 = vmul.f32 %v8074_v35, %v2798_v62  ;;  %v8583_v8 = vpop.eup %8075  ;;  %vm2806_vm11 = vweird.f32 %v8074_v35  ;;  %v2770_v62 = vsel %vm8602_vm2, %v8575_v13, %v2766_v59  ;;  %vm2787_vm9 = vcmp.eq.f32.partialorder %v2786_v16, 8.507059e+37 }
 0x301   : > { %v2778_v32 = vmul.f32 %v8583_v8, %v8573_v12  ;;  %vm8589_vm12 = vmor %vm2805_vm10, %vm2806_vm11  ;;  %vm2783_vm6 = vweird.f32 %v8583_v8  ;;  %vm2825_vm7 = vcmp.eq.f32.partialorder %v2824_v1, 8.507059e+37 }
 0x302   : > { %v2802_v49 = vsub.f32 1.0, %v2801_v17  ;;  %v2788_v17 = vand.u32 2147483648, %v8573_v12  ;;  %vm2784_vm8 = vmor %vm2782_vm5, %vm2783_vm6 }
 0x303   : > { %v2779_v37 = vsub.f32 1.0, %v2778_v32 }
 0x304   : > { %v2803_v28 = vmul.f32 %v8074_v35, %v2802_v49 }
 0x305   : > { %v8078_v29 = vpop.eup %8077  ;;  %v2780_v61 = vmul.f32 %v8583_v8, %v2779_v37 }
 0x306   : > { %v2816_v22 = vmul.f32 %v8078_v29, %v8578_v63  ;;  %v2804_v0 = vadd.f32 %v8074_v35, %v2803_v28  ;;  %vm2821_vm1 = vweird.f32 %v8078_v29 }
 0x307   : > { %v2651_v48 = vpop.f32.mrf.mxu0  ;;  %vm8609_vm3 = vmor %vm2820_vm0, %vm2821_vm1  ;;  %v2781_v28 = vadd.f32 %v8583_v8, %v2780_v61 }
 0x308   : > { %v2817_v56 = vsub.f32 1.0, %v2816_v22  ;;  %v2808_v50 = vsel %vm8589_vm12, %v8074_v35, %v2804_v0  ;;  %v2827_v35 = vor.u32 1.1754944e-38, %v2826_v27  ;;  %v2789_v22 = vor.u32 1.1754944e-38, %v2788_v17 }
 0x309   : > { %v2664_v33 = vpop.f32.mrf.mxu1  ;;  %v2813_v60 = vsel %vm2810_vm15, %v2812_v26, %v2808_v50 }
 0x30a   : > { %v2665_v44 = vadd.f32 %v2664_v33, %v2651_v48  ;;  %v2818_v21 = vmul.f32 %v8078_v29, %v2817_v56  ;;  %v2870_v63 = vmul.f32 %v2813_v60, %v1766_v58  ;;  %v1767_v48 = vld [vmem:[#allocation3] sm:$0xff] }
 0x30c   : > { %v2750_v20 = vadd.f32 %v2665_v44, %v8439_v2  ;;  %v2774_v2 = vor.u32 1.1754944e-38, %v2773_v45  ;;  %v2819_v31 = vadd.f32 %v8078_v29, %v2818_v21 }
 0x30d   : > { %v2677_v55 = vpop.f32.mrf.mxu2 }
 0x30e   : > { %8079 = vtanh.f32 %v2750_v20  ;;  %v2775_v23 = vsel %vm2772_vm4, %v2774_v2, %v2770_v62  ;;  %v2823_v13 = vsel %vm8609_vm3, %v8078_v29, %v2819_v31 }
 0x30f   : > { %v2690_v30 = vpop.f32.mrf.mxu3  ;;  %v2653_v4 = vpop.f32.mrf.mxu0  ;;  %v2828_v33 = vsel %vm2825_vm7, %v2827_v35, %v2823_v13 }
 0x310   : > { %v2691_v34 = vadd.f32 %v2690_v30, %v2677_v55  ;;  %v2871_v0 = vmul.f32 %v2828_v33, %v1767_v48 }
 0x311   : > { %v2666_v51 = vpop.f32.mrf.mxu1 }
 0x312   : > { %v2751_v5 = vadd.f32 %v2691_v34, %v8441_v3  ;;  %v2785_v3 = vsel %vm2784_vm8, %v8583_v8, %v2781_v28 }
 0x313   : > { %v2790_v40 = vsel %vm2787_vm9, %v2789_v22, %v2785_v3 }
 0x314   : > { %v8080_v49 = vpop.eup %8079  ;;  %8081 = vtanh.f32 %v2751_v5 }
 0x315   : > { %v2872_v32 = vmul.f32 %v8080_v49, %v2775_v23  ;;  %v2679_v36 = vpop.f32.mrf.mxu2 }
 0x317   : > { %v2874_v57 = vadd.f32 %v2872_v32, %v2870_v63  ;;  %v2692_v12 = vpop.f32.mrf.mxu3 }
 0x319   : > { %2880 = vst [vmem:[#allocation3 + $0x8] sm:$0xff] %v2874_v57 }
 0x31a   : > { %v8082_v41 = vpop.eup %8081 }
 0x31b   : > { %v2873_v44 = vmul.f32 %v8082_v41, %v2790_v40 }
 0x31d   : > { %v2875_v56 = vadd.f32 %v2873_v44, %v2871_v0 }
 0x31f   : > { %2881 = vst [vmem:[#allocation3] sm:$0xff] %v2875_v56 }
 0x327   : > { %v2703_v29 = vpop.f32.mrf.mxu0 }
 0x329   : > { %v2716_v45 = vpop.f32.mrf.mxu1 }
 0x32a   : > { %v2717_v37 = vadd.f32 %v2716_v45, %v2703_v29 }
 0x32c   : > { %v2752_v26 = vadd.f32 %v2717_v37, %v8443_v6 }
 0x32d   : > { %v2729_v25 = vpop.f32.mrf.mxu2 }
 0x32e   : > { %v6414_v20 = vmul.f32 -1.442695, %v2752_v26 }
 0x32f   : > { %v2742_v21 = vpop.f32.mrf.mxu3  ;;  %v2705_v59 = vpop.f32.mrf.mxu0 }
 0x330   : > { %8083 = vpow2.f32 %v6414_v20  ;;  %v2743_v8 = vadd.f32 %v2742_v21, %v2729_v25 }
 0x331   : > { %v2718_v50 = vpop.f32.mrf.mxu1 }
 0x332   : > { %v2753_v54 = vadd.f32 %v2743_v8, %v8445_v7 }
 0x334   : > { %v6415_v27 = vmul.f32 -1.442695, %v2753_v54 }
 0x335   : > { %v2731_v58 = vpop.f32.mrf.mxu2 }
 0x336   : > { %v8084_v2 = vpop.eup %8083  ;;  %8085 = vpow2.f32 %v6415_v27 }
 0x337   : > { %v2838_v55 = vadd.f32 1.0, %v8084_v2  ;;  %v2744_v60 = vpop.f32.mrf.mxu3 }
 0x339   : > { %8087 = vrcp.f32 %v2838_v55  ;;  %v2851_v4 = vand.u32 2147483648, %v2838_v55  ;;  %vm2845_vm10 = vweird.f32 %v2838_v55  ;;  %v2849_v62 = vand.u32 2147483647, %v2838_v55 }
 0x33b   : > { %v2852_v51 = vor.u32 1.1754944e-38, %v2851_v4  ;;  %vm2850_vm13 = vcmp.eq.f32.partialorder %v2849_v62, 8.507059e+37 }
 0x33c   : > { %v8086_v30 = vpop.eup %8085 }
 0x33d   : > { %v2839_v61 = vadd.f32 1.0, %v8086_v30 }
 0x33f   : > { %v8088_v31 = vpop.eup %8087  ;;  %8089 = vrcp.f32 %v2839_v61  ;;  %v2866_v23 = vand.u32 2147483648, %v2839_v61  ;;  %v2864_v13 = vand.u32 2147483647, %v2839_v61  ;;  %vm2860_vm15 = vweird.f32 %v2839_v61 }
 0x340   : > { %v2841_v6 = vmul.f32 %v8088_v31, %v2838_v55  ;;  %8091 = vtanh.f32 %v2874_v57  ;;  %vm2846_vm11 = vweird.f32 %v8088_v31 }
 0x341   : > { %vm2847_vm12 = vmor %vm2845_vm10, %vm2846_vm11  ;;  %8093 = vtanh.f32 %v2875_v56  ;;  %v2867_v57 = vor.u32 1.1754944e-38, %v2866_v23  ;;  %vm2865_vm1 = vcmp.eq.f32.partialorder %v2864_v13, 8.507059e+37 }
 0x342   : > { %v2842_v1 = vsub.f32 1.0, %v2841_v6 }
 0x344   : > { %v2843_v9 = vmul.f32 %v8088_v31, %v2842_v1 }
 0x345   : > { %v8090_v7 = vpop.eup %8089 }
 0x346   : > { %v2844_v34 = vadd.f32 %v8088_v31, %v2843_v9  ;;  %v2856_v16 = vmul.f32 %v8090_v7, %v2839_v61  ;;  %v8092_v63 = vpop.eup %8091  ;;  %vm2861_vm14 = vweird.f32 %v8090_v7 }
 0x347   : > { %vm2862_vm0 = vmor %vm2860_vm15, %vm2861_vm14  ;;  %v8094_v22 = vpop.eup %8093 }
 0x348   : > { %v2848_v35 = vsel %vm2847_vm12, %v8088_v31, %v2844_v34  ;;  %v2857_v17 = vsub.f32 1.0, %v2856_v16 }
 0x349   : > { %v2853_v5 = vsel %vm2850_vm13, %v2852_v51, %v2848_v35 }
 0x34a   : > { %v2878_v49 = vmul.f32 %v8092_v63, %v2853_v5  ;;  %v2858_v28 = vmul.f32 %v8090_v7, %v2857_v17 }
 0x34c   : > { %2882 = vst [vmem:[#allocation2] sm:$0xff] %v2878_v49  ;;  %v2859_v32 = vadd.f32 %v8090_v7, %v2858_v28 }
 0x34e   : > { %v2863_v48 = vsel %vm2862_vm0, %v8090_v7, %v2859_v32 }
 0x34f   : > { %v2868_v33 = vsel %vm2865_vm1, %v2867_v57, %v2863_v48 }
 0x350   : > { %v2879_v36 = vmul.f32 %v8094_v22, %v2868_v33 }
 0x352   : > { %2883 = vst [vmem:[#allocation2 + $0x8] sm:$0xff] %v2879_v36 }
 0x353 PF: > { %s2884_s7 = sadd.s32 2, %s8359_s20 }
 0x354   : > { %p6416_p10 = scmp.ge.s32.totalorder %s2884_s7, 8 }
 0x356   : > { %2888 = sbr.rel (%p6416_p10) target bundleno = 1159 (0x487), region = 72 }
 0x35b   : > { %v6643_v3 = vld [vmem:[#allocation6 + $0x1c0] sm:$0xf]  ;;  %v7787_v44 = vld [vmem:[#allocation6 + $0x1c4] sm:$0xf] }
 0x35c   : > { %v7791_v12 = vld [vmem:[#allocation6 + $0x1dc] sm:$0xf0]  ;;  %v6645_v56 = vld [vmem:[#allocation6 + $0x1e0] sm:$0xf0] }
 0x35d   : > { %v6899_v0 = vld [vmem:[#allocation6 + $0x3c0] sm:$0xf]  ;;  %v6644_v41 = vor.u32 %v7791_v12, %v6643_v3  ;;  %v6648_v45 = vor.u32 %v7787_v44, %v6645_v56  ;;  %v7851_v37 = vld [vmem:[#allocation6 + $0x3c4] sm:$0xf] }
 0x35e   : > { %v7855_v40 = vld [vmem:[#allocation6 + $0x3dc] sm:$0xf0]  ;;  %v6901_v26 = vld [vmem:[#allocation6 + $0x3e0] sm:$0xf0] }
 0x35f   : > { %v6900_v29 = vor.u32 %v7855_v40, %v6899_v0  ;;  %v6611_v20 = vld [vmem:[#allocation6 + $0x180] sm:$0xf]  ;;  %3663 = vmatpush.bf16.msra.mxu0 %v6644_v41  ;;  %v6904_v25 = vor.u32 %v7851_v37, %v6901_v26  ;;  %3689 = vmatpush.bf16.msra.mxu2 %v6648_v45  ;;  %v7779_v27 = vld [vmem:[#allocation6 + $0x184] sm:$0xf] }
 0x360   : > { %v7783_v21 = vld [vmem:[#allocation6 + $0x19c] sm:$0xf0]  ;;  %v6613_v2 = vld [vmem:[#allocation6 + $0x1a0] sm:$0xf0] }
 0x361   : > { %v6867_v59 = vld [vmem:[#allocation6 + $0x380] sm:$0xf]  ;;  %3676 = vmatpush.bf16.msra.mxu1 %v6900_v29  ;;  %v6612_v50 = vor.u32 %v7783_v21, %v6611_v20  ;;  %v7843_v55 = vld [vmem:[#allocation6 + $0x384] sm:$0xf]  ;;  %3702 = vmatpush.bf16.msra.mxu3 %v6904_v25  ;;  %v6616_v58 = vor.u32 %v7779_v27, %v6613_v2 }
 0x362   : > { %v7847_v8 = vld [vmem:[#allocation6 + $0x39c] sm:$0xf0]  ;;  %v6869_v60 = vld [vmem:[#allocation6 + $0x3a0] sm:$0xf0] }
 0x363   : > { %v6868_v54 = vor.u32 %v7847_v8, %v6867_v59  ;;  %v6579_v30 = vld [vmem:[#allocation6 + $0x140] sm:$0xf]  ;;  %v6872_v31 = vor.u32 %v7843_v55, %v6869_v60  ;;  %v7771_v4 = vld [vmem:[#allocation6 + $0x144] sm:$0xf]  ;;  %3664 = vmatpush.bf16.msra.mxu0 %v6612_v50  ;;  %3690 = vmatpush.bf16.msra.mxu2 %v6616_v58 }
 0x364   : > { %v7775_v61 = vld [vmem:[#allocation6 + $0x15c] sm:$0xf0]  ;;  %v6581_v62 = vld [vmem:[#allocation6 + $0x160] sm:$0xf0] }
 0x365   : > { %v6835_v6 = vld [vmem:[#allocation6 + $0x340] sm:$0xf]  ;;  %v6580_v9 = vor.u32 %v7775_v61, %v6579_v30  ;;  %v7835_v7 = vld [vmem:[#allocation6 + $0x344] sm:$0xf]  ;;  %3677 = vmatpush.bf16.msra.mxu1 %v6868_v54  ;;  %v6584_v16 = vor.u32 %v7771_v4, %v6581_v62  ;;  %3703 = vmatpush.bf16.msra.mxu3 %v6872_v31 }
 0x366   : > { %v7839_v1 = vld [vmem:[#allocation6 + $0x35c] sm:$0xf0]  ;;  %v6837_v34 = vld [vmem:[#allocation6 + $0x360] sm:$0xf0] }
 0x367   : > { %v6836_v51 = vor.u32 %v7839_v1, %v6835_v6  ;;  %v6547_v35 = vld [vmem:[#allocation6 + $0x100] sm:$0xf]  ;;  %v6840_v17 = vor.u32 %v7835_v7, %v6837_v34  ;;  %v7763_v23 = vld [vmem:[#allocation6 + $0x104] sm:$0xf]  ;;  %3665 = vmatpush.bf16.msra.mxu0 %v6580_v9  ;;  %3691 = vmatpush.bf16.msra.mxu2 %v6584_v16 }
 0x368   : > { %v7767_v63 = vld [vmem:[#allocation6 + $0x11c] sm:$0xf0]  ;;  %v6549_v28 = vld [vmem:[#allocation6 + $0x120] sm:$0xf0] }
 0x369   : > { %v6803_v5 = vld [vmem:[#allocation6 + $0x300] sm:$0xf]  ;;  %v7827_v13 = vld [vmem:[#allocation6 + $0x304] sm:$0xf]  ;;  %v6548_v57 = vor.u32 %v7767_v63, %v6547_v35  ;;  %3678 = vmatpush.bf16.msra.mxu1 %v6836_v51  ;;  %v6552_v22 = vor.u32 %v7763_v23, %v6549_v28  ;;  %3704 = vmatpush.bf16.msra.mxu3 %v6840_v17 }
 0x36a   : > { %v7831_v49 = vld [vmem:[#allocation6 + $0x31c] sm:$0xf0]  ;;  %v6805_v32 = vld [vmem:[#allocation6 + $0x320] sm:$0xf0] }
 0x36b   : > { %v6804_v48 = vor.u32 %v7831_v49, %v6803_v5  ;;  %v6515_v33 = vld [vmem:[#allocation6 + $0xc0] sm:$0xf]  ;;  %v6808_v12 = vor.u32 %v7827_v13, %v6805_v32  ;;  %v7755_v41 = vld [vmem:[#allocation6 + $0xc4] sm:$0xf]  ;;  %3666 = vmatpush.bf16.msra.mxu0 %v6548_v57  ;;  %3692 = vmatpush.bf16.msra.mxu2 %v6552_v22  ;;  %v6651_v32 = vld [vmem:[#allocation6 + $0x1c8] sm:$0xf] }
 0x36c   : > { %v7759_v36 = vld [vmem:[#allocation6 + $0xdc] sm:$0xf0]  ;;  %v6517_v40 = vld [vmem:[#allocation6 + $0xe0] sm:$0xf0]  ;;  %v7792_v57 = vld [vmem:[#allocation6 + $0x1e4] sm:$0xf0] }
 0x36d   : > { %v6771_v3 = vld [vmem:[#allocation6 + $0x2c0] sm:$0xf]  ;;  %v7819_v44 = vld [vmem:[#allocation6 + $0x2c4] sm:$0xf]  ;;  %v6516_v29 = vor.u32 %v7759_v36, %v6515_v33  ;;  %3679 = vmatpush.bf16.msra.mxu1 %v6804_v48  ;;  %v6520_v37 = vor.u32 %v7755_v41, %v6517_v40  ;;  %3705 = vmatpush.bf16.msra.mxu3 %v6808_v12  ;;  %v6907_v48 = vld [vmem:[#allocation6 + $0x3c8] sm:$0xf] }
 0x36e   : > { %v7823_v0 = vld [vmem:[#allocation6 + $0x2dc] sm:$0xf0]  ;;  %v6773_v56 = vld [vmem:[#allocation6 + $0x2e0] sm:$0xf0]  ;;  %v7856_v33 = vld [vmem:[#allocation6 + $0x3e4] sm:$0xf0] }
 0x36f   : > { %v6772_v45 = vor.u32 %v7823_v0, %v6771_v3  ;;  %v6483_v26 = vld [vmem:[#allocation6 + $0x80] sm:$0xf]  ;;  %v6776_v21 = vor.u32 %v7819_v44, %v6773_v56  ;;  %v7747_v8 = vld [vmem:[#allocation6 + $0x84] sm:$0xf]  ;;  %3667 = vmatpush.bf16.msra.mxu0 %v6516_v29  ;;  %3693 = vmatpush.bf16.msra.mxu2 %v6520_v37  ;;  %v7788_v36 = vld [vmem:[#allocation6 + $0x1cc] sm:$0xf]  ;;  %v6652_v56 = vor.u32 %v7792_v57, %v6651_v32 }
 0x370   : > { %v7751_v20 = vld [vmem:[#allocation6 + $0x9c] sm:$0xf0]  ;;  %v6485_v50 = vld [vmem:[#allocation6 + $0xa0] sm:$0xf0]  ;;  %v6653_v3 = vld [vmem:[#allocation6 + $0x1e8] sm:$0xf0] }
 0x371   : > { %v6739_v25 = vld [vmem:[#allocation6 + $0x280] sm:$0xf]  ;;  %v7811_v54 = vld [vmem:[#allocation6 + $0x284] sm:$0xf]  ;;  %v6484_v2 = vor.u32 %v7751_v20, %v6483_v26  ;;  %3680 = vmatpush.bf16.msra.mxu1 %v6772_v45  ;;  %v6488_v58 = vor.u32 %v7747_v8, %v6485_v50  ;;  %3706 = vmatpush.bf16.msra.mxu3 %v6776_v21  ;;  %v7852_v41 = vld [vmem:[#allocation6 + $0x3cc] sm:$0xf]  ;;  %v6908_v45 = vor.u32 %v7856_v33, %v6907_v48 }
 0x372   : > { %v7815_v59 = vld [vmem:[#allocation6 + $0x29c] sm:$0xf0]  ;;  %v6741_v27 = vld [vmem:[#allocation6 + $0x2a0] sm:$0xf0]  ;;  %v6909_v40 = vld [vmem:[#allocation6 + $0x3e8] sm:$0xf0]  ;;  %v6656_v37 = vor.u32 %v7788_v36, %v6653_v3 }
 0x373   : > { %v6740_v55 = vor.u32 %v7815_v59, %v6739_v25  ;;  %v6451_v60 = vld [vmem:[#allocation6 + $0x40] sm:$0xf]  ;;  %v6744_v31 = vor.u32 %v7811_v54, %v6741_v27  ;;  %v7739_v1 = vld [vmem:[#allocation6 + $0x44] sm:$0xf]  ;;  %3668 = vmatpush.bf16.msra.mxu0 %v6484_v2  ;;  %3694 = vmatpush.bf16.msra.mxu2 %v6488_v58  ;;  %v6619_v29 = vld [vmem:[#allocation6 + $0x188] sm:$0xf]  ;;  %v6912_v21 = vor.u32 %v7852_v41, %v6909_v40 }
 0x374   : > { %v7743_v30 = vld [vmem:[#allocation6 + $0x5c] sm:$0xf0]  ;;  %v6453_v4 = vld [vmem:[#allocation6 + $0x60] sm:$0xf0]  ;;  %v7784_v26 = vld [vmem:[#allocation6 + $0x1a4] sm:$0xf0] }
 0x375   : > { %v6707_v61 = vld [vmem:[#allocation6 + $0x240] sm:$0xf]  ;;  %v7803_v9 = vld [vmem:[#allocation6 + $0x244] sm:$0xf]  ;;  %v6452_v7 = vor.u32 %v7743_v30, %v6451_v60  ;;  %3681 = vmatpush.bf16.msra.mxu1 %v6740_v55  ;;  %v6456_v35 = vor.u32 %v7739_v1, %v6453_v4  ;;  %3707 = vmatpush.bf16.msra.mxu3 %v6744_v31  ;;  %v6875_v20 = vld [vmem:[#allocation6 + $0x388] sm:$0xf]  ;;  %v6620_v55 = vor.u32 %v7784_v26, %v6619_v29 }
 0x376   : > { %v7807_v6 = vld [vmem:[#allocation6 + $0x25c] sm:$0xf0]  ;;  %v6709_v62 = vld [vmem:[#allocation6 + $0x260] sm:$0xf0]  ;;  %v7848_v25 = vld [vmem:[#allocation6 + $0x3a4] sm:$0xf0] }
 0x377   : > { %v6419_v34 = vld [vmem:[#allocation6] sm:$0xf]  ;;  %v6708_v16 = vor.u32 %v7807_v6, %v6707_v61  ;;  %v7731_v17 = vld [vmem:[#allocation6 + $0x4] sm:$0xf]  ;;  %v6712_v49 = vor.u32 %v7803_v9, %v6709_v62  ;;  %3669 = vmatpush.bf16.msra.mxu0 %v6452_v7  ;;  %3695 = vmatpush.bf16.msra.mxu2 %v6456_v35  ;;  %v7780_v59 = vld [vmem:[#allocation6 + $0x18c] sm:$0xf]  ;;  %v6876_v30 = vor.u32 %v7848_v25, %v6875_v20 }
 0x378   : > { %v7735_v51 = vld [vmem:[#allocation6 + $0x1c] sm:$0xf0]  ;;  %v6421_v23 = vld [vmem:[#allocation6 + $0x20] sm:$0xf0]  ;;  %v6621_v8 = vld [vmem:[#allocation6 + $0x1a8] sm:$0xf0] }
 0x379   : > { %v6675_v63 = vld [vmem:[#allocation6 + $0x200] sm:$0xf]  ;;  %v7795_v28 = vld [vmem:[#allocation6 + $0x204] sm:$0xf]  ;;  %v6420_v22 = vor.u32 %v7735_v51, %v6419_v34  ;;  %3682 = vmatpush.bf16.msra.mxu1 %v6708_v16  ;;  %v6424_v0 = vor.u32 %v7731_v17, %v6421_v23  ;;  %3708 = vmatpush.bf16.msra.mxu3 %v6712_v49  ;;  %v7844_v50 = vld [vmem:[#allocation6 + $0x38c] sm:$0xf]  ;;  %v6624_v61 = vor.u32 %v7780_v59, %v6621_v8 }
 0x37a   : > { %v7799_v5 = vld [vmem:[#allocation6 + $0x21c] sm:$0xf0]  ;;  %v6677_v13 = vld [vmem:[#allocation6 + $0x220] sm:$0xf0]  ;;  %v6877_v54 = vld [vmem:[#allocation6 + $0x3a8] sm:$0xf0] }
 0x37b   : > { %v6676_v12 = vor.u32 %v7799_v5, %v6675_v63  ;;  %v6680_v44 = vor.u32 %v7795_v28, %v6677_v13  ;;  %3670 = vmatpush.bf16.msra.mxu0 %v6420_v22  ;;  %3696 = vmatpush.bf16.msra.mxu2 %v6424_v0  ;;  %v2889_v27 = vld [vmem:[#allocation2] sm:$0xff]  ;;  %v2890_v2 = vld [vmem:[#allocation2 + $0x8] sm:$0xff]  ;;  %v6880_v4 = vor.u32 %v7844_v50, %v6877_v54 }
 0x37c   : > { %v8628_v58 = vpack.c.bf16 %v2889_v27, %v2889_v27  ;;  %v8630_v60 = vpack.c.bf16 %v2890_v2, %v2890_v2  ;;  %v6587_v31 = vld [vmem:[#allocation6 + $0x148] sm:$0xf]  ;;  %v7772_v62 = vld [vmem:[#allocation6 + $0x14c] sm:$0xf] }
 0x37d   : > { %3683 = vmatpush.bf16.msra.mxu1 %v6676_v12  ;;  %3709 = vmatpush.bf16.msra.mxu3 %v6680_v44  ;;  %v7776_v6 = vld [vmem:[#allocation6 + $0x164] sm:$0xf0]  ;;  %v6589_v7 = vld [vmem:[#allocation6 + $0x168] sm:$0xf0] }
 0x37e   : > { %v6843_v1 = vld [vmem:[#allocation6 + $0x348] sm:$0xf]  ;;  %3697 = vmatmul.bf16.vlgmr.msra.gmra.mxu2 %v8628_v58  ;;  %v7836_v34 = vld [vmem:[#allocation6 + $0x34c] sm:$0xf]  ;;  %3671 = vmatmul.bf16.vlgmr.msra.gmra.mxu0 %v8628_v58  ;;  %v6588_v16 = vor.u32 %v7776_v6, %v6587_v31  ;;  %v6592_v63 = vor.u32 %v7772_v62, %v6589_v7 }
 0x37f   : > { %3715 = vmatpush.bf16.msrb.mxu0 %v6652_v56  ;;  %3741 = vmatpush.bf16.msrb.mxu2 %v6656_v37  ;;  %v7840_v9 = vld [vmem:[#allocation6 + $0x364] sm:$0xf0]  ;;  %v6845_v51 = vld [vmem:[#allocation6 + $0x368] sm:$0xf0] }
 0x380   : > { %3710 = vmatmul.bf16.vlgmr.msra.gmra.mxu3 %v8630_v60  ;;  %3684 = vmatmul.bf16.vlgmr.msra.gmra.mxu1 %v8630_v60  ;;  %v6844_v35 = vor.u32 %v7840_v9, %v6843_v1  ;;  %v6555_v5 = vld [vmem:[#allocation6 + $0x108] sm:$0xf]  ;;  %v6848_v23 = vor.u32 %v7836_v34, %v6845_v51  ;;  %v7764_v13 = vld [vmem:[#allocation6 + $0x10c] sm:$0xf] }
 0x381   : > { %3728 = vmatpush.bf16.msrb.mxu1 %v6908_v45  ;;  %3754 = vmatpush.bf16.msrb.mxu3 %v6912_v21  ;;  %v7768_v17 = vld [vmem:[#allocation6 + $0x124] sm:$0xf0]  ;;  %v6557_v32 = vld [vmem:[#allocation6 + $0x128] sm:$0xf0] }
 0x382   : > { %v6811_v49 = vld [vmem:[#allocation6 + $0x308] sm:$0xf]  ;;  %v7828_v57 = vld [vmem:[#allocation6 + $0x30c] sm:$0xf]  ;;  %v6556_v22 = vor.u32 %v7768_v17, %v6555_v5  ;;  %v6560_v36 = vor.u32 %v7764_v13, %v6557_v32 }
 0x383   : > { %3716 = vmatpush.bf16.msrb.mxu0 %v6620_v55  ;;  %3742 = vmatpush.bf16.msrb.mxu2 %v6624_v61  ;;  %v7832_v28 = vld [vmem:[#allocation6 + $0x324] sm:$0xf0]  ;;  %v6813_v48 = vld [vmem:[#allocation6 + $0x328] sm:$0xf0] }
 0x384   : > { %v6812_v33 = vor.u32 %v7832_v28, %v6811_v49  ;;  %v6523_v3 = vld [vmem:[#allocation6 + $0xc8] sm:$0xf]  ;;  %v6816_v41 = vor.u32 %v7828_v57, %v6813_v48  ;;  %v7756_v44 = vld [vmem:[#allocation6 + $0xcc] sm:$0xf] }
 0x385   : > { %3729 = vmatpush.bf16.msrb.mxu1 %v6876_v30  ;;  %3755 = vmatpush.bf16.msrb.mxu3 %v6880_v4  ;;  %v7760_v12 = vld [vmem:[#allocation6 + $0xe4] sm:$0xf0]  ;;  %v6525_v56 = vld [vmem:[#allocation6 + $0xe8] sm:$0xf0] }
 0x386   : > { %v6779_v0 = vld [vmem:[#allocation6 + $0x2c8] sm:$0xf]  ;;  %v7820_v29 = vld [vmem:[#allocation6 + $0x2cc] sm:$0xf]  ;;  %v6524_v37 = vor.u32 %v7760_v12, %v6523_v3  ;;  %v6528_v20 = vor.u32 %v7756_v44, %v6525_v56  ;;  %v6915_v3 = vld [vmem:[#allocation6 + $0x3d0] sm:$0xf] }
 0x387   : > { %3717 = vmatpush.bf16.msrb.mxu0 %v6588_v16  ;;  %3743 = vmatpush.bf16.msrb.mxu2 %v6592_v63  ;;  %v7824_v40 = vld [vmem:[#allocation6 + $0x2e4] sm:$0xf0]  ;;  %v6781_v45 = vld [vmem:[#allocation6 + $0x2e8] sm:$0xf0] }
 0x388   : > { %v6780_v26 = vor.u32 %v7824_v40, %v6779_v0  ;;  %v6491_v25 = vld [vmem:[#allocation6 + $0x88] sm:$0xf]  ;;  %v6784_v8 = vor.u32 %v7820_v29, %v6781_v45  ;;  %v7748_v54 = vld [vmem:[#allocation6 + $0x8c] sm:$0xf]  ;;  %v7857_v0 = vld [vmem:[#allocation6 + $0x3ec] sm:$0xf0] }
 0x389   : > { %3730 = vmatpush.bf16.msrb.mxu1 %v6844_v35  ;;  %3756 = vmatpush.bf16.msrb.mxu3 %v6848_v23  ;;  %v7752_v21 = vld [vmem:[#allocation6 + $0xa4] sm:$0xf0]  ;;  %v6493_v27 = vld [vmem:[#allocation6 + $0xa8] sm:$0xf0]  ;;  %v6661_v40 = vld [vmem:[#allocation6 + $0x1f0] sm:$0xf0] }
 0x38a   : > { %v6747_v59 = vld [vmem:[#allocation6 + $0x288] sm:$0xf]  ;;  %v7812_v2 = vld [vmem:[#allocation6 + $0x28c] sm:$0xf]  ;;  %v6492_v30 = vor.u32 %v7752_v21, %v6491_v25  ;;  %v6496_v31 = vor.u32 %v7748_v54, %v6493_v27  ;;  %v7853_v29 = vld [vmem:[#allocation6 + $0x3d4] sm:$0xf] }
 0x38b   : > { %3718 = vmatpush.bf16.msrb.mxu0 %v6556_v22  ;;  %3744 = vmatpush.bf16.msrb.mxu2 %v6560_v36  ;;  %v7816_v50 = vld [vmem:[#allocation6 + $0x2a4] sm:$0xf0]  ;;  %v6749_v55 = vld [vmem:[#allocation6 + $0x2a8] sm:$0xf0]  ;;  %v7793_v36 = vld [vmem:[#allocation6 + $0x1ec] sm:$0xf0] }
 0x38c   : > { %v6748_v61 = vor.u32 %v7816_v50, %v6747_v59  ;;  %v6459_v6 = vld [vmem:[#allocation6 + $0x48] sm:$0xf]  ;;  %v6752_v9 = vor.u32 %v7812_v2, %v6749_v55  ;;  %v7740_v7 = vld [vmem:[#allocation6 + $0x4c] sm:$0xf]  ;;  %v6917_v45 = vld [vmem:[#allocation6 + $0x3f0] sm:$0xf0] }
 0x38d   : > { %3731 = vmatpush.bf16.msrb.mxu1 %v6812_v33  ;;  %3757 = vmatpush.bf16.msrb.mxu3 %v6816_v41  ;;  %v7744_v1 = vld [vmem:[#allocation6 + $0x64] sm:$0xf0]  ;;  %v6461_v34 = vld [vmem:[#allocation6 + $0x68] sm:$0xf0]  ;;  %v6659_v33 = vld [vmem:[#allocation6 + $0x1d0] sm:$0xf]  ;;  %v6920_v50 = vor.u32 %v7853_v29, %v6917_v45 }
 0x38e   : > { %v6715_v4 = vld [vmem:[#allocation6 + $0x248] sm:$0xf]  ;;  %v7804_v51 = vld [vmem:[#allocation6 + $0x24c] sm:$0xf]  ;;  %v6460_v35 = vor.u32 %v7744_v1, %v6459_v6  ;;  %v6464_v49 = vor.u32 %v7740_v7, %v6461_v34  ;;  %v7789_v41 = vld [vmem:[#allocation6 + $0x1d4] sm:$0xf] }
 0x38f   : > { %3719 = vmatpush.bf16.msrb.mxu0 %v6524_v37  ;;  %3745 = vmatpush.bf16.msrb.mxu2 %v6528_v20  ;;  %v7808_v62 = vld [vmem:[#allocation6 + $0x264] sm:$0xf0]  ;;  %v6717_v16 = vld [vmem:[#allocation6 + $0x268] sm:$0xf0]  ;;  %v6916_v20 = vor.u32 %v7857_v0, %v6915_v3  ;;  %v6664_v25 = vor.u32 %v7789_v41, %v6661_v40  ;;  %v6627_v21 = vld [vmem:[#allocation6 + $0x190] sm:$0xf] }
 0x390   : > { %v6427_v63 = vld [vmem:[#allocation6 + $0x8] sm:$0xf]  ;;  %v6716_v17 = vor.u32 %v7808_v62, %v6715_v4  ;;  %v7732_v13 = vld [vmem:[#allocation6 + $0xc] sm:$0xf]  ;;  %v6720_v32 = vor.u32 %v7804_v51, %v6717_v16  ;;  %v7785_v59 = vld [vmem:[#allocation6 + $0x1ac] sm:$0xf0] }
 0x391   : > { %3732 = vmatpush.bf16.msrb.mxu1 %v6780_v26  ;;  %3758 = vmatpush.bf16.msrb.mxu3 %v6784_v8  ;;  %v7736_v5 = vld [vmem:[#allocation6 + $0x24] sm:$0xf0]  ;;  %v6429_v57 = vld [vmem:[#allocation6 + $0x28] sm:$0xf0]  ;;  %v6660_v26 = vor.u32 %v7793_v36, %v6659_v33  ;;  %v6883_v8 = vld [vmem:[#allocation6 + $0x390] sm:$0xf] }
 0x392   : > { %v6683_v23 = vld [vmem:[#allocation6 + $0x208] sm:$0xf]  ;;  %v7796_v48 = vld [vmem:[#allocation6 + $0x20c] sm:$0xf]  ;;  %v6428_v12 = vor.u32 %v7736_v5, %v6427_v63  ;;  %v6432_v56 = vor.u32 %v7732_v13, %v6429_v57  ;;  %v7849_v54 = vld [vmem:[#allocation6 + $0x3ac] sm:$0xf0] }
 0x393   : > { %3720 = vmatpush.bf16.msrb.mxu0 %v6492_v30  ;;  %3746 = vmatpush.bf16.msrb.mxu2 %v6496_v31  ;;  %v7800_v28 = vld [vmem:[#allocation6 + $0x224] sm:$0xf0]  ;;  %v6685_v22 = vld [vmem:[#allocation6 + $0x228] sm:$0xf0]  ;;  %v7781_v27 = vld [vmem:[#allocation6 + $0x194] sm:$0xf]  ;;  %v6884_v31 = vor.u32 %v7849_v54, %v6883_v8 }
 0x394   : > { %v6684_v44 = vor.u32 %v7800_v28, %v6683_v23  ;;  %v6688_v37 = vor.u32 %v7796_v48, %v6685_v22  ;;  %v6629_v2 = vld [vmem:[#allocation6 + $0x1b0] sm:$0xf0]  ;;  %v6595_v1 = vld [vmem:[#allocation6 + $0x150] sm:$0xf] }
 0x395   : > { %3733 = vmatpush.bf16.msrb.mxu1 %v6748_v61  ;;  %3759 = vmatpush.bf16.msrb.mxu3 %v6752_v9  ;;  %v7845_v55 = vld [vmem:[#allocation6 + $0x394] sm:$0xf]  ;;  %v6628_v61 = vor.u32 %v7785_v59, %v6627_v21  ;;  %v6632_v6 = vor.u32 %v7781_v27, %v6629_v2  ;;  %v7777_v4 = vld [vmem:[#allocation6 + $0x16c] sm:$0xf0] }
 0x396   : > { %v6885_v30 = vld [vmem:[#allocation6 + $0x3b0] sm:$0xf0]  ;;  %v6851_v9 = vld [vmem:[#allocation6 + $0x350] sm:$0xf]  ;;  %v6596_v63 = vor.u32 %v7777_v4, %v6595_v1 }
 0x397   : > { %3721 = vmatpush.bf16.msrb.mxu0 %v6460_v35  ;;  %3747 = vmatpush.bf16.msrb.mxu2 %v6464_v49  ;;  %v6888_v62 = vor.u32 %v7845_v55, %v6885_v30  ;;  %v7841_v7 = vld [vmem:[#allocation6 + $0x36c] sm:$0xf0]  ;;  %v7773_v34 = vld [vmem:[#allocation6 + $0x154] sm:$0xf] }
 0x398   : > { %v6597_v51 = vld [vmem:[#allocation6 + $0x170] sm:$0xf0]  ;;  %v6852_v5 = vor.u32 %v7841_v7, %v6851_v9  ;;  %v6563_v49 = vld [vmem:[#allocation6 + $0x110] sm:$0xf] }
 0x399   : > { %3734 = vmatpush.bf16.msrb.mxu1 %v6716_v17  ;;  %3760 = vmatpush.bf16.msrb.mxu3 %v6720_v32  ;;  %v7837_v16 = vld [vmem:[#allocation6 + $0x354] sm:$0xf]  ;;  %v6600_v17 = vor.u32 %v7773_v34, %v6597_v51  ;;  %v7769_v23 = vld [vmem:[#allocation6 + $0x12c] sm:$0xf0] }
 0x39a   : > { %v6853_v35 = vld [vmem:[#allocation6 + $0x370] sm:$0xf0]  ;;  %v6819_v28 = vld [vmem:[#allocation6 + $0x310] sm:$0xf]  ;;  %v6564_v36 = vor.u32 %v7769_v23, %v6563_v49 }
 0x39b   : > { %3722 = vmatpush.bf16.msrb.mxu0 %v6428_v12  ;;  %3748 = vmatpush.bf16.msrb.mxu2 %v6432_v56  ;;  %v6856_v13 = vor.u32 %v7837_v16, %v6853_v35  ;;  %v7833_v32 = vld [vmem:[#allocation6 + $0x32c] sm:$0xf0]  ;;  %v7765_v57 = vld [vmem:[#allocation6 + $0x114] sm:$0xf] }
 0x39c   : > { %v6565_v48 = vld [vmem:[#allocation6 + $0x130] sm:$0xf0]  ;;  %v6820_v3 = vor.u32 %v7833_v32, %v6819_v28  ;;  %v6531_v0 = vld [vmem:[#allocation6 + $0xd0] sm:$0xf] }
 0x39d   : > { %3735 = vmatpush.bf16.msrb.mxu1 %v6684_v44  ;;  %3761 = vmatpush.bf16.msrb.mxu3 %v6688_v37  ;;  %v7829_v22 = vld [vmem:[#allocation6 + $0x314] sm:$0xf]  ;;  %v6568_v12 = vor.u32 %v7765_v57, %v6565_v48  ;;  %v7761_v41 = vld [vmem:[#allocation6 + $0xec] sm:$0xf0] }
 0x39e   : > { %3723 = vmatmul.bf16.vlgmr.msrb.gmra.mxu0 %v8628_v58  ;;  %3749 = vmatmul.bf16.vlgmr.msrb.gmra.mxu2 %v8628_v58  ;;  %v6821_v33 = vld [vmem:[#allocation6 + $0x330] sm:$0xf0]  ;;  %v6787_v40 = vld [vmem:[#allocation6 + $0x2d0] sm:$0xf] }
 0x39f   : > { %3767 = vmatpush.bf16.msra.mxu0 %v6660_v26  ;;  %3793 = vmatpush.bf16.msra.mxu2 %v6664_v25  ;;  %v6824_v44 = vor.u32 %v7829_v22, %v6821_v33  ;;  %v7825_v56 = vld [vmem:[#allocation6 + $0x2ec] sm:$0xf0]  ;;  %v7757_v29 = vld [vmem:[#allocation6 + $0xd4] sm:$0xf] }
 0x3a0   : > { %3736 = vmatmul.bf16.vlgmr.msrb.gmra.mxu1 %v8630_v60  ;;  %3762 = vmatmul.bf16.vlgmr.msrb.gmra.mxu3 %v8630_v60  ;;  %v6533_v45 = vld [vmem:[#allocation6 + $0xf0] sm:$0xf0]  ;;  %v6788_v25 = vor.u32 %v7825_v56, %v6787_v40  ;;  %v6499_v59 = vld [vmem:[#allocation6 + $0x90] sm:$0xf]  ;;  %v7858_v40 = vld [vmem:[#allocation6 + $0x3f4] sm:$0xf0] }
 0x3a1   : > { %3780 = vmatpush.bf16.msra.mxu1 %v6916_v20  ;;  %3806 = vmatpush.bf16.msra.mxu3 %v6920_v50  ;;  %v7821_v37 = vld [vmem:[#allocation6 + $0x2d4] sm:$0xf]  ;;  %v6532_v20 = vor.u32 %v7761_v41, %v6531_v0  ;;  %v6536_v21 = vor.u32 %v7757_v29, %v6533_v45  ;;  %v7753_v8 = vld [vmem:[#allocation6 + $0xac] sm:$0xf0]  ;;  %v6923_v0 = vld [vmem:[#allocation6 + $0x3d8] sm:$0xf] }
 0x3a2   : > { %v6789_v26 = vld [vmem:[#allocation6 + $0x2f0] sm:$0xf0]  ;;  %v6755_v50 = vld [vmem:[#allocation6 + $0x290] sm:$0xf]  ;;  %v6669_v56 = vld [vmem:[#allocation6 + $0x1f8] sm:$0xf0] }
 0x3a3   : > { %3768 = vmatpush.bf16.msra.mxu0 %v6628_v61  ;;  %3794 = vmatpush.bf16.msra.mxu2 %v6632_v6  ;;  %v6792_v54 = vor.u32 %v7821_v37, %v6789_v26  ;;  %v7817_v27 = vld [vmem:[#allocation6 + $0x2ac] sm:$0xf0]  ;;  %v7749_v2 = vld [vmem:[#allocation6 + $0x94] sm:$0xf]  ;;  %v7854_v37 = vld [vmem:[#allocation6 + $0x3dc] sm:$0xf] }
 0x3a4   : > { %v6501_v55 = vld [vmem:[#allocation6 + $0xb0] sm:$0xf0]  ;;  %v6756_v6 = vor.u32 %v7817_v27, %v6755_v50  ;;  %v6467_v4 = vld [vmem:[#allocation6 + $0x50] sm:$0xf]  ;;  %v6925_v26 = vld [vmem:[#allocation6 + $0x3f8] sm:$0xf0] }
 0x3a5   : > { %3781 = vmatpush.bf16.msra.mxu1 %v6884_v31  ;;  %3807 = vmatpush.bf16.msra.mxu3 %v6888_v62  ;;  %v7813_v30 = vld [vmem:[#allocation6 + $0x294] sm:$0xf]  ;;  %v6500_v31 = vor.u32 %v7753_v8, %v6499_v59  ;;  %v6504_v1 = vor.u32 %v7749_v2, %v6501_v55  ;;  %v7745_v9 = vld [vmem:[#allocation6 + $0x6c] sm:$0xf0]  ;;  %v6635_v8 = vld [vmem:[#allocation6 + $0x198] sm:$0xf]  ;;  %v6928_v27 = vor.u32 %v7854_v37, %v6925_v26 }
 0x3a6   : > { %v6757_v61 = vld [vmem:[#allocation6 + $0x2b0] sm:$0xf0]  ;;  %v6723_v62 = vld [vmem:[#allocation6 + $0x250] sm:$0xf]  ;;  %v7786_v50 = vld [vmem:[#allocation6 + $0x1b4] sm:$0xf0] }
 0x3a7   : > { %3769 = vmatpush.bf16.msra.mxu0 %v6596_v63  ;;  %3795 = vmatpush.bf16.msra.mxu2 %v6600_v17  ;;  %v6760_v7 = vor.u32 %v7813_v30, %v6757_v61  ;;  %v7809_v34 = vld [vmem:[#allocation6 + $0x26c] sm:$0xf0]  ;;  %v7741_v51 = vld [vmem:[#allocation6 + $0x54] sm:$0xf]  ;;  %v7850_v2 = vld [vmem:[#allocation6 + $0x3b4] sm:$0xf0] }
 0x3a8   : > { %v6469_v16 = vld [vmem:[#allocation6 + $0x70] sm:$0xf0]  ;;  %v6435_v17 = vld [vmem:[#allocation6 + $0x10] sm:$0xf]  ;;  %v6724_v23 = vor.u32 %v7809_v34, %v6723_v62  ;;  %v7782_v55 = vld [vmem:[#allocation6 + $0x19c] sm:$0xf] }
 0x3a9   : > { %3782 = vmatpush.bf16.msra.mxu1 %v6852_v5  ;;  %3808 = vmatpush.bf16.msra.mxu3 %v6856_v13  ;;  %v7805_v35 = vld [vmem:[#allocation6 + $0x254] sm:$0xf]  ;;  %v6468_v5 = vor.u32 %v7745_v9, %v6467_v4  ;;  %v7737_v49 = vld [vmem:[#allocation6 + $0x2c] sm:$0xf0]  ;;  %v6472_v28 = vor.u32 %v7741_v51, %v6469_v16  ;;  %v6637_v30 = vld [vmem:[#allocation6 + $0x1b8] sm:$0xf0] }
 0x3aa   : > { %v6725_v63 = vld [vmem:[#allocation6 + $0x270] sm:$0xf0]  ;;  %v6691_v13 = vld [vmem:[#allocation6 + $0x210] sm:$0xf]  ;;  %v6436_v41 = vor.u32 %v7737_v49, %v6435_v17  ;;  %v7846_v61 = vld [vmem:[#allocation6 + $0x39c] sm:$0xf]  ;;  %v6640_v4 = vor.u32 %v7782_v55, %v6637_v30 }
 0x3ab   : > { %3770 = vmatpush.bf16.msra.mxu0 %v6564_v36  ;;  %3796 = vmatpush.bf16.msra.mxu2 %v6568_v12  ;;  %v7801_v32 = vld [vmem:[#allocation6 + $0x22c] sm:$0xf0]  ;;  %v7733_v57 = vld [vmem:[#allocation6 + $0x14] sm:$0xf]  ;;  %v6728_v48 = vor.u32 %v7805_v35, %v6725_v63  ;;  %v7794_v12 = vld [vmem:[#allocation6 + $0x1f4] sm:$0xf0] }
 0x3ac   : > { %v6437_v22 = vld [vmem:[#allocation6 + $0x30] sm:$0xf0]  ;;  %v6692_v29 = vor.u32 %v7801_v32, %v6691_v13  ;;  %v6603_v9 = vld [vmem:[#allocation6 + $0x158] sm:$0xf]  ;;  %v7774_v16 = vld [vmem:[#allocation6 + $0x15c] sm:$0xf] }
 0x3ad   : > { %3783 = vmatpush.bf16.msra.mxu1 %v6820_v3  ;;  %3809 = vmatpush.bf16.msra.mxu3 %v6824_v44  ;;  %v7797_v33 = vld [vmem:[#allocation6 + $0x214] sm:$0xf]  ;;  %v6667_v3 = vld [vmem:[#allocation6 + $0x1d8] sm:$0xf]  ;;  %v7790_v44 = vld [vmem:[#allocation6 + $0x1dc] sm:$0xf]  ;;  %v6440_v45 = vor.u32 %v7733_v57, %v6437_v22 }
 0x3ae   : > { %v6693_v36 = vld [vmem:[#allocation6 + $0x230] sm:$0xf0]  ;;  %v6672_v59 = vor.u32 %v7790_v44, %v6669_v56  ;;  %v7778_v62 = vld [vmem:[#allocation6 + $0x174] sm:$0xf0]  ;;  %v6605_v35 = vld [vmem:[#allocation6 + $0x178] sm:$0xf0] }
 0x3af   : > { %3771 = vmatpush.bf16.msra.mxu0 %v6532_v20  ;;  %3797 = vmatpush.bf16.msra.mxu2 %v6536_v21  ;;  %v6696_v20 = vor.u32 %v7797_v33, %v6693_v36  ;;  %v6924_v21 = vor.u32 %v7858_v40, %v6923_v0  ;;  %v7842_v51 = vld [vmem:[#allocation6 + $0x374] sm:$0xf0]  ;;  %v7838_v63 = vld [vmem:[#allocation6 + $0x35c] sm:$0xf]  ;;  %v6604_v17 = vor.u32 %v7778_v62, %v6603_v9 }
 0x3b0   : > { %v7770_v13 = vld [vmem:[#allocation6 + $0x134] sm:$0xf0]  ;;  %v7766_v22 = vld [vmem:[#allocation6 + $0x11c] sm:$0xf] }
 0x3b1   : > { %3784 = vmatpush.bf16.msra.mxu1 %v6788_v25  ;;  %3810 = vmatpush.bf16.msra.mxu3 %v6792_v54  ;;  %v6668_v25 = vor.u32 %v7794_v12, %v6667_v3  ;;  %v6891_v54 = vld [vmem:[#allocation6 + $0x398] sm:$0xf]  ;;  %v6573_v33 = vld [vmem:[#allocation6 + $0x138] sm:$0xf0] }
 0x3b2   : > { %v6827_v32 = vld [vmem:[#allocation6 + $0x318] sm:$0xf]  ;;  %v7830_v36 = vld [vmem:[#allocation6 + $0x31c] sm:$0xf] }
 0x3b3   : > { %3772 = vmatpush.bf16.msra.mxu0 %v6500_v31  ;;  %3798 = vmatpush.bf16.msra.mxu2 %v6504_v1  ;;  %v6893_v31 = vld [vmem:[#allocation6 + $0x3b8] sm:$0xf0]  ;;  %v6892_v1 = vor.u32 %v7850_v2, %v6891_v54  ;;  %v6539_v40 = vld [vmem:[#allocation6 + $0xd8] sm:$0xf] }
 0x3b4   : > { %v6896_v34 = vor.u32 %v7846_v61, %v6893_v31  ;;  %v6829_v3 = vld [vmem:[#allocation6 + $0x338] sm:$0xf0]  ;;  %v7762_v44 = vld [vmem:[#allocation6 + $0xf4] sm:$0xf0] }
 0x3b5   : > { %3785 = vmatpush.bf16.msra.mxu1 %v6756_v6  ;;  %3811 = vmatpush.bf16.msra.mxu3 %v6760_v7  ;;  %v6636_v6 = vor.u32 %v7786_v50, %v6635_v8  ;;  %v6859_v7 = vld [vmem:[#allocation6 + $0x358] sm:$0xf]  ;;  %v7758_v37 = vld [vmem:[#allocation6 + $0xdc] sm:$0xf] }
 0x3b6   : > { %v6860_v49 = vor.u32 %v7842_v51, %v6859_v7  ;;  %v6795_v56 = vld [vmem:[#allocation6 + $0x2d8] sm:$0xf]  ;;  %v6541_v26 = vld [vmem:[#allocation6 + $0xf8] sm:$0xf0] }
 0x3b7   : > { %3773 = vmatpush.bf16.msra.mxu0 %v6468_v5  ;;  %3799 = vmatpush.bf16.msra.mxu2 %v6472_v28  ;;  %v6861_v5 = vld [vmem:[#allocation6 + $0x378] sm:$0xf0]  ;;  %v6571_v28 = vld [vmem:[#allocation6 + $0x118] sm:$0xf]  ;;  %v6544_v8 = vor.u32 %v7758_v37, %v6541_v26 }
 0x3b8   : > { %v6864_v57 = vor.u32 %v7838_v63, %v6861_v5  ;;  %v6572_v12 = vor.u32 %v7770_v13, %v6571_v28  ;;  %v6507_v50 = vld [vmem:[#allocation6 + $0x98] sm:$0xf]  ;;  %v7750_v30 = vld [vmem:[#allocation6 + $0x9c] sm:$0xf] }
 0x3b9   : > { %3786 = vmatpush.bf16.msra.mxu1 %v6724_v23  ;;  %3812 = vmatpush.bf16.msra.mxu3 %v6728_v48  ;;  %v6608_v23 = vor.u32 %v7774_v16, %v6605_v35  ;;  %v7834_v48 = vld [vmem:[#allocation6 + $0x334] sm:$0xf0]  ;;  %v6509_v61 = vld [vmem:[#allocation6 + $0xb8] sm:$0xf0] }
 0x3ba   : > { %v6828_v0 = vor.u32 %v7834_v48, %v6827_v32  ;;  %v7754_v54 = vld [vmem:[#allocation6 + $0xb4] sm:$0xf0]  ;;  %v7814_v31 = vld [vmem:[#allocation6 + $0x29c] sm:$0xf]  ;;  %v6512_v9 = vor.u32 %v7750_v30, %v6509_v61 }
 0x3bb   : > { %3774 = vmatpush.bf16.msra.mxu0 %v6436_v41  ;;  %3800 = vmatpush.bf16.msra.mxu2 %v6440_v45  ;;  %v6576_v41 = vor.u32 %v7766_v22, %v6573_v33  ;;  %v7826_v45 = vld [vmem:[#allocation6 + $0x2f4] sm:$0xf0]  ;;  %v7742_v35 = vld [vmem:[#allocation6 + $0x5c] sm:$0xf] }
 0x3bc   : > { %v7818_v55 = vld [vmem:[#allocation6 + $0x2b4] sm:$0xf0]  ;;  %v6477_v63 = vld [vmem:[#allocation6 + $0x78] sm:$0xf0] }
 0x3bd   : > { %3787 = vmatpush.bf16.msra.mxu1 %v6692_v29  ;;  %3813 = vmatpush.bf16.msra.mxu3 %v6696_v20  ;;  %v6832_v29 = vor.u32 %v7830_v36, %v6829_v3  ;;  %v7822_v20 = vld [vmem:[#allocation6 + $0x2dc] sm:$0xf]  ;;  %v6475_v62 = vld [vmem:[#allocation6 + $0x58] sm:$0xf]  ;;  %v6480_v28 = vor.u32 %v7742_v35, %v6477_v63 }
 0x3be   : > { %3775 = vmatmul.bf16.vlgmr.msra.gmra.mxu0 %v8628_v58  ;;  %3801 = vmatmul.bf16.vlgmr.msra.gmra.mxu2 %v8628_v58  ;;  %v7746_v7 = vld [vmem:[#allocation6 + $0x74] sm:$0xf0]  ;;  %v7806_v5 = vld [vmem:[#allocation6 + $0x25c] sm:$0xf] }
 0x3bf   : > { %3819 = vmatpush.bf16.msrb.mxu0 %v6668_v25  ;;  %3845 = vmatpush.bf16.msrb.mxu2 %v6672_v59  ;;  %v6797_v25 = vld [vmem:[#allocation6 + $0x2f8] sm:$0xf0]  ;;  %v6796_v59 = vor.u32 %v7826_v45, %v6795_v56  ;;  %v7810_v16 = vld [vmem:[#allocation6 + $0x274] sm:$0xf0] }
 0x3c0   : > { %3788 = vmatmul.bf16.vlgmr.msra.gmra.mxu1 %v8630_v60  ;;  %3814 = vmatmul.bf16.vlgmr.msra.gmra.mxu3 %v8630_v60  ;;  %v6800_v2 = vor.u32 %v7822_v20, %v6797_v25  ;;  %v6443_v13 = vld [vmem:[#allocation6 + $0x18] sm:$0xf]  ;;  %v7734_v33 = vld [vmem:[#allocation6 + $0x1c] sm:$0xf] }
 0x3c1   : > { %3832 = vmatpush.bf16.msrb.mxu1 %v6924_v21  ;;  %3858 = vmatpush.bf16.msrb.mxu3 %v6928_v27  ;;  %v6540_v21 = vor.u32 %v7762_v44, %v6539_v40  ;;  %v6763_v27 = vld [vmem:[#allocation6 + $0x298] sm:$0xf]  ;;  %v6445_v36 = vld [vmem:[#allocation6 + $0x38] sm:$0xf0] }
 0x3c2   : > { %v7738_v32 = vld [vmem:[#allocation6 + $0x34] sm:$0xf0]  ;;  %v7798_v3 = vld [vmem:[#allocation6 + $0x21c] sm:$0xf]  ;;  %v6448_v40 = vor.u32 %v7734_v33, %v6445_v36 }
 0x3c3   : > { %3820 = vmatpush.bf16.msrb.mxu0 %v6636_v6  ;;  %3846 = vmatpush.bf16.msrb.mxu2 %v6640_v4  ;;  %v6765_v6 = vld [vmem:[#allocation6 + $0x2b8] sm:$0xf0]  ;;  %v6764_v4 = vor.u32 %v7818_v55, %v6763_v27  ;;  %v7802_v22 = vld [vmem:[#allocation6 + $0x234] sm:$0xf0] }
 0x3c4   : > { %v6768_v51 = vor.u32 %v7814_v31, %v6765_v6 }
 0x3c5   : > { %3833 = vmatpush.bf16.msrb.mxu1 %v6892_v1  ;;  %3859 = vmatpush.bf16.msrb.mxu3 %v6896_v34  ;;  %v6508_v1 = vor.u32 %v7754_v54, %v6507_v50  ;;  %v6731_v34 = vld [vmem:[#allocation6 + $0x258] sm:$0xf] }
 0x3c7   : > { %3821 = vmatpush.bf16.msrb.mxu0 %v6604_v17  ;;  %3847 = vmatpush.bf16.msrb.mxu2 %v6608_v23  ;;  %v6733_v17 = vld [vmem:[#allocation6 + $0x278] sm:$0xf0]  ;;  %v6732_v23 = vor.u32 %v7810_v16, %v6731_v34 }
 0x3c8   : > { %v6736_v48 = vor.u32 %v7806_v5, %v6733_v17 }
 0x3c9   : > { %3834 = vmatpush.bf16.msrb.mxu1 %v6860_v49  ;;  %3860 = vmatpush.bf16.msrb.mxu3 %v6864_v57  ;;  %v6476_v49 = vor.u32 %v7746_v7, %v6475_v62  ;;  %v6699_v57 = vld [vmem:[#allocation6 + $0x218] sm:$0xf] }
 0x3cb   : > { %3822 = vmatpush.bf16.msrb.mxu0 %v6572_v12  ;;  %3848 = vmatpush.bf16.msrb.mxu2 %v6576_v41  ;;  %v6701_v12 = vld [vmem:[#allocation6 + $0x238] sm:$0xf0]  ;;  %v6700_v41 = vor.u32 %v7802_v22, %v6699_v57 }
 0x3cc   : > { %v6704_v44 = vor.u32 %v7798_v3, %v6701_v12 }
 0x3cd   : > { %3835 = vmatpush.bf16.msrb.mxu1 %v6828_v0  ;;  %3861 = vmatpush.bf16.msrb.mxu3 %v6832_v29  ;;  %v6444_v0 = vor.u32 %v7738_v32, %v6443_v13 }
 0x3cf   : > { %3823 = vmatpush.bf16.msrb.mxu0 %v6540_v21  ;;  %3849 = vmatpush.bf16.msrb.mxu2 %v6544_v8 }
 0x3d1   : > { %3836 = vmatpush.bf16.msrb.mxu1 %v6796_v59  ;;  %3862 = vmatpush.bf16.msrb.mxu3 %v6800_v2 }
 0x3d3   : > { %3824 = vmatpush.bf16.msrb.mxu0 %v6508_v1  ;;  %3850 = vmatpush.bf16.msrb.mxu2 %v6512_v9 }
 0x3d5   : > { %3837 = vmatpush.bf16.msrb.mxu1 %v6764_v4  ;;  %3863 = vmatpush.bf16.msrb.mxu3 %v6768_v51 }
 0x3d7   : > { %3825 = vmatpush.bf16.msrb.mxu0 %v6476_v49  ;;  %3851 = vmatpush.bf16.msrb.mxu2 %v6480_v28 }
 0x3d9   : > { %3838 = vmatpush.bf16.msrb.mxu1 %v6732_v23  ;;  %3864 = vmatpush.bf16.msrb.mxu3 %v6736_v48 }
 0x3db   : > { %3826 = vmatpush.bf16.msrb.mxu0 %v6444_v0  ;;  %3852 = vmatpush.bf16.msrb.mxu2 %v6448_v40 }
 0x3dd   : > { %3839 = vmatpush.bf16.msrb.mxu1 %v6700_v41  ;;  %3865 = vmatpush.bf16.msrb.mxu3 %v6704_v44 }
 0x3de   : > { %3827 = vmatmul.bf16.vlgmr.msrb.gmra.mxu0 %v8628_v58  ;;  %3853 = vmatmul.bf16.vlgmr.msrb.gmra.mxu2 %v8628_v58 }
 0x3e0   : > { %3840 = vmatmul.bf16.vlgmr.msrb.gmra.mxu1 %v8630_v60  ;;  %3866 = vmatmul.bf16.vlgmr.msrb.gmra.mxu3 %v8630_v60 }
 0x3fb   : > { %v3672_v56 = vpop.f32.mrf.mxu0 }
 0x3fd   : > { %v3685_v29 = vpop.f32.mrf.mxu1 }
 0x3fe   : > { %v3686_v59 = vadd.f32 %v3685_v29, %v3672_v56 }
 0x400   : > { %v3871_v8 = vadd.f32 %v3686_v59, %v8415_v38 }
 0x401   : > { %v3698_v45 = vpop.f32.mrf.mxu2 }
 0x402   : > { %v6929_v54 = vmul.f32 -1.442695, %v3871_v8 }
 0x403   : > { %v3711_v37 = vpop.f32.mrf.mxu3  ;;  %v3674_v26 = vpop.f32.mrf.mxu0 }
 0x404   : > { %v3712_v50 = vadd.f32 %v3711_v37, %v3698_v45  ;;  %8095 = vpow2.f32 %v6929_v54 }
 0x405   : > { %v3687_v20 = vpop.f32.mrf.mxu1 }
 0x406   : > { %v3872_v27 = vadd.f32 %v3712_v50, %v8417_v39 }
 0x408   : > { %v6930_v60 = vmul.f32 -1.442695, %v3872_v27 }
 0x409   : > { %v3700_v25 = vpop.f32.mrf.mxu2 }
 0x40a   : > { %v8096_v31 = vpop.eup %8095  ;;  %8097 = vpow2.f32 %v6930_v60 }
 0x40b   : > { %v3713_v21 = vpop.f32.mrf.mxu3  ;;  %v8651_v62 = vadd.f32 1.0, %v8096_v31 }
 0x40d   : > { %vm3892_vm5 = vweird.f32 %v8651_v62  ;;  %v3898_v37 = vand.u32 2147483648, %v8651_v62  ;;  %v3896_v21 = vand.u32 2147483647, %v8651_v62 }
 0x40f   : > { %vm3897_vm12 = vcmp.eq.f32.partialorder %v3896_v21, 8.507059e+37 }
 0x410   : > { %v8098_v7 = vpop.eup %8097 }
 0x411   : > { %v8655_v63 = vadd.f32 1.0, %v8098_v7 }
 0x413   : > { %vm3907_vm13 = vweird.f32 %v8655_v63 }
 0x41b   : > { %v3724_v2 = vpop.f32.mrf.mxu0 }
 0x41d   : > { %v3737_v58 = vpop.f32.mrf.mxu1 }
 0x41e   : > { %v3738_v55 = vadd.f32 %v3737_v58, %v3724_v2  ;;  %v2891_v58 = vld [vmem:[#allocation3 + $0x8] sm:$0xff] }
 0x420   : > { %v3873_v30 = vadd.f32 %v3738_v55, %v8419_v42 }
 0x421   : > { %v3750_v6 = vpop.f32.mrf.mxu2 }
 0x422   : > { %v6931_v61 = vmul.f32 -1.442695, %v3873_v30 }
 0x423   : > { %v3763_v1 = vpop.f32.mrf.mxu3  ;;  %v3726_v4 = vpop.f32.mrf.mxu0 }
 0x424   : > { %8099 = vpow2.f32 %v6931_v61  ;;  %v3764_v9 = vadd.f32 %v3763_v1, %v3750_v6 }
 0x425   : > { %v3739_v38 = vpop.f32.mrf.mxu1  ;;  %8101 = vrcp.f32 %v8651_v62 }
 0x426   : > { %v3874_v39 = vadd.f32 %v3764_v9, %v8421_v43 }
 0x428   : > { %v6932_v34 = vmul.f32 -1.442695, %v3874_v39 }
 0x429   : > { %v3752_v42 = vpop.f32.mrf.mxu2 }
 0x42a   : > { %v8100_v51 = vpop.eup %8099  ;;  %8103 = vpow2.f32 %v6932_v34 }
 0x42b   : > { %v3923_v16 = vadd.f32 1.0, %v8100_v51  ;;  %v3765_v35 = vpop.f32.mrf.mxu3  ;;  %v8657_v5 = vpop.eup %8101  ;;  %v3913_v51 = vand.u32 2147483648, %v8655_v63 }
 0x42c   : > { %v3888_v23 = vmul.f32 %v8657_v5, %v8651_v62  ;;  %vm3893_vm6 = vweird.f32 %v8657_v5  ;;  %v3911_v62 = vand.u32 2147483647, %v8655_v63 }
 0x42d   : > { %8105 = vrcp.f32 %v3923_v16  ;;  %vm3930_vm2 = vweird.f32 %v3923_v16  ;;  %v3936_v36 = vand.u32 2147483648, %v3923_v16  ;;  %v3934_v44 = vand.u32 2147483647, %v3923_v16  ;;  %vm8684_vm10 = vmor %vm3892_vm5, %vm3893_vm6 }
 0x42e   : > { %8107 = vrcp.f32 %v8655_v63  ;;  %v3889_v57 = vsub.f32 1.0, %v3888_v23  ;;  %v3914_v23 = vor.u32 1.1754944e-38, %v3913_v51  ;;  %vm3912_vm1 = vcmp.eq.f32.partialorder %v3911_v62, 8.507059e+37 }
 0x42f   : > { %v3937_v20 = vor.u32 1.1754944e-38, %v3936_v36  ;;  %vm3935_vm7 = vcmp.eq.f32.partialorder %v3934_v44, 8.507059e+37 }
 0x430   : > { %v8104_v17 = vpop.eup %8103  ;;  %v3890_v41 = vmul.f32 %v8657_v5, %v3889_v57 }
 0x431   : > { %v8660_v49 = vadd.f32 1.0, %v8104_v17 }
 0x432   : > { %v3891_v8 = vadd.f32 %v8657_v5, %v3890_v41 }
 0x433   : > { %v8106_v43 = vpop.eup %8105  ;;  %8109 = vrcp.f32 %v8660_v49  ;;  %vm3945_vm8 = vweird.f32 %v8660_v49  ;;  %v3951_v27 = vand.u32 2147483648, %v8660_v49  ;;  %v3949_v31 = vand.u32 2147483647, %v8660_v49 }
 0x434   : > { %v3926_v28 = vmul.f32 %v8106_v43, %v3923_v16  ;;  %v8665_v32 = vpop.eup %8107  ;;  %vm3931_vm3 = vweird.f32 %v8106_v43  ;;  %v3895_v4 = vsel %vm8684_vm10, %v8657_v5, %v3891_v8 }
 0x435   : > { %v3903_v33 = vmul.f32 %v8665_v32, %v8655_v63  ;;  %vm8671_vm4 = vmor %vm3930_vm2, %vm3931_vm3  ;;  %vm3908_vm14 = vweird.f32 %v8665_v32  ;;  %v3952_v39 = vor.u32 1.1754944e-38, %v3951_v27  ;;  %vm3950_vm15 = vcmp.eq.f32.partialorder %v3949_v31, 8.507059e+37 }
 0x436   : > { %v3927_v13 = vsub.f32 1.0, %v3926_v28  ;;  %vm3909_vm0 = vmor %vm3907_vm13, %vm3908_vm14 }
 0x437   : > { %v3904_v26 = vsub.f32 1.0, %v3903_v33 }
 0x438   : > { %v3928_v48 = vmul.f32 %v8106_v43, %v3927_v13 }
 0x439   : > { %v8110_v22 = vpop.eup %8109  ;;  %v3905_v30 = vmul.f32 %v8665_v32, %v3904_v26 }
 0x43a   : > { %v3941_v12 = vmul.f32 %v8110_v22, %v8660_v49  ;;  %v3929_v40 = vadd.f32 %v8106_v43, %v3928_v48  ;;  %vm3946_vm9 = vweird.f32 %v8110_v22 }
 0x43b   : > { %v3776_v3 = vpop.f32.mrf.mxu0  ;;  %vm8691_vm11 = vmor %vm3945_vm8, %vm3946_vm9  ;;  %v3906_v35 = vadd.f32 %v8665_v32, %v3905_v30 }
 0x43c   : > { %v3942_v45 = vsub.f32 1.0, %v3941_v12  ;;  %v3933_v50 = vsel %vm8671_vm4, %v8106_v43, %v3929_v40  ;;  %v2892_v43 = vld [vmem:[#allocation3] sm:$0xff] }
 0x43d   : > { %v3789_v0 = vpop.f32.mrf.mxu1  ;;  %v3938_v55 = vsel %vm3935_vm7, %v3937_v20, %v3933_v50 }
 0x43e   : > { %v3790_v29 = vadd.f32 %v3789_v0, %v3776_v3  ;;  %v3943_v59 = vmul.f32 %v8110_v22, %v3942_v45  ;;  %v3995_v7 = vmul.f32 %v3938_v55, %v2891_v58 }
 0x440   : > { %v3875_v25 = vadd.f32 %v3790_v29, %v8447_v10  ;;  %v3899_v10 = vor.u32 1.1754944e-38, %v3898_v37  ;;  %v3944_v61 = vadd.f32 %v8110_v22, %v3943_v59 }
 0x441   : > { %v3802_v2 = vpop.f32.mrf.mxu2 }
 0x442   : > { %8111 = vtanh.f32 %v3875_v25  ;;  %v3900_v42 = vsel %vm3897_vm12, %v3899_v10, %v3895_v4  ;;  %v3948_v5 = vsel %vm8691_vm11, %v8110_v22, %v3944_v61 }
 0x443   : > { %v3815_v60 = vpop.f32.mrf.mxu3  ;;  %v3778_v6 = vpop.f32.mrf.mxu0  ;;  %v3953_v28 = vsel %vm3950_vm15, %v3952_v39, %v3948_v5 }
 0x444   : > { %v3816_v9 = vadd.f32 %v3815_v60, %v3802_v2  ;;  %v3996_v57 = vmul.f32 %v3953_v28, %v2892_v43 }
 0x445   : > { %v3791_v38 = vpop.f32.mrf.mxu1 }
 0x446   : > { %v3876_v34 = vadd.f32 %v3816_v9, %v8449_v11  ;;  %v3910_v11 = vsel %vm3909_vm0, %v8665_v32, %v3906_v35 }
 0x447   : > { %v3915_v33 = vsel %vm3912_vm1, %v3914_v23, %v3910_v11 }
 0x448   : > { %v8112_v16 = vpop.eup %8111  ;;  %8113 = vtanh.f32 %v3876_v34 }
 0x449   : > { %v3997_v17 = vmul.f32 %v8112_v16, %v3900_v42  ;;  %v3804_v13 = vpop.f32.mrf.mxu2 }
 0x44b   : > { %v3999_v49 = vadd.f32 %v3997_v17, %v3995_v7  ;;  %v3817_v63 = vpop.f32.mrf.mxu3 }
 0x44d   : > { %4005 = vst [vmem:[#allocation3 + $0x8] sm:$0xff] %v3999_v49 }
 0x44e   : > { %v8114_v48 = vpop.eup %8113 }
 0x44f   : > { %v3998_v36 = vmul.f32 %v8114_v48, %v3915_v33 }
 0x451   : > { %v4000_v3 = vadd.f32 %v3998_v36, %v3996_v57 }
 0x453   : > { %4006 = vst [vmem:[#allocation3] sm:$0xff] %v4000_v3 }
 0x45b   : > { %v3828_v22 = vpop.f32.mrf.mxu0 }
 0x45d   : > { %v3841_v12 = vpop.f32.mrf.mxu1 }
 0x45e   : > { %v3842_v0 = vadd.f32 %v3841_v12, %v3828_v22 }
 0x460   : > { %v3877_v41 = vadd.f32 %v3842_v0, %v8451_v14 }
 0x461   : > { %v3854_v44 = vpop.f32.mrf.mxu2 }
 0x462   : > { %v6933_v40 = vmul.f32 -1.442695, %v3877_v41 }
 0x463   : > { %v3867_v56 = vpop.f32.mrf.mxu3  ;;  %v3830_v29 = vpop.f32.mrf.mxu0 }
 0x464   : > { %8115 = vpow2.f32 %v6933_v40  ;;  %v3868_v32 = vadd.f32 %v3867_v56, %v3854_v44 }
 0x465   : > { %v3843_v45 = vpop.f32.mrf.mxu1 }
 0x466   : > { %v3878_v37 = vadd.f32 %v3868_v32, %v8453_v15 }
 0x468   : > { %v6934_v26 = vmul.f32 -1.442695, %v3878_v37 }
 0x469   : > { %v3856_v21 = vpop.f32.mrf.mxu2 }
 0x46a   : > { %v8116_v20 = vpop.eup %8115  ;;  %8117 = vpow2.f32 %v6934_v26 }
 0x46b   : > { %v3963_v25 = vadd.f32 1.0, %v8116_v20  ;;  %v3869_v59 = vpop.f32.mrf.mxu3 }
 0x46d   : > { %8119 = vrcp.f32 %v3963_v25  ;;  %v3976_v10 = vand.u32 2147483648, %v3963_v25  ;;  %vm3970_vm2 = vweird.f32 %v3963_v25  ;;  %v3974_v58 = vand.u32 2147483647, %v3963_v25 }
 0x46f   : > { %v3977_v60 = vor.u32 1.1754944e-38, %v3976_v10  ;;  %vm3975_vm5 = vcmp.eq.f32.partialorder %v3974_v58, 8.507059e+37 }
 0x470   : > { %v8118_v8 = vpop.eup %8117 }
 0x471   : > { %v3964_v50 = vadd.f32 1.0, %v8118_v8 }
 0x473   : > { %v8120_v54 = vpop.eup %8119  ;;  %8121 = vrcp.f32 %v3964_v50  ;;  %v3991_v9 = vand.u32 2147483648, %v3964_v50  ;;  %v3989_v62 = vand.u32 2147483647, %v3964_v50  ;;  %vm3985_vm7 = vweird.f32 %v3964_v50 }
 0x474   : > { %v3966_v14 = vmul.f32 %v8120_v54, %v3963_v25  ;;  %8123 = vtanh.f32 %v3999_v49  ;;  %vm3971_vm3 = vweird.f32 %v8120_v54 }
 0x475   : > { %vm3972_vm4 = vmor %vm3970_vm2, %vm3971_vm3  ;;  %8125 = vtanh.f32 %v4000_v3  ;;  %v3992_v7 = vor.u32 1.1754944e-38, %v3991_v9  ;;  %vm3990_vm9 = vcmp.eq.f32.partialorder %v3989_v62, 8.507059e+37 }
 0x476   : > { %v3967_v27 = vsub.f32 1.0, %v3966_v14 }
 0x478   : > { %v3968_v2 = vmul.f32 %v8120_v54, %v3967_v27 }
 0x479   : > { %v8122_v15 = vpop.eup %8121 }
 0x47a   : > { %v3969_v55 = vadd.f32 %v8120_v54, %v3968_v2  ;;  %v3981_v30 = vmul.f32 %v8122_v15, %v3964_v50  ;;  %v8124_v31 = vpop.eup %8123  ;;  %vm3986_vm6 = vweird.f32 %v8122_v15 }
 0x47b   : > { %vm3987_vm8 = vmor %vm3985_vm7, %vm3986_vm6  ;;  %v8126_v51 = vpop.eup %8125 }
 0x47c   : > { %v3973_v61 = vsel %vm3972_vm4, %v8120_v54, %v3969_v55  ;;  %v3982_v1 = vsub.f32 1.0, %v3981_v30 }
 0x47d   : > { %v3978_v6 = vsel %vm3975_vm5, %v3977_v60, %v3973_v61 }
 0x47e   : > { %v4003_v4 = vmul.f32 %v8124_v31, %v3978_v6  ;;  %v3983_v38 = vmul.f32 %v8122_v15, %v3982_v1 }
 0x480   : > { %4007 = vst [vmem:[#allocation2] sm:$0xff] %v4003_v4  ;;  %v3984_v39 = vadd.f32 %v8122_v15, %v3983_v38 }
 0x482   : > { %v3988_v34 = vsel %vm3987_vm8, %v8122_v15, %v3984_v39 }
 0x483   : > { %v3993_v16 = vsel %vm3990_vm9, %v3992_v7, %v3988_v34 }
 0x484   : > { %v4004_v42 = vmul.f32 %v8126_v51, %v3993_v16 }
 0x486   : > { %4008 = vst [vmem:[#allocation2 + $0x8] sm:$0xff] %v4004_v42 }
 0x487 PF: > { %s4009_s8 = sadd.s32 3, %s8359_s20 }
 0x488   : > { %p6935_p11 = scmp.ge.s32.totalorder %s4009_s8, 8 }
 0x48a   : > { %4013 = sbr.rel (%p6935_p11) target bundleno = 1467 (0x5bb), region = 76 }
 0x48f   : > { %v7162_v35 = vld [vmem:[#allocation6 + $0x1c0] sm:$0xf]  ;;  %v7915_v23 = vld [vmem:[#allocation6 + $0x1c4] sm:$0xf] }
 0x490   : > { %v7919_v5 = vld [vmem:[#allocation6 + $0x1dc] sm:$0xf0]  ;;  %v7164_v28 = vld [vmem:[#allocation6 + $0x1e0] sm:$0xf0] }
 0x491   : > { %v7418_v17 = vld [vmem:[#allocation6 + $0x3c0] sm:$0xf]  ;;  %v7163_v49 = vor.u32 %v7919_v5, %v7162_v35  ;;  %v7167_v11 = vor.u32 %v7915_v23, %v7164_v28  ;;  %v7979_v63 = vld [vmem:[#allocation6 + $0x3c4] sm:$0xf] }
 0x492   : > { %v7983_v43 = vld [vmem:[#allocation6 + $0x3dc] sm:$0xf0]  ;;  %v7420_v57 = vld [vmem:[#allocation6 + $0x3e0] sm:$0xf0] }
 0x493   : > { %v7419_v13 = vor.u32 %v7983_v43, %v7418_v17  ;;  %v7130_v48 = vld [vmem:[#allocation6 + $0x180] sm:$0xf]  ;;  %4788 = vmatpush.bf16.msra.mxu0 %v7163_v49  ;;  %v7423_v33 = vor.u32 %v7979_v63, %v7420_v57  ;;  %4814 = vmatpush.bf16.msra.mxu2 %v7167_v11  ;;  %v7907_v41 = vld [vmem:[#allocation6 + $0x184] sm:$0xf] }
 0x494   : > { %v7911_v36 = vld [vmem:[#allocation6 + $0x19c] sm:$0xf0]  ;;  %v7132_v40 = vld [vmem:[#allocation6 + $0x1a0] sm:$0xf0] }
 0x495   : > { %v7386_v3 = vld [vmem:[#allocation6 + $0x380] sm:$0xf]  ;;  %4801 = vmatpush.bf16.msra.mxu1 %v7419_v13  ;;  %v7131_v12 = vor.u32 %v7911_v36, %v7130_v48  ;;  %v7971_v44 = vld [vmem:[#allocation6 + $0x384] sm:$0xf]  ;;  %4827 = vmatpush.bf16.msra.mxu3 %v7423_v33  ;;  %v7135_v56 = vor.u32 %v7907_v41, %v7132_v40 }
 0x496   : > { %v7975_v22 = vld [vmem:[#allocation6 + $0x39c] sm:$0xf0]  ;;  %v7388_v29 = vld [vmem:[#allocation6 + $0x3a0] sm:$0xf0] }
 0x497   : > { %v7387_v0 = vor.u32 %v7975_v22, %v7386_v3  ;;  %v7098_v32 = vld [vmem:[#allocation6 + $0x140] sm:$0xf]  ;;  %v7391_v37 = vor.u32 %v7971_v44, %v7388_v29  ;;  %v7899_v25 = vld [vmem:[#allocation6 + $0x144] sm:$0xf]  ;;  %4789 = vmatpush.bf16.msra.mxu0 %v7131_v12  ;;  %4815 = vmatpush.bf16.msra.mxu2 %v7135_v56 }
 0x498   : > { %v7903_v45 = vld [vmem:[#allocation6 + $0x15c] sm:$0xf0]  ;;  %v7100_v59 = vld [vmem:[#allocation6 + $0x160] sm:$0xf0] }
 0x499   : > { %v7354_v26 = vld [vmem:[#allocation6 + $0x340] sm:$0xf]  ;;  %v7099_v21 = vor.u32 %v7903_v45, %v7098_v32  ;;  %v7963_v8 = vld [vmem:[#allocation6 + $0x344] sm:$0xf]  ;;  %4802 = vmatpush.bf16.msra.mxu1 %v7387_v0  ;;  %v7103_v14 = vor.u32 %v7899_v25, %v7100_v59  ;;  %4828 = vmatpush.bf16.msra.mxu3 %v7391_v37 }
 0x49a   : > { %v7967_v20 = vld [vmem:[#allocation6 + $0x35c] sm:$0xf0]  ;;  %v7356_v50 = vld [vmem:[#allocation6 + $0x360] sm:$0xf0] }
 0x49b   : > { %v7355_v54 = vor.u32 %v7967_v20, %v7354_v26  ;;  %v7066_v27 = vld [vmem:[#allocation6 + $0x100] sm:$0xf]  ;;  %v7359_v58 = vor.u32 %v7963_v8, %v7356_v50  ;;  %v7891_v55 = vld [vmem:[#allocation6 + $0x104] sm:$0xf]  ;;  %4790 = vmatpush.bf16.msra.mxu0 %v7099_v21  ;;  %4816 = vmatpush.bf16.msra.mxu2 %v7103_v14 }
 0x49c   : > { %v7895_v10 = vld [vmem:[#allocation6 + $0x11c] sm:$0xf0]  ;;  %v7068_v60 = vld [vmem:[#allocation6 + $0x120] sm:$0xf0] }
 0x49d   : > { %v7322_v2 = vld [vmem:[#allocation6 + $0x300] sm:$0xf]  ;;  %v7955_v30 = vld [vmem:[#allocation6 + $0x304] sm:$0xf]  ;;  %v7067_v31 = vor.u32 %v7895_v10, %v7066_v27  ;;  %4803 = vmatpush.bf16.msra.mxu1 %v7355_v54  ;;  %v7071_v1 = vor.u32 %v7891_v55, %v7068_v60  ;;  %4829 = vmatpush.bf16.msra.mxu3 %v7359_v58  ;;  %v7170_v27 = vld [vmem:[#allocation6 + $0x1c8] sm:$0xf] }
 0x49e   : > { %v7959_v15 = vld [vmem:[#allocation6 + $0x31c] sm:$0xf0]  ;;  %v7324_v61 = vld [vmem:[#allocation6 + $0x320] sm:$0xf0]  ;;  %v7920_v10 = vld [vmem:[#allocation6 + $0x1e4] sm:$0xf0] }
 0x49f   : > { %v7323_v6 = vor.u32 %v7959_v15, %v7322_v2  ;;  %v7034_v4 = vld [vmem:[#allocation6 + $0xc0] sm:$0xf]  ;;  %v7327_v62 = vor.u32 %v7955_v30, %v7324_v61  ;;  %v7883_v7 = vld [vmem:[#allocation6 + $0xc4] sm:$0xf]  ;;  %4791 = vmatpush.bf16.msra.mxu0 %v7067_v31  ;;  %4817 = vmatpush.bf16.msra.mxu2 %v7071_v1  ;;  %v7426_v2 = vld [vmem:[#allocation6 + $0x3c8] sm:$0xf] }
 0x4a0   : > { %v7887_v9 = vld [vmem:[#allocation6 + $0xdc] sm:$0xf0]  ;;  %v7036_v34 = vld [vmem:[#allocation6 + $0xe0] sm:$0xf0]  ;;  %v7984_v15 = vld [vmem:[#allocation6 + $0x3e4] sm:$0xf0] }
 0x4a1   : > { %v7290_v38 = vld [vmem:[#allocation6 + $0x2c0] sm:$0xf]  ;;  %v7947_v51 = vld [vmem:[#allocation6 + $0x2c4] sm:$0xf]  ;;  %v7035_v42 = vor.u32 %v7887_v9, %v7034_v4  ;;  %4804 = vmatpush.bf16.msra.mxu1 %v7323_v6  ;;  %v7039_v5 = vor.u32 %v7883_v7, %v7036_v34  ;;  %4830 = vmatpush.bf16.msra.mxu3 %v7327_v62  ;;  %v7916_v55 = vld [vmem:[#allocation6 + $0x1cc] sm:$0xf]  ;;  %v7171_v4 = vor.u32 %v7920_v10, %v7170_v27 }
 0x4a2   : > { %v7951_v39 = vld [vmem:[#allocation6 + $0x2dc] sm:$0xf0]  ;;  %v7292_v16 = vld [vmem:[#allocation6 + $0x2e0] sm:$0xf0]  ;;  %v7172_v60 = vld [vmem:[#allocation6 + $0x1e8] sm:$0xf0] }
 0x4a3   : > { %v7291_v35 = vor.u32 %v7951_v39, %v7290_v38  ;;  %v7002_v17 = vld [vmem:[#allocation6 + $0x80] sm:$0xf]  ;;  %v7295_v23 = vor.u32 %v7947_v51, %v7292_v16  ;;  %v7875_v13 = vld [vmem:[#allocation6 + $0x84] sm:$0xf]  ;;  %4792 = vmatpush.bf16.msra.mxu0 %v7035_v42  ;;  %4818 = vmatpush.bf16.msra.mxu2 %v7039_v5  ;;  %v7980_v31 = vld [vmem:[#allocation6 + $0x3cc] sm:$0xf]  ;;  %v7427_v38 = vor.u32 %v7984_v15, %v7426_v2 }
 0x4a4   : > { %v7879_v49 = vld [vmem:[#allocation6 + $0x9c] sm:$0xf0]  ;;  %v7004_v11 = vld [vmem:[#allocation6 + $0xa0] sm:$0xf0]  ;;  %v7428_v6 = vld [vmem:[#allocation6 + $0x3e8] sm:$0xf0]  ;;  %v7175_v62 = vor.u32 %v7916_v55, %v7172_v60 }
 0x4a5   : > { %v7258_v43 = vld [vmem:[#allocation6 + $0x280] sm:$0xf]  ;;  %v7939_v63 = vld [vmem:[#allocation6 + $0x284] sm:$0xf]  ;;  %v7003_v48 = vor.u32 %v7879_v49, %v7002_v17  ;;  %4805 = vmatpush.bf16.msra.mxu1 %v7291_v35  ;;  %v7007_v36 = vor.u32 %v7875_v13, %v7004_v11  ;;  %4831 = vmatpush.bf16.msra.mxu3 %v7295_v23  ;;  %v7138_v9 = vld [vmem:[#allocation6 + $0x188] sm:$0xf]  ;;  %v7431_v51 = vor.u32 %v7980_v31, %v7428_v6 }
 0x4a6   : > { %v7943_v28 = vld [vmem:[#allocation6 + $0x29c] sm:$0xf0]  ;;  %v7260_v57 = vld [vmem:[#allocation6 + $0x2a0] sm:$0xf0]  ;;  %v7912_v39 = vld [vmem:[#allocation6 + $0x1a4] sm:$0xf0] }
 0x4a7   : > { %v7259_v33 = vor.u32 %v7943_v28, %v7258_v43  ;;  %v6970_v3 = vld [vmem:[#allocation6 + $0x40] sm:$0xf]  ;;  %v7263_v0 = vor.u32 %v7939_v63, %v7260_v57  ;;  %v7867_v40 = vld [vmem:[#allocation6 + $0x44] sm:$0xf]  ;;  %4793 = vmatpush.bf16.msra.mxu0 %v7003_v48  ;;  %4819 = vmatpush.bf16.msra.mxu2 %v7007_v36  ;;  %v7394_v7 = vld [vmem:[#allocation6 + $0x388] sm:$0xf]  ;;  %v7139_v43 = vor.u32 %v7912_v39, %v7138_v9 }
 0x4a8   : > { %v7871_v22 = vld [vmem:[#allocation6 + $0x5c] sm:$0xf0]  ;;  %v6972_v44 = vld [vmem:[#allocation6 + $0x60] sm:$0xf0]  ;;  %v7976_v34 = vld [vmem:[#allocation6 + $0x3a4] sm:$0xf0] }
 0x4a9   : > { %v7226_v12 = vld [vmem:[#allocation6 + $0x240] sm:$0xf]  ;;  %v7931_v56 = vld [vmem:[#allocation6 + $0x244] sm:$0xf]  ;;  %v6971_v32 = vor.u32 %v7871_v22, %v6970_v3  ;;  %4806 = vmatpush.bf16.msra.mxu1 %v7259_v33  ;;  %v6975_v20 = vor.u32 %v7867_v40, %v6972_v44  ;;  %4832 = vmatpush.bf16.msra.mxu3 %v7263_v0  ;;  %v7908_v16 = vld [vmem:[#allocation6 + $0x18c] sm:$0xf]  ;;  %v7395_v13 = vor.u32 %v7976_v34, %v7394_v7 }
 0x4aa   : > { %v7935_v41 = vld [vmem:[#allocation6 + $0x25c] sm:$0xf0]  ;;  %v7228_v29 = vld [vmem:[#allocation6 + $0x260] sm:$0xf0]  ;;  %v7140_v42 = vld [vmem:[#allocation6 + $0x1a8] sm:$0xf0] }
 0x4ab   : > { %v6938_v45 = vld [vmem:[#allocation6] sm:$0xf]  ;;  %v7227_v26 = vor.u32 %v7935_v41, %v7226_v12  ;;  %v7859_v59 = vld [vmem:[#allocation6 + $0x4] sm:$0xf]  ;;  %v7231_v8 = vor.u32 %v7931_v56, %v7228_v29  ;;  %4794 = vmatpush.bf16.msra.mxu0 %v6971_v32  ;;  %4820 = vmatpush.bf16.msra.mxu2 %v6975_v20  ;;  %v7972_v35 = vld [vmem:[#allocation6 + $0x38c] sm:$0xf]  ;;  %v7143_v11 = vor.u32 %v7908_v16, %v7140_v42 }
 0x4ac   : > { %v7863_v37 = vld [vmem:[#allocation6 + $0x1c] sm:$0xf0]  ;;  %v6940_v50 = vld [vmem:[#allocation6 + $0x20] sm:$0xf0]  ;;  %v7396_v5 = vld [vmem:[#allocation6 + $0x3a8] sm:$0xf0] }
 0x4ad   : > { %v7194_v25 = vld [vmem:[#allocation6 + $0x200] sm:$0xf]  ;;  %v7923_v54 = vld [vmem:[#allocation6 + $0x204] sm:$0xf]  ;;  %v6939_v58 = vor.u32 %v7863_v37, %v6938_v45  ;;  %4807 = vmatpush.bf16.msra.mxu1 %v7227_v26  ;;  %v6943_v61 = vor.u32 %v7859_v59, %v6940_v50  ;;  %4833 = vmatpush.bf16.msra.mxu3 %v7231_v8  ;;  %v4015_v49 = vld [vmem:[#allocation2 + $0x8] sm:$0xff]  ;;  %v7399_v33 = vor.u32 %v7972_v35, %v7396_v5 }
 0x4ae   : > { %v7927_v21 = vld [vmem:[#allocation6 + $0x21c] sm:$0xf0]  ;;  %v7196_v14 = vld [vmem:[#allocation6 + $0x220] sm:$0xf0]  ;;  %v8712_v28 = vpack.c.bf16 %v4015_v49, %v4015_v49  ;;  %v7106_v63 = vld [vmem:[#allocation6 + $0x148] sm:$0xf] }
 0x4af   : > { %v7195_v30 = vor.u32 %v7927_v21, %v7194_v25  ;;  %v7199_v1 = vor.u32 %v7923_v54, %v7196_v14  ;;  %4795 = vmatpush.bf16.msra.mxu0 %v6939_v58  ;;  %4821 = vmatpush.bf16.msra.mxu2 %v6943_v61  ;;  %v4014_v17 = vld [vmem:[#allocation2] sm:$0xff]  ;;  %v7904_v57 = vld [vmem:[#allocation6 + $0x164] sm:$0xf0]  ;;  %v7900_v3 = vld [vmem:[#allocation6 + $0x14c] sm:$0xf] }
 0x4b0   : > { %v8710_v23 = vpack.c.bf16 %v4014_v17, %v4014_v17  ;;  %v7362_v48 = vld [vmem:[#allocation6 + $0x348] sm:$0xf]  ;;  %v7108_v22 = vld [vmem:[#allocation6 + $0x168] sm:$0xf0]  ;;  %v7107_v41 = vor.u32 %v7904_v57, %v7106_v63 }
 0x4b1   : > { %4808 = vmatpush.bf16.msra.mxu1 %v7195_v30  ;;  %4834 = vmatpush.bf16.msra.mxu3 %v7199_v1  ;;  %v7968_v36 = vld [vmem:[#allocation6 + $0x364] sm:$0xf0]  ;;  %v7964_v12 = vld [vmem:[#allocation6 + $0x34c] sm:$0xf]  ;;  %v7111_v44 = vor.u32 %v7900_v3, %v7108_v22 }
 0x4b2   : > { %4822 = vmatmul.bf16.vlgmr.msra.gmra.mxu2 %v8710_v23  ;;  %v7364_v0 = vld [vmem:[#allocation6 + $0x368] sm:$0xf0]  ;;  %4796 = vmatmul.bf16.vlgmr.msra.gmra.mxu0 %v8710_v23  ;;  %v7363_v40 = vor.u32 %v7968_v36, %v7362_v48  ;;  %v7074_v56 = vld [vmem:[#allocation6 + $0x108] sm:$0xf] }
 0x4b3   : > { %4840 = vmatpush.bf16.msrb.mxu0 %v7171_v4  ;;  %4866 = vmatpush.bf16.msrb.mxu2 %v7175_v62  ;;  %v7896_v29 = vld [vmem:[#allocation6 + $0x124] sm:$0xf0]  ;;  %v7367_v45 = vor.u32 %v7964_v12, %v7364_v0  ;;  %v7892_v26 = vld [vmem:[#allocation6 + $0x10c] sm:$0xf] }
 0x4b4   : > { %4835 = vmatmul.bf16.vlgmr.msra.gmra.mxu3 %v8712_v28  ;;  %4809 = vmatmul.bf16.vlgmr.msra.gmra.mxu1 %v8712_v28  ;;  %v7330_v32 = vld [vmem:[#allocation6 + $0x308] sm:$0xf]  ;;  %v7076_v20 = vld [vmem:[#allocation6 + $0x128] sm:$0xf0]  ;;  %v7075_v59 = vor.u32 %v7896_v29, %v7074_v56 }
 0x4b5   : > { %4853 = vmatpush.bf16.msrb.mxu1 %v7427_v38  ;;  %4879 = vmatpush.bf16.msrb.mxu3 %v7431_v51  ;;  %v7960_v37 = vld [vmem:[#allocation6 + $0x324] sm:$0xf0]  ;;  %v7956_v25 = vld [vmem:[#allocation6 + $0x30c] sm:$0xf]  ;;  %v7079_v50 = vor.u32 %v7892_v26, %v7076_v20  ;;  %v7985_v20 = vld [vmem:[#allocation6 + $0x3ec] sm:$0xf0] }
 0x4b6   : > { %v7332_v21 = vld [vmem:[#allocation6 + $0x328] sm:$0xf0]  ;;  %v7331_v8 = vor.u32 %v7960_v37, %v7330_v32  ;;  %v7042_v54 = vld [vmem:[#allocation6 + $0xc8] sm:$0xf]  ;;  %v7178_v32 = vld [vmem:[#allocation6 + $0x1d0] sm:$0xf] }
 0x4b7   : > { %4841 = vmatpush.bf16.msrb.mxu0 %v7139_v43  ;;  %4867 = vmatpush.bf16.msrb.mxu2 %v7143_v11  ;;  %v7888_v14 = vld [vmem:[#allocation6 + $0xe4] sm:$0xf0]  ;;  %v7335_v10 = vor.u32 %v7956_v25, %v7332_v21  ;;  %v7884_v58 = vld [vmem:[#allocation6 + $0xcc] sm:$0xf]  ;;  %v7434_v37 = vld [vmem:[#allocation6 + $0x3d0] sm:$0xf] }
 0x4b8   : > { %v7298_v27 = vld [vmem:[#allocation6 + $0x2c8] sm:$0xf]  ;;  %v7044_v15 = vld [vmem:[#allocation6 + $0xe8] sm:$0xf0]  ;;  %v7043_v30 = vor.u32 %v7888_v14, %v7042_v54  ;;  %v7917_v25 = vld [vmem:[#allocation6 + $0x1d4] sm:$0xf] }
 0x4b9   : > { %4854 = vmatpush.bf16.msrb.mxu1 %v7395_v13  ;;  %4880 = vmatpush.bf16.msrb.mxu3 %v7399_v33  ;;  %v7952_v2 = vld [vmem:[#allocation6 + $0x2e4] sm:$0xf0]  ;;  %v7948_v55 = vld [vmem:[#allocation6 + $0x2cc] sm:$0xf]  ;;  %v7047_v31 = vor.u32 %v7884_v58, %v7044_v15  ;;  %v7180_v21 = vld [vmem:[#allocation6 + $0x1f0] sm:$0xf0] }
 0x4ba   : > { %v7300_v60 = vld [vmem:[#allocation6 + $0x2e8] sm:$0xf0]  ;;  %v7299_v61 = vor.u32 %v7952_v2, %v7298_v27  ;;  %v7010_v6 = vld [vmem:[#allocation6 + $0x88] sm:$0xf]  ;;  %v7436_v54 = vld [vmem:[#allocation6 + $0x3f0] sm:$0xf0]  ;;  %v7183_v2 = vor.u32 %v7917_v25, %v7180_v21 }
 0x4bb   : > { %4842 = vmatpush.bf16.msrb.mxu0 %v7107_v41  ;;  %4868 = vmatpush.bf16.msrb.mxu2 %v7111_v44  ;;  %v7880_v1 = vld [vmem:[#allocation6 + $0xa4] sm:$0xf0]  ;;  %v7303_v9 = vor.u32 %v7948_v55, %v7300_v60  ;;  %v7876_v62 = vld [vmem:[#allocation6 + $0x8c] sm:$0xf]  ;;  %v7146_v58 = vld [vmem:[#allocation6 + $0x190] sm:$0xf] }
 0x4bc   : > { %v7266_v4 = vld [vmem:[#allocation6 + $0x288] sm:$0xf]  ;;  %v7012_v39 = vld [vmem:[#allocation6 + $0xa8] sm:$0xf0]  ;;  %v7011_v51 = vor.u32 %v7880_v1, %v7010_v6  ;;  %v7913_v15 = vld [vmem:[#allocation6 + $0x1ac] sm:$0xf0] }
 0x4bd   : > { %4855 = vmatpush.bf16.msrb.mxu1 %v7363_v40  ;;  %4881 = vmatpush.bf16.msrb.mxu3 %v7367_v45  ;;  %v7944_v38 = vld [vmem:[#allocation6 + $0x2a4] sm:$0xf0]  ;;  %v7940_v7 = vld [vmem:[#allocation6 + $0x28c] sm:$0xf]  ;;  %v7015_v42 = vor.u32 %v7876_v62, %v7012_v39  ;;  %v7921_v45 = vld [vmem:[#allocation6 + $0x1ec] sm:$0xf0] }
 0x4be   : > { %v7268_v34 = vld [vmem:[#allocation6 + $0x2a8] sm:$0xf0]  ;;  %v7267_v16 = vor.u32 %v7944_v38, %v7266_v4  ;;  %v6978_v35 = vld [vmem:[#allocation6 + $0x48] sm:$0xf]  ;;  %v7179_v27 = vor.u32 %v7921_v45, %v7178_v32  ;;  %v7402_v55 = vld [vmem:[#allocation6 + $0x390] sm:$0xf]  ;;  %v7147_v4 = vor.u32 %v7913_v15, %v7146_v58 }
 0x4bf   : > { %4843 = vmatpush.bf16.msrb.mxu0 %v7075_v59  ;;  %4869 = vmatpush.bf16.msrb.mxu2 %v7079_v50  ;;  %v7872_v5 = vld [vmem:[#allocation6 + $0x64] sm:$0xf0]  ;;  %v7271_v49 = vor.u32 %v7940_v7, %v7268_v34  ;;  %v7868_v13 = vld [vmem:[#allocation6 + $0x4c] sm:$0xf]  ;;  %v7981_v50 = vld [vmem:[#allocation6 + $0x3d4] sm:$0xf] }
 0x4c0   : > { %v7234_v17 = vld [vmem:[#allocation6 + $0x248] sm:$0xf]  ;;  %v6980_v11 = vld [vmem:[#allocation6 + $0x68] sm:$0xf0]  ;;  %v6979_v48 = vor.u32 %v7872_v5, %v6978_v35  ;;  %v7439_v60 = vor.u32 %v7981_v50, %v7436_v54  ;;  %v7973_v6 = vld [vmem:[#allocation6 + $0x394] sm:$0xf] }
 0x4c1   : > { %4856 = vmatpush.bf16.msrb.mxu1 %v7331_v8  ;;  %4882 = vmatpush.bf16.msrb.mxu3 %v7335_v10  ;;  %v7936_v43 = vld [vmem:[#allocation6 + $0x264] sm:$0xf0]  ;;  %v7932_v63 = vld [vmem:[#allocation6 + $0x24c] sm:$0xf]  ;;  %v6983_v22 = vor.u32 %v7868_v13, %v6980_v11  ;;  %v7435_v10 = vor.u32 %v7985_v20, %v7434_v37  ;;  %v7404_v1 = vld [vmem:[#allocation6 + $0x3b0] sm:$0xf0] }
 0x4c2   : > { %v7236_v57 = vld [vmem:[#allocation6 + $0x268] sm:$0xf0]  ;;  %v6946_v33 = vld [vmem:[#allocation6 + $0x8] sm:$0xf]  ;;  %v7235_v3 = vor.u32 %v7936_v43, %v7234_v17  ;;  %v7114_v62 = vld [vmem:[#allocation6 + $0x150] sm:$0xf]  ;;  %v7407_v34 = vor.u32 %v7973_v6, %v7404_v1 }
 0x4c3   : > { %4844 = vmatpush.bf16.msrb.mxu0 %v7043_v30  ;;  %4870 = vmatpush.bf16.msrb.mxu2 %v7047_v31  ;;  %v7864_v36 = vld [vmem:[#allocation6 + $0x24] sm:$0xf0]  ;;  %v7860_v41 = vld [vmem:[#allocation6 + $0xc] sm:$0xf]  ;;  %v7239_v40 = vor.u32 %v7932_v63, %v7236_v57  ;;  %v7977_v30 = vld [vmem:[#allocation6 + $0x3ac] sm:$0xf0] }
 0x4c4   : > { %v7202_v12 = vld [vmem:[#allocation6 + $0x208] sm:$0xf]  ;;  %v6948_v44 = vld [vmem:[#allocation6 + $0x28] sm:$0xf0]  ;;  %v6947_v26 = vor.u32 %v7864_v36, %v6946_v33  ;;  %v7148_v31 = vld [vmem:[#allocation6 + $0x1b0] sm:$0xf0] }
 0x4c5   : > { %4857 = vmatpush.bf16.msrb.mxu1 %v7299_v61  ;;  %4883 = vmatpush.bf16.msrb.mxu3 %v7303_v9  ;;  %v7928_v0 = vld [vmem:[#allocation6 + $0x224] sm:$0xf0]  ;;  %v7924_v56 = vld [vmem:[#allocation6 + $0x20c] sm:$0xf]  ;;  %v6951_v8 = vor.u32 %v7860_v41, %v6948_v44  ;;  %v7909_v61 = vld [vmem:[#allocation6 + $0x194] sm:$0xf]  ;;  %v7403_v9 = vor.u32 %v7977_v30, %v7402_v55 }
 0x4c6   : > { %v7204_v29 = vld [vmem:[#allocation6 + $0x228] sm:$0xf0]  ;;  %v7203_v59 = vor.u32 %v7928_v0, %v7202_v12  ;;  %v7151_v38 = vor.u32 %v7909_v61, %v7148_v31  ;;  %v7905_v39 = vld [vmem:[#allocation6 + $0x16c] sm:$0xf0]  ;;  %v7965_v35 = vld [vmem:[#allocation6 + $0x354] sm:$0xf] }
 0x4c7   : > { %4845 = vmatpush.bf16.msrb.mxu0 %v7011_v51  ;;  %4871 = vmatpush.bf16.msrb.mxu2 %v7015_v42  ;;  %v7207_v14 = vor.u32 %v7924_v56, %v7204_v29  ;;  %v7370_v7 = vld [vmem:[#allocation6 + $0x350] sm:$0xf]  ;;  %v7116_v42 = vld [vmem:[#allocation6 + $0x170] sm:$0xf0]  ;;  %v7115_v17 = vor.u32 %v7905_v39, %v7114_v62 }
 0x4c8   : > { %v7969_v51 = vld [vmem:[#allocation6 + $0x36c] sm:$0xf0]  ;;  %v7372_v5 = vld [vmem:[#allocation6 + $0x370] sm:$0xf0] }
 0x4c9   : > { %4858 = vmatpush.bf16.msrb.mxu1 %v7267_v16  ;;  %4884 = vmatpush.bf16.msrb.mxu3 %v7271_v49  ;;  %v7901_v16 = vld [vmem:[#allocation6 + $0x154] sm:$0xf]  ;;  %v7371_v49 = vor.u32 %v7969_v51, %v7370_v7  ;;  %v7082_v13 = vld [vmem:[#allocation6 + $0x110] sm:$0xf]  ;;  %v7375_v57 = vor.u32 %v7965_v35, %v7372_v5 }
 0x4ca   : > { %v7119_v43 = vor.u32 %v7901_v16, %v7116_v42  ;;  %v7897_v11 = vld [vmem:[#allocation6 + $0x12c] sm:$0xf0]  ;;  %v7893_v33 = vld [vmem:[#allocation6 + $0x114] sm:$0xf] }
 0x4cb   : > { %4846 = vmatpush.bf16.msrb.mxu0 %v6979_v48  ;;  %4872 = vmatpush.bf16.msrb.mxu2 %v6983_v22  ;;  %v7338_v63 = vld [vmem:[#allocation6 + $0x310] sm:$0xf]  ;;  %v7084_v36 = vld [vmem:[#allocation6 + $0x130] sm:$0xf0]  ;;  %v7083_v12 = vor.u32 %v7897_v11, %v7082_v13 }
 0x4cc   : > { %v7961_v48 = vld [vmem:[#allocation6 + $0x32c] sm:$0xf0]  ;;  %v7340_v22 = vld [vmem:[#allocation6 + $0x330] sm:$0xf0]  ;;  %v7087_v41 = vor.u32 %v7893_v33, %v7084_v36  ;;  %v7986_v36 = vld [vmem:[#allocation6 + $0x3f4] sm:$0xf0] }
 0x4cd   : > { %4859 = vmatpush.bf16.msrb.mxu1 %v7235_v3  ;;  %4885 = vmatpush.bf16.msrb.mxu3 %v7239_v40  ;;  %v7957_v3 = vld [vmem:[#allocation6 + $0x314] sm:$0xf]  ;;  %v7339_v0 = vor.u32 %v7961_v48, %v7338_v63  ;;  %v7050_v40 = vld [vmem:[#allocation6 + $0xd0] sm:$0xf]  ;;  %v7186_v63 = vld [vmem:[#allocation6 + $0x1d8] sm:$0xf] }
 0x4ce   : > { %v7889_v44 = vld [vmem:[#allocation6 + $0xec] sm:$0xf0]  ;;  %v7343_v29 = vor.u32 %v7957_v3, %v7340_v22  ;;  %v7885_v45 = vld [vmem:[#allocation6 + $0xd4] sm:$0xf]  ;;  %v7442_v48 = vld [vmem:[#allocation6 + $0x3d8] sm:$0xf] }
 0x4cf   : > { %4847 = vmatpush.bf16.msrb.mxu0 %v6947_v26  ;;  %4873 = vmatpush.bf16.msrb.mxu2 %v6951_v8  ;;  %v7306_v56 = vld [vmem:[#allocation6 + $0x2d0] sm:$0xf]  ;;  %v7052_v37 = vld [vmem:[#allocation6 + $0xf0] sm:$0xf0]  ;;  %v7051_v25 = vor.u32 %v7889_v44, %v7050_v40  ;;  %v7918_v3 = vld [vmem:[#allocation6 + $0x1dc] sm:$0xf] }
 0x4d0   : > { %v7953_v32 = vld [vmem:[#allocation6 + $0x2ec] sm:$0xf0]  ;;  %v7949_v26 = vld [vmem:[#allocation6 + $0x2d4] sm:$0xf]  ;;  %v7188_v22 = vld [vmem:[#allocation6 + $0x1f8] sm:$0xf0] }
 0x4d1   : > { %4860 = vmatpush.bf16.msrb.mxu1 %v7203_v59  ;;  %4886 = vmatpush.bf16.msrb.mxu3 %v7207_v14  ;;  %v7308_v20 = vld [vmem:[#allocation6 + $0x2f0] sm:$0xf0]  ;;  %v7307_v21 = vor.u32 %v7953_v32, %v7306_v56  ;;  %v7055_v59 = vor.u32 %v7885_v45, %v7052_v37  ;;  %v7018_v8 = vld [vmem:[#allocation6 + $0x90] sm:$0xf]  ;;  %v7444_v40 = vld [vmem:[#allocation6 + $0x3f8] sm:$0xf0]  ;;  %v7191_v32 = vor.u32 %v7918_v3, %v7188_v22 }
 0x4d2   : > { %4848 = vmatmul.bf16.vlgmr.msrb.gmra.mxu0 %v8710_v23  ;;  %4874 = vmatmul.bf16.vlgmr.msrb.gmra.mxu2 %v8710_v23  ;;  %v7881_v50 = vld [vmem:[#allocation6 + $0xac] sm:$0xf0]  ;;  %v7311_v14 = vor.u32 %v7949_v26, %v7308_v20  ;;  %v7941_v58 = vld [vmem:[#allocation6 + $0x294] sm:$0xf]  ;;  %v7154_v45 = vld [vmem:[#allocation6 + $0x198] sm:$0xf] }
 0x4d3   : > { %4892 = vmatpush.bf16.msra.mxu0 %v7179_v27  ;;  %4918 = vmatpush.bf16.msra.mxu2 %v7183_v2  ;;  %v7274_v54 = vld [vmem:[#allocation6 + $0x290] sm:$0xf]  ;;  %v7020_v2 = vld [vmem:[#allocation6 + $0xb0] sm:$0xf0]  ;;  %v7019_v55 = vor.u32 %v7881_v50, %v7018_v8  ;;  %v7914_v37 = vld [vmem:[#allocation6 + $0x1b4] sm:$0xf0] }
 0x4d4   : > { %4861 = vmatmul.bf16.vlgmr.msrb.gmra.mxu1 %v8712_v28  ;;  %4887 = vmatmul.bf16.vlgmr.msrb.gmra.mxu3 %v8712_v28  ;;  %v7945_v27 = vld [vmem:[#allocation6 + $0x2ac] sm:$0xf0]  ;;  %v7276_v15 = vld [vmem:[#allocation6 + $0x2b0] sm:$0xf0]  ;;  %v7410_v26 = vld [vmem:[#allocation6 + $0x398] sm:$0xf] }
 0x4d5   : > { %4905 = vmatpush.bf16.msra.mxu1 %v7435_v10  ;;  %4931 = vmatpush.bf16.msra.mxu3 %v7439_v60  ;;  %v7877_v10 = vld [vmem:[#allocation6 + $0x94] sm:$0xf]  ;;  %v7275_v60 = vor.u32 %v7945_v27, %v7274_v54  ;;  %v6986_v61 = vld [vmem:[#allocation6 + $0x50] sm:$0xf]  ;;  %v7279_v1 = vor.u32 %v7941_v58, %v7276_v15  ;;  %v7974_v8 = vld [vmem:[#allocation6 + $0x39c] sm:$0xf]  ;;  %v7155_v54 = vor.u32 %v7914_v37, %v7154_v45 }
 0x4d6   : > { %v7023_v30 = vor.u32 %v7877_v10, %v7020_v2  ;;  %v7873_v31 = vld [vmem:[#allocation6 + $0x6c] sm:$0xf0]  ;;  %v7933_v62 = vld [vmem:[#allocation6 + $0x254] sm:$0xf]  ;;  %v7412_v50 = vld [vmem:[#allocation6 + $0x3b8] sm:$0xf0] }
 0x4d7   : > { %4893 = vmatpush.bf16.msra.mxu0 %v7147_v4  ;;  %4919 = vmatpush.bf16.msra.mxu2 %v7151_v38  ;;  %v7242_v6 = vld [vmem:[#allocation6 + $0x250] sm:$0xf]  ;;  %v6988_v38 = vld [vmem:[#allocation6 + $0x70] sm:$0xf0]  ;;  %v6987_v7 = vor.u32 %v7873_v31, %v6986_v61  ;;  %v7122_v10 = vld [vmem:[#allocation6 + $0x158] sm:$0xf]  ;;  %v7415_v15 = vor.u32 %v7974_v8, %v7412_v50 }
 0x4d8   : > { %v7937_v4 = vld [vmem:[#allocation6 + $0x26c] sm:$0xf0]  ;;  %v7244_v39 = vld [vmem:[#allocation6 + $0x270] sm:$0xf0]  ;;  %v7906_v2 = vld [vmem:[#allocation6 + $0x174] sm:$0xf0] }
 0x4d9   : > { %4906 = vmatpush.bf16.msra.mxu1 %v7403_v9  ;;  %4932 = vmatpush.bf16.msra.mxu3 %v7407_v34  ;;  %v7869_v9 = vld [vmem:[#allocation6 + $0x54] sm:$0xf]  ;;  %v6954_v34 = vld [vmem:[#allocation6 + $0x10] sm:$0xf]  ;;  %v7243_v16 = vor.u32 %v7937_v4, %v7242_v6  ;;  %v7378_v58 = vld [vmem:[#allocation6 + $0x358] sm:$0xf]  ;;  %v7123_v6 = vor.u32 %v7906_v2, %v7122_v10 }
 0x4da   : > { %v7865_v51 = vld [vmem:[#allocation6 + $0x2c] sm:$0xf0]  ;;  %v6991_v42 = vor.u32 %v7869_v9, %v6988_v38  ;;  %v7925_v13 = vld [vmem:[#allocation6 + $0x214] sm:$0xf]  ;;  %v7966_v61 = vld [vmem:[#allocation6 + $0x35c] sm:$0xf] }
 0x4db   : > { %4894 = vmatpush.bf16.msra.mxu0 %v7115_v17  ;;  %4920 = vmatpush.bf16.msra.mxu2 %v7119_v43  ;;  %v7210_v35 = vld [vmem:[#allocation6 + $0x210] sm:$0xf]  ;;  %v7861_v17 = vld [vmem:[#allocation6 + $0x14] sm:$0xf]  ;;  %v6955_v33 = vor.u32 %v7865_v51, %v6954_v34  ;;  %v7380_v31 = vld [vmem:[#allocation6 + $0x378] sm:$0xf0] }
 0x4dc   : > { %v7929_v5 = vld [vmem:[#allocation6 + $0x22c] sm:$0xf0]  ;;  %v6956_v43 = vld [vmem:[#allocation6 + $0x30] sm:$0xf0]  ;;  %v7090_v9 = vld [vmem:[#allocation6 + $0x118] sm:$0xf] }
 0x4dd   : > { %4907 = vmatpush.bf16.msra.mxu1 %v7371_v49  ;;  %4933 = vmatpush.bf16.msra.mxu3 %v7375_v57  ;;  %v7247_v49 = vor.u32 %v7933_v62, %v7244_v39  ;;  %v7212_v11 = vld [vmem:[#allocation6 + $0x230] sm:$0xf0]  ;;  %v7922_v57 = vld [vmem:[#allocation6 + $0x1f4] sm:$0xf0]  ;;  %v7383_v39 = vor.u32 %v7966_v61, %v7380_v31  ;;  %v7894_v34 = vld [vmem:[#allocation6 + $0x11c] sm:$0xf] }
 0x4de   : > { %v7215_v44 = vor.u32 %v7925_v13, %v7212_v11  ;;  %v7187_v56 = vor.u32 %v7922_v57, %v7186_v63  ;;  %v7898_v38 = vld [vmem:[#allocation6 + $0x134] sm:$0xf0]  ;;  %v7092_v51 = vld [vmem:[#allocation6 + $0x138] sm:$0xf0] }
 0x4df   : > { %4895 = vmatpush.bf16.msra.mxu0 %v7083_v12  ;;  %4921 = vmatpush.bf16.msra.mxu2 %v7087_v41  ;;  %v7211_v12 = vor.u32 %v7929_v5, %v7210_v35  ;;  %v7982_v41 = vld [vmem:[#allocation6 + $0x3dc] sm:$0xf]  ;;  %v7346_v62 = vld [vmem:[#allocation6 + $0x318] sm:$0xf]  ;;  %v7091_v35 = vor.u32 %v7898_v38, %v7090_v9 }
 0x4e0   : > { %v7447_v20 = vor.u32 %v7982_v41, %v7444_v40  ;;  %v7314_v13 = vld [vmem:[#allocation6 + $0x2d8] sm:$0xf]  ;;  %v7886_v57 = vld [vmem:[#allocation6 + $0xdc] sm:$0xf] }
 0x4e1   : > { %4908 = vmatpush.bf16.msra.mxu1 %v7339_v0  ;;  %4934 = vmatpush.bf16.msra.mxu3 %v7343_v29  ;;  %v6959_v0 = vor.u32 %v7861_v17, %v6956_v43  ;;  %v7443_v29 = vor.u32 %v7986_v36, %v7442_v48  ;;  %v7095_v17 = vor.u32 %v7894_v34, %v7092_v51  ;;  %v7890_v43 = vld [vmem:[#allocation6 + $0xf4] sm:$0xf0]  ;;  %v7060_v48 = vld [vmem:[#allocation6 + $0xf8] sm:$0xf0] }
 0x4e2   : > { %v7954_v63 = vld [vmem:[#allocation6 + $0x2f4] sm:$0xf0]  ;;  %v7316_v36 = vld [vmem:[#allocation6 + $0x2f8] sm:$0xf0] }
 0x4e3   : > { %4896 = vmatpush.bf16.msra.mxu0 %v7051_v25  ;;  %4922 = vmatpush.bf16.msra.mxu2 %v7055_v59  ;;  %v7978_v25 = vld [vmem:[#allocation6 + $0x3b4] sm:$0xf0]  ;;  %v7156_v59 = vld [vmem:[#allocation6 + $0x1b8] sm:$0xf0]  ;;  %v7315_v22 = vor.u32 %v7954_v63, %v7314_v13 }
 0x4e4   : > { %v7882_v41 = vld [vmem:[#allocation6 + $0xb4] sm:$0xf0]  ;;  %v7942_v45 = vld [vmem:[#allocation6 + $0x29c] sm:$0xf] }
 0x4e5   : > { %4909 = vmatpush.bf16.msra.mxu1 %v7307_v21  ;;  %4935 = vmatpush.bf16.msra.mxu3 %v7311_v14  ;;  %v7910_v21 = vld [vmem:[#allocation6 + $0x19c] sm:$0xf]  ;;  %v7411_v14 = vor.u32 %v7978_v25, %v7410_v26  ;;  %v7282_v40 = vld [vmem:[#allocation6 + $0x298] sm:$0xf] }
 0x4e6   : > { %v7159_v27 = vor.u32 %v7910_v21, %v7156_v59  ;;  %v7284_v37 = vld [vmem:[#allocation6 + $0x2b8] sm:$0xf0]  ;;  %v6994_v21 = vld [vmem:[#allocation6 + $0x58] sm:$0xf] }
 0x4e7   : > { %4897 = vmatpush.bf16.msra.mxu0 %v7019_v55  ;;  %4923 = vmatpush.bf16.msra.mxu2 %v7023_v30  ;;  %v7970_v55 = vld [vmem:[#allocation6 + $0x374] sm:$0xf0]  ;;  %v7124_v30 = vld [vmem:[#allocation6 + $0x178] sm:$0xf0]  ;;  %v7287_v50 = vor.u32 %v7942_v45, %v7284_v37 }
 0x4e8   : > { %v7874_v59 = vld [vmem:[#allocation6 + $0x74] sm:$0xf0]  ;;  %v7934_v10 = vld [vmem:[#allocation6 + $0x25c] sm:$0xf] }
 0x4e9   : > { %4910 = vmatpush.bf16.msra.mxu1 %v7275_v60  ;;  %4936 = vmatpush.bf16.msra.mxu3 %v7279_v1  ;;  %v7902_v60 = vld [vmem:[#allocation6 + $0x15c] sm:$0xf]  ;;  %v7379_v1 = vor.u32 %v7970_v55, %v7378_v58  ;;  %v7250_v8 = vld [vmem:[#allocation6 + $0x258] sm:$0xf]  ;;  %v6995_v58 = vor.u32 %v7874_v59, %v6994_v21 }
 0x4ea   : > { %v7127_v4 = vor.u32 %v7902_v60, %v7124_v30  ;;  %v7252_v2 = vld [vmem:[#allocation6 + $0x278] sm:$0xf0]  ;;  %v6962_v60 = vld [vmem:[#allocation6 + $0x18] sm:$0xf] }
 0x4eb   : > { %4898 = vmatpush.bf16.msra.mxu0 %v6987_v7  ;;  %4924 = vmatpush.bf16.msra.mxu2 %v6991_v42  ;;  %v7962_v7 = vld [vmem:[#allocation6 + $0x334] sm:$0xf0]  ;;  %v7348_v42 = vld [vmem:[#allocation6 + $0x338] sm:$0xf0]  ;;  %v7255_v31 = vor.u32 %v7934_v10, %v7252_v2 }
 0x4ec   : > { %v7347_v5 = vor.u32 %v7962_v7, %v7346_v62  ;;  %v7866_v30 = vld [vmem:[#allocation6 + $0x34] sm:$0xf0]  ;;  %v7926_v9 = vld [vmem:[#allocation6 + $0x21c] sm:$0xf] }
 0x4ed   : > { %4911 = vmatpush.bf16.msra.mxu1 %v7243_v16  ;;  %4937 = vmatpush.bf16.msra.mxu3 %v7247_v49  ;;  %v7958_v16 = vld [vmem:[#allocation6 + $0x31c] sm:$0xf]  ;;  %v7058_v49 = vld [vmem:[#allocation6 + $0xd8] sm:$0xf]  ;;  %v6963_v62 = vor.u32 %v7866_v30, %v6962_v60 }
 0x4ee   : > { %v7351_v11 = vor.u32 %v7958_v16, %v7348_v42  ;;  %v7059_v3 = vor.u32 %v7890_v43, %v7058_v49  ;;  %v7218_v61 = vld [vmem:[#allocation6 + $0x218] sm:$0xf]  ;;  %v7220_v38 = vld [vmem:[#allocation6 + $0x238] sm:$0xf0] }
 0x4ef   : > { %4899 = vmatpush.bf16.msra.mxu0 %v6955_v33  ;;  %4925 = vmatpush.bf16.msra.mxu2 %v6959_v0  ;;  %v7950_v33 = vld [vmem:[#allocation6 + $0x2dc] sm:$0xf]  ;;  %v7026_v0 = vld [vmem:[#allocation6 + $0x98] sm:$0xf]  ;;  %v7223_v34 = vor.u32 %v7926_v9, %v7220_v38 }
 0x4f0   : > { %v7027_v26 = vor.u32 %v7882_v41, %v7026_v0 }
 0x4f1   : > { %4912 = vmatpush.bf16.msra.mxu1 %v7211_v12  ;;  %4938 = vmatpush.bf16.msra.mxu3 %v7215_v44  ;;  %v7063_v12 = vor.u32 %v7886_v57, %v7060_v48  ;;  %v7319_v44 = vor.u32 %v7950_v33, %v7316_v36 }
 0x4f2   : > { %4900 = vmatmul.bf16.vlgmr.msra.gmra.mxu0 %v8710_v23  ;;  %4926 = vmatmul.bf16.vlgmr.msra.gmra.mxu2 %v8710_v23 }
 0x4f3   : > { %4944 = vmatpush.bf16.msrb.mxu0 %v7187_v56  ;;  %4970 = vmatpush.bf16.msrb.mxu2 %v7191_v32  ;;  %v7946_v56 = vld [vmem:[#allocation6 + $0x2b4] sm:$0xf0]  ;;  %v7028_v32 = vld [vmem:[#allocation6 + $0xb8] sm:$0xf0] }
 0x4f4   : > { %4913 = vmatmul.bf16.vlgmr.msra.gmra.mxu1 %v8712_v28  ;;  %4939 = vmatmul.bf16.vlgmr.msra.gmra.mxu3 %v8712_v28 }
 0x4f5   : > { %4957 = vmatpush.bf16.msrb.mxu1 %v7443_v29  ;;  %4983 = vmatpush.bf16.msrb.mxu3 %v7447_v20  ;;  %v7878_v29 = vld [vmem:[#allocation6 + $0x9c] sm:$0xf]  ;;  %v7283_v20 = vor.u32 %v7946_v56, %v7282_v40 }
 0x4f6   : > { %v7031_v25 = vor.u32 %v7878_v29, %v7028_v32 }
 0x4f7   : > { %4945 = vmatpush.bf16.msrb.mxu0 %v7155_v54  ;;  %4971 = vmatpush.bf16.msrb.mxu2 %v7159_v27  ;;  %v7938_v54 = vld [vmem:[#allocation6 + $0x274] sm:$0xf0]  ;;  %v6996_v27 = vld [vmem:[#allocation6 + $0x78] sm:$0xf0] }
 0x4f9   : > { %4958 = vmatpush.bf16.msrb.mxu1 %v7411_v14  ;;  %4984 = vmatpush.bf16.msrb.mxu3 %v7415_v15  ;;  %v7870_v14 = vld [vmem:[#allocation6 + $0x5c] sm:$0xf]  ;;  %v7251_v15 = vor.u32 %v7938_v54, %v7250_v8 }
 0x4fa   : > { %v6999_v55 = vor.u32 %v7870_v14, %v6996_v27 }
 0x4fb   : > { %4946 = vmatpush.bf16.msrb.mxu0 %v7123_v6  ;;  %4972 = vmatpush.bf16.msrb.mxu2 %v7127_v4  ;;  %v7930_v6 = vld [vmem:[#allocation6 + $0x234] sm:$0xf0]  ;;  %v6964_v4 = vld [vmem:[#allocation6 + $0x38] sm:$0xf0] }
 0x4fd   : > { %4959 = vmatpush.bf16.msrb.mxu1 %v7379_v1  ;;  %4985 = vmatpush.bf16.msrb.mxu3 %v7383_v39  ;;  %v7862_v1 = vld [vmem:[#allocation6 + $0x1c] sm:$0xf]  ;;  %v7219_v39 = vor.u32 %v7930_v6, %v7218_v61 }
 0x4fe   : > { %v6967_v7 = vor.u32 %v7862_v1, %v6964_v4 }
 0x4ff   : > { %4947 = vmatpush.bf16.msrb.mxu0 %v7091_v35  ;;  %4973 = vmatpush.bf16.msrb.mxu2 %v7095_v17 }
 0x501   : > { %4960 = vmatpush.bf16.msrb.mxu1 %v7347_v5  ;;  %4986 = vmatpush.bf16.msrb.mxu3 %v7351_v11 }
 0x503   : > { %4948 = vmatpush.bf16.msrb.mxu0 %v7059_v3  ;;  %4974 = vmatpush.bf16.msrb.mxu2 %v7063_v12 }
 0x505   : > { %4961 = vmatpush.bf16.msrb.mxu1 %v7315_v22  ;;  %4987 = vmatpush.bf16.msrb.mxu3 %v7319_v44 }
 0x507   : > { %4949 = vmatpush.bf16.msrb.mxu0 %v7027_v26  ;;  %4975 = vmatpush.bf16.msrb.mxu2 %v7031_v25 }
 0x509   : > { %4962 = vmatpush.bf16.msrb.mxu1 %v7283_v20  ;;  %4988 = vmatpush.bf16.msrb.mxu3 %v7287_v50 }
 0x50b   : > { %4950 = vmatpush.bf16.msrb.mxu0 %v6995_v58  ;;  %4976 = vmatpush.bf16.msrb.mxu2 %v6999_v55 }
 0x50d   : > { %4963 = vmatpush.bf16.msrb.mxu1 %v7251_v15  ;;  %4989 = vmatpush.bf16.msrb.mxu3 %v7255_v31 }
 0x50f   : > { %4951 = vmatpush.bf16.msrb.mxu0 %v6963_v62  ;;  %4977 = vmatpush.bf16.msrb.mxu2 %v6967_v7 }
 0x511   : > { %4964 = vmatpush.bf16.msrb.mxu1 %v7219_v39  ;;  %4990 = vmatpush.bf16.msrb.mxu3 %v7223_v34 }
 0x512   : > { %4952 = vmatmul.bf16.vlgmr.msrb.gmra.mxu0 %v8710_v23  ;;  %4978 = vmatmul.bf16.vlgmr.msrb.gmra.mxu2 %v8710_v23 }
 0x514   : > { %4965 = vmatmul.bf16.vlgmr.msrb.gmra.mxu1 %v8712_v28  ;;  %4991 = vmatmul.bf16.vlgmr.msrb.gmra.mxu3 %v8712_v28 }
 0x52f   : > { %v4797_v51 = vpop.f32.mrf.mxu0 }
 0x531   : > { %v4810_v16 = vpop.f32.mrf.mxu1 }
 0x532   : > { %v4811_v13 = vadd.f32 %v4810_v16, %v4797_v51 }
 0x534   : > { %v4996_v11 = vadd.f32 %v4811_v13, %v8423_v46 }
 0x535   : > { %v4823_v42 = vpop.f32.mrf.mxu2 }
 0x536   : > { %v7448_v57 = vmul.f32 -1.442695, %v4996_v11 }
 0x537   : > { %v4836_v35 = vpop.f32.mrf.mxu3  ;;  %v4799_v5 = vpop.f32.mrf.mxu0 }
 0x538   : > { %v4837_v63 = vadd.f32 %v4836_v35, %v4823_v42  ;;  %8127 = vpow2.f32 %v7448_v57 }
 0x539   : > { %v4812_v17 = vpop.f32.mrf.mxu1 }
 0x53a   : > { %v4997_v48 = vadd.f32 %v4837_v63, %v8425_v47 }
 0x53c   : > { %v7449_v28 = vmul.f32 -1.442695, %v4997_v48 }
 0x53d   : > { %v4825_v49 = vpop.f32.mrf.mxu2 }
 0x53e   : > { %v8128_v12 = vpop.eup %8127  ;;  %8129 = vpow2.f32 %v7449_v28  ;;  %v4016_v49 = vld [vmem:[#allocation3 + $0x8] sm:$0xff] }
 0x53f   : > { %v4838_v43 = vpop.f32.mrf.mxu3  ;;  %v8733_v56 = vadd.f32 1.0, %v8128_v12 }
 0x541   : > { %vm5017_vm13 = vweird.f32 %v8733_v56  ;;  %v5023_v38 = vand.u32 2147483648, %v8733_v56  ;;  %v5021_v34 = vand.u32 2147483647, %v8733_v56 }
 0x543   : > { %vm5022_vm4 = vcmp.eq.f32.partialorder %v5021_v34, 8.507059e+37 }
 0x544   : > { %v8130_v29 = vpop.eup %8129 }
 0x545   : > { %v8737_v20 = vadd.f32 1.0, %v8130_v29 }
 0x547   : > { %vm5032_vm5 = vweird.f32 %v8737_v20 }
 0x54f   : > { %v4849_v33 = vpop.f32.mrf.mxu0 }
 0x551   : > { %v4862_v23 = vpop.f32.mrf.mxu1 }
 0x552   : > { %v4863_v36 = vadd.f32 %v4862_v23, %v4849_v33 }
 0x554   : > { %v4998_v3 = vadd.f32 %v4863_v36, %v8427_v52 }
 0x555   : > { %v4875_v0 = vpop.f32.mrf.mxu2 }
 0x556   : > { %v7450_v22 = vmul.f32 -1.442695, %v4998_v3  ;;  %v5036_v3 = vand.u32 2147483647, %v8737_v20 }
 0x557   : > { %v4888_v41 = vpop.f32.mrf.mxu3  ;;  %v4851_v40 = vpop.f32.mrf.mxu0 }
 0x558   : > { %8131 = vpow2.f32 %v7450_v22  ;;  %v4889_v44 = vadd.f32 %v4888_v41, %v4875_v0  ;;  %v5038_v41 = vand.u32 2147483648, %v8737_v20  ;;  %vm5037_vm9 = vcmp.eq.f32.partialorder %v5036_v3, 8.507059e+37 }
 0x559   : > { %v4864_v46 = vpop.f32.mrf.mxu1  ;;  %8133 = vrcp.f32 %v8733_v56 }
 0x55a   : > { %v4999_v47 = vadd.f32 %v4889_v44, %v8429_v53 }
 0x55c   : > { %v7451_v32 = vmul.f32 -1.442695, %v4999_v47 }
 0x55d   : > { %v4877_v52 = vpop.f32.mrf.mxu2 }
 0x55e   : > { %v8132_v45 = vpop.eup %8131  ;;  %8135 = vpow2.f32 %v7451_v32  ;;  %v4017_v32 = vld [vmem:[#allocation3] sm:$0xff] }
 0x55f   : > { %v5048_v37 = vadd.f32 1.0, %v8132_v45  ;;  %v4890_v26 = vpop.f32.mrf.mxu3  ;;  %v8739_v25 = vpop.eup %8133  ;;  %v5039_v45 = vor.u32 1.1754944e-38, %v5038_v41 }
 0x560   : > { %v5013_v8 = vmul.f32 %v8739_v25, %v8733_v56  ;;  %vm5018_vm14 = vweird.f32 %v8739_v25 }
 0x561   : > { %8137 = vrcp.f32 %v5048_v37  ;;  %vm5055_vm10 = vweird.f32 %v5048_v37  ;;  %v5061_v15 = vand.u32 2147483648, %v5048_v37  ;;  %v5059_v6 = vand.u32 2147483647, %v5048_v37  ;;  %vm8766_vm2 = vmor %vm5017_vm13, %vm5018_vm14 }
 0x562   : > { %8139 = vrcp.f32 %v8737_v20  ;;  %v5014_v27 = vsub.f32 1.0, %v5013_v8 }
 0x563   : > { %v5062_v39 = vor.u32 1.1754944e-38, %v5061_v15  ;;  %vm5060_vm15 = vcmp.eq.f32.partialorder %v5059_v6, 8.507059e+37 }
 0x564   : > { %v8136_v21 = vpop.eup %8135  ;;  %v5015_v61 = vmul.f32 %v8739_v25, %v5014_v27 }
 0x565   : > { %v8742_v59 = vadd.f32 1.0, %v8136_v21 }
 0x566   : > { %v5016_v16 = vadd.f32 %v8739_v25, %v5015_v61 }
 0x567   : > { %v8138_v53 = vpop.eup %8137  ;;  %8141 = vrcp.f32 %v8742_v59  ;;  %vm5070_vm0 = vweird.f32 %v8742_v59  ;;  %v5076_v5 = vand.u32 2147483648, %v8742_v59  ;;  %v5074_v57 = vand.u32 2147483647, %v8742_v59 }
 0x568   : > { %v5051_v50 = vmul.f32 %v8138_v53, %v5048_v37  ;;  %v8747_v14 = vpop.eup %8139  ;;  %vm5056_vm11 = vweird.f32 %v8138_v53  ;;  %v5020_v23 = vsel %vm8766_vm2, %v8739_v25, %v5016_v16 }
 0x569   : > { %v5028_v58 = vmul.f32 %v8747_v14, %v8737_v20  ;;  %vm8753_vm12 = vmor %vm5055_vm10, %vm5056_vm11  ;;  %vm5033_vm6 = vweird.f32 %v8747_v14  ;;  %v5077_v22 = vor.u32 1.1754944e-38, %v5076_v5  ;;  %vm5075_vm7 = vcmp.eq.f32.partialorder %v5074_v57, 8.507059e+37 }
 0x56a   : > { %v5052_v54 = vsub.f32 1.0, %v5051_v50  ;;  %vm5034_vm8 = vmor %vm5032_vm5, %vm5033_vm6 }
 0x56b   : > { %v5029_v62 = vsub.f32 1.0, %v5028_v58 }
 0x56c   : > { %v5053_v10 = vmul.f32 %v8138_v53, %v5052_v54 }
 0x56d   : > { %v8142_v2 = vpop.eup %8141  ;;  %v5030_v11 = vmul.f32 %v8747_v14, %v5029_v62 }
 0x56e   : > { %v5066_v60 = vmul.f32 %v8142_v2, %v8742_v59  ;;  %v5054_v31 = vadd.f32 %v8138_v53, %v5053_v10  ;;  %vm5071_vm1 = vweird.f32 %v8142_v2 }
 0x56f   : > { %v4901_v55 = vpop.f32.mrf.mxu0  ;;  %vm8773_vm3 = vmor %vm5070_vm0, %vm5071_vm1  ;;  %v5031_v46 = vadd.f32 %v8747_v14, %v5030_v11 }
 0x570   : > { %v5067_v9 = vsub.f32 1.0, %v5066_v60  ;;  %v5058_v42 = vsel %vm8753_vm12, %v8138_v53, %v5054_v31  ;;  %v8835_v60 = vld [vmem:[#allocation11_spill] sm:$0xff] }
 0x571   : > { %v4914_v30 = vpop.f32.mrf.mxu1  ;;  %v5063_v43 = vsel %vm5060_vm15, %v5062_v39, %v5058_v42 }
 0x572   : > { %v4915_v4 = vadd.f32 %v4914_v30, %v4901_v55  ;;  %v5068_v51 = vmul.f32 %v8142_v2, %v5067_v9  ;;  %v5120_v12 = vmul.f32 %v5063_v43, %v4016_v49 }
 0x574   : > { %v5000_v7 = vadd.f32 %v4915_v4, %v8455_v18  ;;  %v5024_v18 = vor.u32 1.1754944e-38, %v5023_v38  ;;  %v5069_v63 = vadd.f32 %v8142_v2, %v5068_v51 }
 0x575   : > { %v4927_v17 = vpop.f32.mrf.mxu2 }
 0x576   : > { %8143 = vtanh.f32 %v5000_v7  ;;  %v5025_v44 = vsel %vm5022_vm4, %v5024_v18, %v5020_v23  ;;  %v5073_v56 = vsel %vm8773_vm3, %v8142_v2, %v5069_v63 }
 0x577   : > { %v4940_v13 = vpop.f32.mrf.mxu3  ;;  %v4903_v48 = vpop.f32.mrf.mxu0  ;;  %v5078_v37 = vsel %vm5075_vm7, %v5077_v22, %v5073_v56 }
 0x578   : > { %v4941_v36 = vadd.f32 %v4940_v13, %v4927_v17  ;;  %v5121_v20 = vmul.f32 %v5078_v37, %v4017_v32 }
 0x579   : > { %v4916_v28 = vpop.f32.mrf.mxu1 }
 0x57a   : > { %v5001_v0 = vadd.f32 %v4941_v36, %v8457_v19  ;;  %v5035_v19 = vsel %vm5034_vm8, %v8747_v14, %v5031_v46 }
 0x57b   : > { %v5040_v21 = vsel %vm5037_vm9, %v5039_v45, %v5035_v19 }
 0x57c   : > { %v8144_v40 = vpop.eup %8143  ;;  %8145 = vtanh.f32 %v5001_v0 }
 0x57d   : > { %v5122_v47 = vmul.f32 %v8144_v40, %v5025_v44  ;;  %v4929_v52 = vpop.f32.mrf.mxu2 }
 0x57f   : > { %v5124_v29 = vadd.f32 %v5122_v47, %v5120_v12  ;;  %v4942_v26 = vpop.f32.mrf.mxu3 }
 0x581   : > { %5130 = vst [vmem:[#allocation3 + $0x8] sm:$0xff] %v5124_v29 }
 0x582   : > { %v8146_v25 = vpop.eup %8145 }
 0x583   : > { %v5123_v59 = vmul.f32 %v8146_v25, %v5040_v21 }
 0x585   : > { %v5125_v53 = vadd.f32 %v5123_v59, %v5121_v20 }
 0x587   : > { %5131 = vst [vmem:[#allocation3] sm:$0xff] %v5125_v53 }
 0x58f   : > { %v4953_v8 = vpop.f32.mrf.mxu0 }
 0x591   : > { %v4966_v50 = vpop.f32.mrf.mxu1 }
 0x592   : > { %v4967_v54 = vadd.f32 %v4966_v50, %v4953_v8 }
 0x594   : > { %v5002_v27 = vadd.f32 %v4967_v54, %v8459_v24 }
 0x595   : > { %v4979_v2 = vpop.f32.mrf.mxu2 }
 0x596   : > { %v7452_v10 = vmul.f32 -1.442695, %v5002_v27 }
 0x597   : > { %v4992_v58 = vpop.f32.mrf.mxu3  ;;  %v4955_v15 = vpop.f32.mrf.mxu0 }
 0x598   : > { %8147 = vpow2.f32 %v7452_v10  ;;  %v4993_v14 = vadd.f32 %v4992_v58, %v4979_v2 }
 0x599   : > { %v4968_v55 = vpop.f32.mrf.mxu1 }
 0x59a   : > { %v5003_v30 = vadd.f32 %v4993_v14, %v8835_v60 }
 0x59c   : > { %v7453_v61 = vmul.f32 -1.442695, %v5003_v30 }
 0x59d   : > { %v4981_v1 = vpop.f32.mrf.mxu2 }
 0x59e   : > { %v8148_v31 = vpop.eup %8147  ;;  %8149 = vpow2.f32 %v7453_v61 }
 0x59f   : > { %v5088_v6 = vadd.f32 1.0, %v8148_v31  ;;  %v4994_v4 = vpop.f32.mrf.mxu3 }
 0x5a1   : > { %8151 = vrcp.f32 %v5088_v6  ;;  %v5101_v7 = vand.u32 2147483648, %v5088_v6  ;;  %vm5095_vm10 = vweird.f32 %v5088_v6  ;;  %v5099_v51 = vand.u32 2147483647, %v5088_v6 }
 0x5a3   : > { %v5102_v35 = vor.u32 1.1754944e-38, %v5101_v7  ;;  %vm5100_vm13 = vcmp.eq.f32.partialorder %v5099_v51, 8.507059e+37 }
 0x5a4   : > { %v8150_v9 = vpop.eup %8149 }
 0x5a5   : > { %v5089_v38 = vadd.f32 1.0, %v8150_v9 }
 0x5a7   : > { %v8152_v62 = vpop.eup %8151  ;;  %8153 = vrcp.f32 %v5089_v38  ;;  %v5116_v11 = vand.u32 2147483648, %v5089_v38  ;;  %v5114_v57 = vand.u32 2147483647, %v5089_v38  ;;  %vm5110_vm15 = vweird.f32 %v5089_v38 }
 0x5a8   : > { %v5091_v24 = vmul.f32 %v8152_v62, %v5088_v6  ;;  %8155 = vtanh.f32 %v5124_v29  ;;  %vm5096_vm11 = vweird.f32 %v8152_v62 }
 0x5a9   : > { %vm5097_vm12 = vmor %vm5095_vm10, %vm5096_vm11  ;;  %8157 = vtanh.f32 %v5125_v53  ;;  %v5117_v33 = vor.u32 1.1754944e-38, %v5116_v11  ;;  %vm5115_vm1 = vcmp.eq.f32.partialorder %v5114_v57, 8.507059e+37 }
 0x5aa   : > { %v5092_v39 = vsub.f32 1.0, %v5091_v24 }
 0x5ac   : > { %v5093_v34 = vmul.f32 %v8152_v62, %v5092_v39 }
 0x5ad   : > { %v8154_v16 = vpop.eup %8153 }
 0x5ae   : > { %v5094_v42 = vadd.f32 %v8152_v62, %v5093_v34  ;;  %v5106_v5 = vmul.f32 %v8154_v16, %v5089_v38  ;;  %v8156_v17 = vpop.eup %8155  ;;  %vm5111_vm14 = vweird.f32 %v8154_v16 }
 0x5af   : > { %vm5112_vm0 = vmor %vm5110_vm15, %vm5111_vm14  ;;  %v8158_v36 = vpop.eup %8157 }
 0x5b0   : > { %v5098_v18 = vsel %vm5097_vm12, %v8152_v62, %v5094_v42  ;;  %v5107_v43 = vsub.f32 1.0, %v5106_v5 }
 0x5b1   : > { %v5103_v49 = vsel %vm5100_vm13, %v5102_v35, %v5098_v18 }
 0x5b2   : > { %v5128_v13 = vmul.f32 %v8156_v17, %v5103_v49  ;;  %v5108_v63 = vmul.f32 %v8154_v16, %v5107_v43 }
 0x5b4   : > { %5132 = vst [vmem:[#allocation2] sm:$0xff] %v5128_v13  ;;  %v5109_v48 = vadd.f32 %v8154_v16, %v5108_v63 }
 0x5b6   : > { %v5113_v23 = vsel %vm5112_vm0, %v8154_v16, %v5109_v48 }
 0x5b7   : > { %v5118_v28 = vsel %vm5115_vm1, %v5117_v33, %v5113_v23 }
 0x5b8   : > { %v5129_v3 = vmul.f32 %v8158_v36, %v5118_v28 }
 0x5ba   : > { %5133 = vst [vmem:[#allocation2 + $0x8] sm:$0xff] %v5129_v3 }
 0x5bb PF: > { %p7454_p12 = scmp.ne.s32.totalorder %s8315_s22, 1 }
 0x5bd   : > { %5137 = sbr.rel (%p7454_p12) target bundleno = 1637 (0x665), region = 80 }
 0x5c2   : > { %v5155_v22 = vld [vmem:[#allocation8 + $0x78] sm:$0xff]  ;;  %v5154_v12 = vld [vmem:[#allocation8 + $0x70] sm:$0xff]  ;;  %v5153_v40 = vld [vmem:[#allocation8 + $0x68] sm:$0xff] }
 0x5c3   : > { %v5171_v0 = vld [vmem:[#allocation8 + $0xf8] sm:$0xff]  ;;  %5176 = vmatpush.msra.mxu0 %v5155_v22  ;;  %v5170_v41 = vld [vmem:[#allocation8 + $0xf0] sm:$0xff]  ;;  %v5169_v44 = vld [vmem:[#allocation8 + $0xe8] sm:$0xff] }
 0x5c4   : > { %5196 = vmatpush.msra.mxu1 %v5171_v0  ;;  %v5152_v46 = vld [vmem:[#allocation8 + $0x60] sm:$0xff]  ;;  %v5151_v47 = vld [vmem:[#allocation8 + $0x58] sm:$0xff]  ;;  %v5150_v32 = vld [vmem:[#allocation8 + $0x50] sm:$0xff] }
 0x5c5   : > { %5177 = vmatpush.msra.mxu0 %v5154_v12  ;;  %v5168_v56 = vld [vmem:[#allocation8 + $0xe0] sm:$0xff]  ;;  %v5167_v29 = vld [vmem:[#allocation8 + $0xd8] sm:$0xff]  ;;  %v5166_v45 = vld [vmem:[#allocation8 + $0xd0] sm:$0xff] }
 0x5c6   : > { %5197 = vmatpush.msra.mxu1 %v5170_v41  ;;  %v5149_v37 = vld [vmem:[#allocation8 + $0x48] sm:$0xff]  ;;  %v5148_v19 = vld [vmem:[#allocation8 + $0x40] sm:$0xff]  ;;  %v5147_v20 = vld [vmem:[#allocation8 + $0x38] sm:$0xff] }
 0x5c7   : > { %5178 = vmatpush.msra.mxu0 %v5153_v40  ;;  %v5165_v52 = vld [vmem:[#allocation8 + $0xc8] sm:$0xff]  ;;  %v5164_v26 = vld [vmem:[#allocation8 + $0xc0] sm:$0xff]  ;;  %v5163_v25 = vld [vmem:[#allocation8 + $0xb8] sm:$0xff] }
 0x5c8   : > { %5198 = vmatpush.msra.mxu1 %v5169_v44  ;;  %v5146_v21 = vld [vmem:[#allocation8 + $0x30] sm:$0xff]  ;;  %v5145_v53 = vld [vmem:[#allocation8 + $0x28] sm:$0xff]  ;;  %v5144_v50 = vld [vmem:[#allocation8 + $0x20] sm:$0xff] }
 0x5c9   : > { %5179 = vmatpush.msra.mxu0 %v5152_v46  ;;  %v5162_v59 = vld [vmem:[#allocation8 + $0xb0] sm:$0xff]  ;;  %v5161_v8 = vld [vmem:[#allocation8 + $0xa8] sm:$0xff]  ;;  %v5160_v54 = vld [vmem:[#allocation8 + $0xa0] sm:$0xff] }
 0x5ca   : > { %5199 = vmatpush.msra.mxu1 %v5168_v56  ;;  %v5143_v27 = vld [vmem:[#allocation8 + $0x18] sm:$0xff]  ;;  %v5142_v2 = vld [vmem:[#allocation8 + $0x10] sm:$0xff]  ;;  %v5141_v15 = vld [vmem:[#allocation8 + $0x8] sm:$0xff] }
 0x5cb   : > { %5180 = vmatpush.msra.mxu0 %v5151_v47  ;;  %v5159_v10 = vld [vmem:[#allocation8 + $0x98] sm:$0xff]  ;;  %v5158_v58 = vld [vmem:[#allocation8 + $0x90] sm:$0xff]  ;;  %v5157_v14 = vld [vmem:[#allocation8 + $0x88] sm:$0xff] }
 0x5cc   : > { %5200 = vmatpush.msra.mxu1 %v5167_v29  ;;  %v5140_v55 = vld [vmem:[#allocation8] sm:$0xff]  ;;  %v5139_v61 = vld [vmem:[#allocation2 + $0x8] sm:$0xff] }
 0x5cd   : > { %5181 = vmatpush.msra.mxu0 %v5150_v32  ;;  %v5156_v60 = vld [vmem:[#allocation8 + $0x80] sm:$0xff] }
 0x5ce   : > { %5201 = vmatpush.msra.mxu1 %v5166_v45  ;;  %v5138_v30 = vld [vmem:[#allocation2] sm:$0xff] }
 0x5cf   : > { %5182 = vmatpush.msra.mxu0 %v5149_v37  ;;  %v8159_v31 = vld [vmem:[%s8806_s5] ss:$0 sm:$0xff] }
 0x5d0   : > { %5202 = vmatpush.msra.mxu1 %v5165_v52 }
 0x5d1   : > { %5183 = vmatpush.msra.mxu0 %v5148_v19 }
 0x5d2   : > { %5203 = vmatpush.msra.mxu1 %v5164_v26 }
 0x5d3   : > { %5184 = vmatpush.msra.mxu0 %v5147_v20 }
 0x5d4   : > { %5204 = vmatpush.msra.mxu1 %v5163_v25 }
 0x5d5   : > { %5185 = vmatpush.msra.mxu0 %v5146_v21 }
 0x5d6   : > { %5205 = vmatpush.msra.mxu1 %v5162_v59 }
 0x5d7   : > { %5186 = vmatpush.msra.mxu0 %v5145_v53 }
 0x5d8   : > { %5206 = vmatpush.msra.mxu1 %v5161_v8 }
 0x5d9   : > { %5187 = vmatpush.msra.mxu0 %v5144_v50 }
 0x5da   : > { %5207 = vmatpush.msra.mxu1 %v5160_v54 }
 0x5db   : > { %5188 = vmatpush.msra.mxu0 %v5143_v27 }
 0x5dc   : > { %5208 = vmatpush.msra.mxu1 %v5159_v10 }
 0x5dd   : > { %5189 = vmatpush.msra.mxu0 %v5142_v2 }
 0x5de   : > { %5209 = vmatpush.msra.mxu1 %v5158_v58 }
 0x5df   : > { %5190 = vmatpush.msra.mxu0 %v5141_v15 }
 0x5e0   : > { %5210 = vmatpush.msra.mxu1 %v5157_v14 }
 0x5e1   : > { %5191 = vmatpush.msra.mxu0 %v5140_v55 }
 0x5e2   : > { %5211 = vmatpush.msra.mxu1 %v5156_v60  ;;  %5192 = vmatmul.f32.vlgmr.msra.gmra.mxu0 %v5138_v30 }
 0x5e3   : > { %5212 = vmatmul.f32.vlgmr.msra.gmra.mxu1 %v5139_v61 }
 0x65f   : > { %v5193_v6 = vpop.f32.mrf.mxu0 }
 0x660   : > { %v5213_v1 = vpop.f32.mrf.mxu1  ;;  %v5194_v4 = vadd.f32 %v8159_v31, %v5193_v6 }
 0x662   : > { %v5214_v9 = vadd.f32 %v5213_v1, %v5194_v4 }
 0x664   : > { %5216 = vst [vmem:[%s8807_s6] sm:$0xff] %v5214_v9 }
 0x665 PF: > { %s18_s21 = sadd.s32 1, %s8264_s21  }
 0x666   : > { %p15_p13 = scmp.ge.s32.totalorder %s18_s21, 4  }
 0x668   :  { %17 = sbr.rel (!%p15_p13) target bundleno = 2 (0x2), region = 107 }
 0x66d   :  { %5228 = vsyncpa [#allocation5], 1 }
 0x66e   :  { %5230 = vsyncpa [#allocation5 + $0x1], 1 }
 0x66f   :  { %5231 = vsyncpa [#allocation7], 1 }

</bundles_post_ra>
